<compile_context>
chip_gen: v5e
topology: v5e:2x2
jax: 0.10.0
libtpu: 0.0.40
codegen_flags: <defaults>
</compile_context>

<pallas_src>
import functools

import jax
import jax.numpy as jnp
from jax.experimental import pallas as pl
from jax.experimental.pallas import tpu as pltpu

F32 = jnp.float32
BF16 = jnp.bfloat16


def _vmem_limit_bytes():
    # ~75% of physical VMEM (64 MiB on v7x, 128 MiB on v5e/v6e); safe fallback.
    try:
        cap = getattr(pltpu.get_tpu_info(), "vmem_capacity_bytes", None)
        if cap:
            return int(cap) * 3 // 4
    except Exception:
        pass
    return 48 * 1024 * 1024


_VMEM_LIMIT = _vmem_limit_bytes()


# --------------------------------------------------------------------------
# Pallas kernels
# --------------------------------------------------------------------------
def _conv3x3_kernel(*refs, n_in, H, W, relu):
    # refs: x_0..x_{n_in-1}  (1, H+2, W+2, Cin_i)  bf16 (padded input, halo=1)
    #       w_0..w_{n_in-1}  (9, Cin_i, Tco)       bf16
    #       s_ref, b_ref     (1, Tco)              f32 (folded BN scale/bias)
    #       o_ref            (1, H*W, Tco)
    x_refs = refs[:n_in]
    w_refs = refs[n_in:2 * n_in]
    s_ref, b_ref, o_ref = refs[2 * n_in:]
    Tco = o_ref.shape[-1]
    acc = jnp.zeros((H * W, Tco), F32)
    for x_ref, w_ref in zip(x_refs, w_refs):
        Cin = x_ref.shape[-1]
        for dy in range(3):
            for dx in range(3):
                patch = x_ref[0, dy:dy + H, dx:dx + W, :].reshape(H * W, Cin)
                acc = acc + jnp.dot(patch, w_ref[dy * 3 + dx],
                                    preferred_element_type=F32)
    y = acc * s_ref[0] + b_ref[0]          # f32 epilogue (v5e has no bf16 VPU)
    if relu:
        y = jnp.maximum(y, 0.0)
    o_ref[0] = y.astype(o_ref.dtype)


def _dense_kernel(x_ref, w_ref, b_ref, o_ref, *, relu):
    # x: (1, M, Cin) bf16   w: (Cin, Cout) bf16   b: (1, Cout) f32
    y = jnp.dot(x_ref[0], w_ref[...], preferred_element_type=F32) + b_ref[0]
    if relu:
        y = jnp.maximum(y, 0.0)
    o_ref[0] = y.astype(o_ref.dtype)


def _upconv_kernel(x_ref, w_ref, b_ref, o_ref, *, H, W, Cout):
    # x: (1, H*W, Cin) bf16   w: (Cin, 4*Cout) bf16 (tap-major dy,dx)
    # b: (1, 4*Cout) f32      o: (1, H, 2, W, 2*Cout) -> free reshape to
    #                              (N, 2H, 2W, Cout) outside.
    y = jnp.dot(x_ref[0], w_ref[...], preferred_element_type=F32) + b_ref[0]
    for dy in range(2):
        blk = y[:, dy * 2 * Cout:(dy + 1) * 2 * Cout]      # (H*W, 2*Cout)
        o_ref[0, :, dy] = blk.reshape(H, W, 2 * Cout).astype(o_ref.dtype)


def _maxpool_kernel(x_ref, o_ref):
    # x: (1, H, Wo, 2C)  (free HBM view of (1,H,W,C));  o: (1, Ho, Wo, C)
    Ho = o_ref.shape[1]
    C = o_ref.shape[-1]
    for i in range(Ho):
        a = jnp.maximum(x_ref[0, 2 * i], x_ref[0, 2 * i + 1])   # (Wo, 2C)
        o_ref[0, i] = jnp.maximum(a[:, :C], a[:, C:])           # (Wo, C)


# --------------------------------------------------------------------------
# Pallas call wrappers
# --------------------------------------------------------------------------
def _conv3x3_call(x_pads, w_taps, scale, bias, relu, out_dtype):
    N, Hp2, Wp2, _ = x_pads[0].shape
    H, W = Hp2 - 2, Wp2 - 2
    Cout = w_taps[0].shape[-1]
    Tco = Cout if Cout <= 256 else 256          # output-channel tile
    assert Cout % Tco == 0, (Cout, Tco)
    nco = Cout // Tco
    n_in = len(x_pads)
    kernel = functools.partial(_conv3x3_kernel, n_in=n_in, H=H, W=W, relu=relu)
    in_specs = (
        [pl.BlockSpec((1, Hp2, Wp2, xp.shape[-1]), lambda c, n: (n, 0, 0, 0))
         for xp in x_pads]
        + [pl.BlockSpec((9, wt.shape[1], Tco), lambda c, n: (0, 0, c))
           for wt in w_taps]
        + [pl.BlockSpec((1, Tco), lambda c, n: (0, c)),
           pl.BlockSpec((1, Tco), lambda c, n: (0, c))])
    return pl.pallas_call(
        kernel,
        out_shape=jax.ShapeDtypeStruct((N, H * W, Cout), out_dtype),
        grid=(nco, N),                      # N inner => weight block reused
        in_specs=in_specs,
        out_specs=pl.BlockSpec((1, H * W, Tco), lambda c, n: (n, 0, c)),
        compiler_params=pltpu.CompilerParams(
            dimension_semantics=("parallel", "parallel"),
            vmem_limit_bytes=_VMEM_LIMIT),
    )(*x_pads, *w_taps, scale.reshape(1, Cout), bias.reshape(1, Cout))


def conv3x3_bn_relu(xs, w, conv_b, gamma, beta, rmean, rvar, eps=1e-5,
                    out_dtype=BF16):
    """xs: NHWC input or list of NHWC inputs (implicit channel concat).
    w: (Cout, sum(Cin_i), 3, 3) torch layout. Fused inference-BN + ReLU."""
    if not isinstance(xs, (list, tuple)):
        xs = [xs]
    N, H, W, _ = xs[0].shape
    Cout = w.shape[0]
    x_pads, w_taps, off = [], [], 0
    for x in xs:
        Cin = x.shape[-1]
        w_i = w[:, off:off + Cin]
        off += Cin
        Cin_p = max(Cin, 8)                 # pad tiny Cin (first layer Cin=1)
        if Cin_p != Cin:
            x = jnp.pad(x, ((0, 0), (0, 0), (0, 0), (0, Cin_p - Cin)))
            w_i = jnp.pad(w_i, ((0, 0), (0, Cin_p - Cin), (0, 0), (0, 0)))
        x_pads.append(jnp.pad(x, ((0, 0), (1, 1), (1, 1), (0, 0))).astype(BF16))
        w_taps.append(
            jnp.transpose(w_i, (2, 3, 1, 0)).reshape(9, Cin_p, Cout).astype(BF16))
    assert off == w.shape[1]
    scale = (gamma / jnp.sqrt(rvar + eps)).astype(F32)
    bias = ((conv_b - rmean) * scale + beta).astype(F32)
    y = _conv3x3_call(x_pads, w_taps, scale, bias, relu=True,
                      out_dtype=out_dtype)
    return y.reshape(N, H, W, Cout)


def conv1x1(x, w, b, out_dtype=F32):
    """x: (N,H,W,Cin); w: (Cout,Cin,1,1) torch layout. No activation.
    Cout is padded to 128 for lane-dense stores; extra channels sliced off."""
    N, H, W, Cin = x.shape
    Cout = w.shape[0]
    Cout_p = max(Cout, 128)
    w_p = jnp.pad(w, ((0, Cout_p - Cout), (0, 0), (0, 0), (0, 0)))
    b_p = jnp.pad(b, (0, Cout_p - Cout))
    wk = jnp.transpose(w_p, (2, 3, 1, 0)).reshape(Cin, Cout_p).astype(BF16)
    xf = x.reshape(N, H * W, Cin).astype(BF16)
    y = pl.pallas_call(
        functools.partial(_dense_kernel, relu=False),
        out_shape=jax.ShapeDtypeStruct((N, H * W, Cout_p), out_dtype),
        grid=(N,),
        in_specs=[pl.BlockSpec((1, H * W, Cin), lambda n: (n, 0, 0)),
                  pl.BlockSpec((Cin, Cout_p), lambda n: (0, 0)),
                  pl.BlockSpec((1, Cout_p), lambda n: (0, 0))],
        out_specs=pl.BlockSpec((1, H * W, Cout_p), lambda n: (n, 0, 0)),
        compiler_params=pltpu.CompilerParams(
            dimension_semantics=("parallel",),
            vmem_limit_bytes=_VMEM_LIMIT),
    )(xf, wk, b_p.reshape(1, Cout_p).astype(F32))
    return y.reshape(N, H, W, Cout_p)[..., :Cout]


def maxpool2x2(x):
    N, H, W, C = x.shape
    Ho, Wo = H // 2, W // 2
    xr = x.reshape(N, H, Wo, 2 * C)        # free HBM reshape (same order)
    return pl.pallas_call(
        _maxpool_kernel,
        out_shape=jax.ShapeDtypeStruct((N, Ho, Wo, C), x.dtype),
        grid=(N,),
        in_specs=[pl.BlockSpec((1, H, Wo, 2 * C), lambda n: (n, 0, 0, 0))],
        out_specs=pl.BlockSpec((1, Ho, Wo, C), lambda n: (n, 0, 0, 0)),
        compiler_params=pltpu.CompilerParams(
            dimension_semantics=("parallel",),
            vmem_limit_bytes=_VMEM_LIMIT),
    )(xr)


def upconv2x2(x, w, b, out_dtype=BF16):
    """ConvTranspose2d(k=2, stride=2). x: (N,H,W,Cin); w: (Cin,Cout,2,2)."""
    N, H, W, Cin = x.shape
    Cout = w.shape[1]
    wk = jnp.transpose(w, (0, 2, 3, 1)).reshape(Cin, 4 * Cout).astype(BF16)
    bk = jnp.tile(b, 4).reshape(1, 4 * Cout).astype(F32)
    xf = x.reshape(N, H * W, Cin).astype(BF16)
    y = pl.pallas_call(
        functools.partial(_upconv_kernel, H=H, W=W, Cout=Cout),
        out_shape=jax.ShapeDtypeStruct((N, H, 2, W, 2 * Cout), out_dtype),
        grid=(N,),
        in_specs=[pl.BlockSpec((1, H * W, Cin), lambda n: (n, 0, 0)),
                  pl.BlockSpec((Cin, 4 * Cout), lambda n: (0, 0)),
                  pl.BlockSpec((1, 4 * Cout), lambda n: (0, 0))],
        out_specs=pl.BlockSpec((1, H, 2, W, 2 * Cout),
                               lambda n: (n, 0, 0, 0, 0)),
        compiler_params=pltpu.CompilerParams(
            dimension_semantics=("parallel",),
            vmem_limit_bytes=_VMEM_LIMIT),
    )(xf, wk, bk)
    return y.reshape(N, 2 * H, 2 * W, Cout)   # free HBM reshape


# --------------------------------------------------------------------------
# Parameters (deterministic, in-script) and forward pass
# --------------------------------------------------------------------------
def _conv_block_params(key, in_c, out_c):
    k = jax.random.split(key, 4)

    def conv_w(kk, ci, co):
        std = (2.0 / (ci * 9)) ** 0.5
        return jax.random.normal(kk, (co, ci, 3, 3), F32) * std

    def bn(co):
        return (jnp.ones((co,), F32), jnp.zeros((co,), F32),
                jnp.zeros((co,), F32), jnp.ones((co,), F32))

    g1, be1, m1, v1 = bn(out_c)
    g2, be2, m2, v2 = bn(out_c)
    return {
        "w1": conv_w(k[0], in_c, out_c),
        "b1": jax.random.normal(k[1], (out_c,), F32) * 0.01,
        "g1": g1, "be1": be1, "m1": m1, "v1": v1,
        "w2": conv_w(k[2], out_c, out_c),
        "b2": jax.random.normal(k[3], (out_c,), F32) * 0.01,
        "g2": g2, "be2": be2, "m2": m2, "v2": v2,
    }


def _upconv_params(key, in_c, out_c):
    k = jax.random.split(key, 2)
    std = (2.0 / (in_c * 4)) ** 0.5
    return {"w": jax.random.normal(k[0], (in_c, out_c, 2, 2), F32) * std,
            "b": jax.random.normal(k[1], (out_c,), F32) * 0.01}


def init_params(key):
    names_enc = [("enc1", 1, 64), ("enc2", 64, 128), ("enc3", 128, 256),
                 ("enc4", 256, 512), ("enc5", 512, 1024)]
    names_dec = [("dec1", 1024, 512), ("dec2", 512, 256),
                 ("dec3", 256, 128), ("dec4", 128, 64)]
    names_up = [("up1", 1024, 512), ("up2", 512, 256),
                ("up3", 256, 128), ("up4", 128, 64)]
    keys = jax.random.split(key, len(names_enc) + len(names_dec) + len(names_up) + 1)
    params, i = {}, 0
    for name, ci, co in names_enc + names_dec:
        params[name] = _conv_block_params(keys[i], ci, co); i += 1
    for name, ci, co in names_up:
        params[name] = _upconv_params(keys[i], ci, co); i += 1
    ko = jax.random.split(keys[i], 2)
    params["out"] = {"w": jax.random.normal(ko[0], (1, 64, 1, 1), F32) * (1.0 / 8.0),
                     "b": jax.random.normal(ko[1], (1,), F32) * 0.01}
    return params


def _block(params, name, xs):
    p = params[name]
    h = conv3x3_bn_relu(xs, p["w1"], p["b1"], p["g1"], p["be1"], p["m1"], p["v1"])
    h = conv3x3_bn_relu(h, p["w2"], p["b2"], p["g2"], p["be2"], p["m2"], p["v2"])
    return h  # Dropout(0.2): identity in eval semantics (see TODO above)


def unet_forward(params, x_nchw):
    x = jnp.transpose(x_nchw, (0, 2, 3, 1))  # NCHW -> NHWC
    c1 = _block(params, "enc1", x)
    c2 = _block(params, "enc2", maxpool2x2(c1))
    c3 = _block(params, "enc3", maxpool2x2(c2))
    c4 = _block(params, "enc4", maxpool2x2(c3))
    c5 = _block(params, "enc5", maxpool2x2(c4))
    u1 = upconv2x2(c5, params["up1"]["w"], params["up1"]["b"])
    d1 = _block(params, "dec1", [u1, c4])     # no concat materialization
    u2 = upconv2x2(d1, params["up2"]["w"], params["up2"]["b"])
    d2 = _block(params, "dec2", [u2, c3])
    u3 = upconv2x2(d2, params["up3"]["w"], params["up3"]["b"])
    d3 = _block(params, "dec3", [u3, c2])
    u4 = upconv2x2(d3, params["up4"]["w"], params["up4"]["b"])
    d4 = _block(params, "dec4", [u4, c1])
    out = conv1x1(d4, params["out"]["w"], params["out"]["b"], out_dtype=F32)
    return jnp.transpose(out, (0, 3, 1, 2))  # NHWC -> NCHW


if __name__ == "__main__":
    key = jax.random.PRNGKey(0)
    pkey, xkey = jax.random.split(key)
    params = init_params(pkey)
    x = jax.random.normal(xkey, (2, 1, 16, 16), F32)  # NCHW, 1 input channel
    y = unet_forward(params, x)
    y = jax.block_until_ready(y)
    assert y.shape == (2, 1, 16, 16), y.shape
    assert bool(jnp.all(jnp.isfinite(y)))
    print("KERNEL_OK")
</pallas_src>

<mosaic_0001>
module attributes {stable_mosaic.version = 11 : i64} {
  func.func @_conv3x3_kernel(%arg0: i32, %arg1: i32, %arg2: memref<1x18x18x8xbf16, #tpu.memory_space<vmem>>, %arg3: memref<9x8x64xbf16, #tpu.memory_space<vmem>>, %arg4: memref<1x64xf32, #tpu.memory_space<vmem>>, %arg5: memref<1x64xf32, #tpu.memory_space<vmem>>, %arg6: memref<1x256x64xbf16, #tpu.memory_space<vmem>>) attributes {dimension_semantics = [#tpu.dimension_semantics<parallel>, #tpu.dimension_semantics<parallel>], iteration_bounds = array<i64: 1, 2>, scalar_prefetch = 0 : i64, scratch_operands = 0 : i64, tpu.core_type = #tpu.core_type<tc>, window_params = [{transform_indices = @transform_0, window_bounds = array<i64: 1, 18, 18, 8>}, {transform_indices = @transform_1, window_bounds = array<i64: 9, 8, 64>}, {transform_indices = @transform_2, window_bounds = array<i64: 1, 64>}, {transform_indices = @transform_3, window_bounds = array<i64: 1, 64>}, {transform_indices = @transform_4, window_bounds = array<i64: 1, 256, 64>}]} {
    %cst = arith.constant 0.000000e+00 : f32
    %0 = vector.broadcast %cst : f32 to vector<256x64xf32>
    %c0 = arith.constant 0 : index
    %c0_0 = arith.constant 0 : index
    %c0_1 = arith.constant 0 : index
    %c0_2 = arith.constant 0 : index
    %1 = vector.load %arg2[%c0, %c0_0, %c0_1, %c0_2] : memref<1x18x18x8xbf16, #tpu.memory_space<vmem>>, vector<1x16x16x8xbf16>
    %2 = vector.shape_cast %1 : vector<1x16x16x8xbf16> to vector<16x16x8xbf16>
    %3 = vector.shape_cast %2 : vector<16x16x8xbf16> to vector<256x8xbf16>
    %c0_3 = arith.constant 0 : index
    %c0_4 = arith.constant 0 : index
    %c0_5 = arith.constant 0 : index
    %4 = vector.load %arg3[%c0_3, %c0_4, %c0_5] : memref<9x8x64xbf16, #tpu.memory_space<vmem>>, vector<1x8x64xbf16>
    %5 = vector.shape_cast %4 : vector<1x8x64xbf16> to vector<8x64xbf16>
    %cst_6 = arith.constant dense<0.000000e+00> : vector<256x64xf32>
    %6 = tpu.matmul %3, %5, %cst_6 {dimension_numbers = #tpu.dot_dimension_numbers<[1], [0], [0], [1], [0, 0, 1, 1], [], []>} : vector<256x8xbf16>, vector<8x64xbf16>, vector<256x64xf32> -> vector<256x64xf32>
    %7 = arith.addf %0, %6 : vector<256x64xf32>
    %c0_7 = arith.constant 0 : index
    %c0_8 = arith.constant 0 : index
    %c1 = arith.constant 1 : index
    %c0_9 = arith.constant 0 : index
    %8 = vector.load %arg2[%c0_7, %c0_8, %c1, %c0_9] : memref<1x18x18x8xbf16, #tpu.memory_space<vmem>>, vector<1x16x16x8xbf16>
    %9 = vector.shape_cast %8 : vector<1x16x16x8xbf16> to vector<16x16x8xbf16>
    %10 = vector.shape_cast %9 : vector<16x16x8xbf16> to vector<256x8xbf16>
    %c1_10 = arith.constant 1 : index
    %c0_11 = arith.constant 0 : index
    %c0_12 = arith.constant 0 : index
    %11 = vector.load %arg3[%c1_10, %c0_11, %c0_12] : memref<9x8x64xbf16, #tpu.memory_space<vmem>>, vector<1x8x64xbf16>
    %12 = vector.shape_cast %11 : vector<1x8x64xbf16> to vector<8x64xbf16>
    %cst_13 = arith.constant dense<0.000000e+00> : vector<256x64xf32>
    %13 = tpu.matmul %10, %12, %cst_13 {dimension_numbers = #tpu.dot_dimension_numbers<[1], [0], [0], [1], [0, 0, 1, 1], [], []>} : vector<256x8xbf16>, vector<8x64xbf16>, vector<256x64xf32> -> vector<256x64xf32>
    %14 = arith.addf %7, %13 : vector<256x64xf32>
    %c0_14 = arith.constant 0 : index
    %c0_15 = arith.constant 0 : index
    %c2 = arith.constant 2 : index
    %c0_16 = arith.constant 0 : index
    %15 = vector.load %arg2[%c0_14, %c0_15, %c2, %c0_16] : memref<1x18x18x8xbf16, #tpu.memory_space<vmem>>, vector<1x16x16x8xbf16>
    %16 = vector.shape_cast %15 : vector<1x16x16x8xbf16> to vector<16x16x8xbf16>
    %17 = vector.shape_cast %16 : vector<16x16x8xbf16> to vector<256x8xbf16>
    %c2_17 = arith.constant 2 : index
    %c0_18 = arith.constant 0 : index
    %c0_19 = arith.constant 0 : index
    %18 = vector.load %arg3[%c2_17, %c0_18, %c0_19] : memref<9x8x64xbf16, #tpu.memory_space<vmem>>, vector<1x8x64xbf16>
    %19 = vector.shape_cast %18 : vector<1x8x64xbf16> to vector<8x64xbf16>
    %cst_20 = arith.constant dense<0.000000e+00> : vector<256x64xf32>
    %20 = tpu.matmul %17, %19, %cst_20 {dimension_numbers = #tpu.dot_dimension_numbers<[1], [0], [0], [1], [0, 0, 1, 1], [], []>} : vector<256x8xbf16>, vector<8x64xbf16>, vector<256x64xf32> -> vector<256x64xf32>
    %21 = arith.addf %14, %20 : vector<256x64xf32>
    %c0_21 = arith.constant 0 : index
    %c1_22 = arith.constant 1 : index
    %c0_23 = arith.constant 0 : index
    %c0_24 = arith.constant 0 : index
    %22 = vector.load %arg2[%c0_21, %c1_22, %c0_23, %c0_24] : memref<1x18x18x8xbf16, #tpu.memory_space<vmem>>, vector<1x16x16x8xbf16>
    %23 = vector.shape_cast %22 : vector<1x16x16x8xbf16> to vector<16x16x8xbf16>
    %24 = vector.shape_cast %23 : vector<16x16x8xbf16> to vector<256x8xbf16>
    %c3 = arith.constant 3 : index
    %c0_25 = arith.constant 0 : index
    %c0_26 = arith.constant 0 : index
    %25 = vector.load %arg3[%c3, %c0_25, %c0_26] : memref<9x8x64xbf16, #tpu.memory_space<vmem>>, vector<1x8x64xbf16>
    %26 = vector.shape_cast %25 : vector<1x8x64xbf16> to vector<8x64xbf16>
    %cst_27 = arith.constant dense<0.000000e+00> : vector<256x64xf32>
    %27 = tpu.matmul %24, %26, %cst_27 {dimension_numbers = #tpu.dot_dimension_numbers<[1], [0], [0], [1], [0, 0, 1, 1], [], []>} : vector<256x8xbf16>, vector<8x64xbf16>, vector<256x64xf32> -> vector<256x64xf32>
    %28 = arith.addf %21, %27 : vector<256x64xf32>
    %c0_28 = arith.constant 0 : index
    %c1_29 = arith.constant 1 : index
    %c1_30 = arith.constant 1 : index
    %c0_31 = arith.constant 0 : index
    %29 = vector.load %arg2[%c0_28, %c1_29, %c1_30, %c0_31] : memref<1x18x18x8xbf16, #tpu.memory_space<vmem>>, vector<1x16x16x8xbf16>
    %30 = vector.shape_cast %29 : vector<1x16x16x8xbf16> to vector<16x16x8xbf16>
    %31 = vector.shape_cast %30 : vector<16x16x8xbf16> to vector<256x8xbf16>
    %c4 = arith.constant 4 : index
    %c0_32 = arith.constant 0 : index
    %c0_33 = arith.constant 0 : index
    %32 = vector.load %arg3[%c4, %c0_32, %c0_33] : memref<9x8x64xbf16, #tpu.memory_space<vmem>>, vector<1x8x64xbf16>
    %33 = vector.shape_cast %32 : vector<1x8x64xbf16> to vector<8x64xbf16>
    %cst_34 = arith.constant dense<0.000000e+00> : vector<256x64xf32>
    %34 = tpu.matmul %31, %33, %cst_34 {dimension_numbers = #tpu.dot_dimension_numbers<[1], [0], [0], [1], [0, 0, 1, 1], [], []>} : vector<256x8xbf16>, vector<8x64xbf16>, vector<256x64xf32> -> vector<256x64xf32>
    %35 = arith.addf %28, %34 : vector<256x64xf32>
    %c0_35 = arith.constant 0 : index
    %c1_36 = arith.constant 1 : index
    %c2_37 = arith.constant 2 : index
    %c0_38 = arith.constant 0 : index
    %36 = vector.load %arg2[%c0_35, %c1_36, %c2_37, %c0_38] : memref<1x18x18x8xbf16, #tpu.memory_space<vmem>>, vector<1x16x16x8xbf16>
    %37 = vector.shape_cast %36 : vector<1x16x16x8xbf16> to vector<16x16x8xbf16>
    %38 = vector.shape_cast %37 : vector<16x16x8xbf16> to vector<256x8xbf16>
    %c5 = arith.constant 5 : index
    %c0_39 = arith.constant 0 : index
    %c0_40 = arith.constant 0 : index
    %39 = vector.load %arg3[%c5, %c0_39, %c0_40] : memref<9x8x64xbf16, #tpu.memory_space<vmem>>, vector<1x8x64xbf16>
    %40 = vector.shape_cast %39 : vector<1x8x64xbf16> to vector<8x64xbf16>
    %cst_41 = arith.constant dense<0.000000e+00> : vector<256x64xf32>
    %41 = tpu.matmul %38, %40, %cst_41 {dimension_numbers = #tpu.dot_dimension_numbers<[1], [0], [0], [1], [0, 0, 1, 1], [], []>} : vector<256x8xbf16>, vector<8x64xbf16>, vector<256x64xf32> -> vector<256x64xf32>
    %42 = arith.addf %35, %41 : vector<256x64xf32>
    %c0_42 = arith.constant 0 : index
    %c2_43 = arith.constant 2 : index
    %c0_44 = arith.constant 0 : index
    %c0_45 = arith.constant 0 : index
    %43 = vector.load %arg2[%c0_42, %c2_43, %c0_44, %c0_45] : memref<1x18x18x8xbf16, #tpu.memory_space<vmem>>, vector<1x16x16x8xbf16>
    %44 = vector.shape_cast %43 : vector<1x16x16x8xbf16> to vector<16x16x8xbf16>
    %45 = vector.shape_cast %44 : vector<16x16x8xbf16> to vector<256x8xbf16>
    %c6 = arith.constant 6 : index
    %c0_46 = arith.constant 0 : index
    %c0_47 = arith.constant 0 : index
    %46 = vector.load %arg3[%c6, %c0_46, %c0_47] : memref<9x8x64xbf16, #tpu.memory_space<vmem>>, vector<1x8x64xbf16>
    %47 = vector.shape_cast %46 : vector<1x8x64xbf16> to vector<8x64xbf16>
    %cst_48 = arith.constant dense<0.000000e+00> : vector<256x64xf32>
    %48 = tpu.matmul %45, %47, %cst_48 {dimension_numbers = #tpu.dot_dimension_numbers<[1], [0], [0], [1], [0, 0, 1, 1], [], []>} : vector<256x8xbf16>, vector<8x64xbf16>, vector<256x64xf32> -> vector<256x64xf32>
    %49 = arith.addf %42, %48 : vector<256x64xf32>
    %c0_49 = arith.constant 0 : index
    %c2_50 = arith.constant 2 : index
    %c1_51 = arith.constant 1 : index
    %c0_52 = arith.constant 0 : index
    %50 = vector.load %arg2[%c0_49, %c2_50, %c1_51, %c0_52] : memref<1x18x18x8xbf16, #tpu.memory_space<vmem>>, vector<1x16x16x8xbf16>
    %51 = vector.shape_cast %50 : vector<1x16x16x8xbf16> to vector<16x16x8xbf16>
    %52 = vector.shape_cast %51 : vector<16x16x8xbf16> to vector<256x8xbf16>
    %c7 = arith.constant 7 : index
    %c0_53 = arith.constant 0 : index
    %c0_54 = arith.constant 0 : index
    %53 = vector.load %arg3[%c7, %c0_53, %c0_54] : memref<9x8x64xbf16, #tpu.memory_space<vmem>>, vector<1x8x64xbf16>
    %54 = vector.shape_cast %53 : vector<1x8x64xbf16> to vector<8x64xbf16>
    %cst_55 = arith.constant dense<0.000000e+00> : vector<256x64xf32>
    %55 = tpu.matmul %52, %54, %cst_55 {dimension_numbers = #tpu.dot_dimension_numbers<[1], [0], [0], [1], [0, 0, 1, 1], [], []>} : vector<256x8xbf16>, vector<8x64xbf16>, vector<256x64xf32> -> vector<256x64xf32>
    %56 = arith.addf %49, %55 : vector<256x64xf32>
    %c0_56 = arith.constant 0 : index
    %c2_57 = arith.constant 2 : index
    %c2_58 = arith.constant 2 : index
    %c0_59 = arith.constant 0 : index
    %57 = vector.load %arg2[%c0_56, %c2_57, %c2_58, %c0_59] : memref<1x18x18x8xbf16, #tpu.memory_space<vmem>>, vector<1x16x16x8xbf16>
    %58 = vector.shape_cast %57 : vector<1x16x16x8xbf16> to vector<16x16x8xbf16>
    %59 = vector.shape_cast %58 : vector<16x16x8xbf16> to vector<256x8xbf16>
    %c8 = arith.constant 8 : index
    %c0_60 = arith.constant 0 : index
    %c0_61 = arith.constant 0 : index
    %60 = vector.load %arg3[%c8, %c0_60, %c0_61] : memref<9x8x64xbf16, #tpu.memory_space<vmem>>, vector<1x8x64xbf16>
    %61 = vector.shape_cast %60 : vector<1x8x64xbf16> to vector<8x64xbf16>
    %cst_62 = arith.constant dense<0.000000e+00> : vector<256x64xf32>
    %62 = tpu.matmul %59, %61, %cst_62 {dimension_numbers = #tpu.dot_dimension_numbers<[1], [0], [0], [1], [0, 0, 1, 1], [], []>} : vector<256x8xbf16>, vector<8x64xbf16>, vector<256x64xf32> -> vector<256x64xf32>
    %63 = arith.addf %56, %62 : vector<256x64xf32>
    %c0_63 = arith.constant 0 : index
    %c0_64 = arith.constant 0 : index
    %64 = vector.load %arg4[%c0_63, %c0_64] : memref<1x64xf32, #tpu.memory_space<vmem>>, vector<1x64xf32>
    %65 = vector.shape_cast %64 : vector<1x64xf32> to vector<64xf32>
    %66 = vector.shape_cast %65 : vector<64xf32> to vector<1x64xf32>
    %67 = vector.broadcast %66 : vector<1x64xf32> to vector<256x64xf32>
    %68 = arith.mulf %63, %67 : vector<256x64xf32>
    %c0_65 = arith.constant 0 : index
    %c0_66 = arith.constant 0 : index
    %69 = vector.load %arg5[%c0_65, %c0_66] : memref<1x64xf32, #tpu.memory_space<vmem>>, vector<1x64xf32>
    %70 = vector.shape_cast %69 : vector<1x64xf32> to vector<64xf32>
    %71 = vector.shape_cast %70 : vector<64xf32> to vector<1x64xf32>
    %72 = vector.broadcast %71 : vector<1x64xf32> to vector<256x64xf32>
    %73 = arith.addf %68, %72 : vector<256x64xf32>
    %cst_67 = arith.constant 0.000000e+00 : f32
    %74 = vector.broadcast %cst_67 : f32 to vector<256x64xf32>
    %75 = arith.maximumf %73, %74 : vector<256x64xf32>
    %76 = arith.truncf %75 : vector<256x64xf32> to vector<256x64xbf16>
    %c0_68 = arith.constant 0 : index
    %c0_69 = arith.constant 0 : index
    %c0_70 = arith.constant 0 : index
    %77 = vector.load %arg6[%c0_68, %c0_69, %c0_70] : memref<1x256x64xbf16, #tpu.memory_space<vmem>>, vector<1x256x64xbf16>
    %78 = vector.shape_cast %77 : vector<1x256x64xbf16> to vector<256x64xbf16>
    %79 = vector.shape_cast %76 : vector<256x64xbf16> to vector<1x256x64xbf16>
    tpu.vector_store %arg6[%c0_68, %c0_69, %c0_70], %79 {strides = array<i32>} : memref<1x256x64xbf16, #tpu.memory_space<vmem>>, vector<1x256x64xbf16>,
    return
  }
  func.func @transform_0(%arg0: i32, %arg1: i32) -> (i32, i32, i32, i32) {
    %c0_i32 = arith.constant 0 : i32
    %c0_i32_0 = arith.constant 0 : i32
    %c0_i32_1 = arith.constant 0 : i32
    %c0_i32_2 = arith.constant 0 : i32
    return %arg1, %c0_i32, %c0_i32_0, %c0_i32_1 : i32, i32, i32, i32
  }
  func.func @transform_1(%arg0: i32, %arg1: i32) -> (i32, i32, i32) {
    %c0_i32 = arith.constant 0 : i32
    %c0_i32_0 = arith.constant 0 : i32
    %c0_i32_1 = arith.constant 0 : i32
    return %c0_i32, %c0_i32_0, %arg0 : i32, i32, i32
  }
  func.func @transform_2(%arg0: i32, %arg1: i32) -> (i32, i32) {
    %c0_i32 = arith.constant 0 : i32
    %c0_i32_0 = arith.constant 0 : i32
    return %c0_i32, %arg0 : i32, i32
  }
  func.func @transform_3(%arg0: i32, %arg1: i32) -> (i32, i32) {
    %c0_i32 = arith.constant 0 : i32
    %c0_i32_0 = arith.constant 0 : i32
    return %c0_i32, %arg0 : i32, i32
  }
  func.func @transform_4(%arg0: i32, %arg1: i32) -> (i32, i32, i32) {
    %c0_i32 = arith.constant 0 : i32
    %c0_i32_0 = arith.constant 0 : i32
    return %arg1, %c0_i32, %arg0 : i32, i32, i32
  }
}

</mosaic_0001>

<bundles_post_ra>
// kernel: tpu_custom_call.1
= control target key start
LH: loop header
LB: loop body
LE: loop exit
PB: predicated region body
PF: predicated region fallthrough
CT: control target
= control target key end

     0   :  { %s5238_s15 = smov 0   ;;  %s5240_s16 = smov 0   ;;  %s6737_s0 = inlined_call_operand.vmem [shape: bf16[2,18,18,8], index: 0, kind: input, shape index: {}]   ;;  %s6738_s1 = inlined_call_operand.vmem [shape: bf16[9,8,64], index: 1, kind: input, shape index: {}]   ;;  %s6739_s2 = inlined_call_operand.vmem [shape: f32[1,64], index: 2, kind: input, shape index: {}]   ;;  %s6740_s3 = inlined_call_operand.vmem [shape: f32[1,64], index: 3, kind: input, shape index: {}]   ;;  %s6741_s4 = inlined_call_operand.vmem [shape: bf16[2,256,64], index: 4, kind: output, shape index: {}]  }
   0x1   :  { %s5242_s17 = smov 0  }
   0x2 LB: > { %s23_s18 = sadd.s32 1, %s5207_s16  ;;  %p4468_p0 = scmp.ge.s32.totalorder %s5211_s17, 1  ;;  %s5211_s17 = sphi %s5242_s17, %s14_s17   ;;  %s5207_s16 = sphi %s5240_s16, %s6753_s16   ;;  %s5203_s15 = sphi %s5238_s15, %s6752_s15  }
   0x3   : > { %p24_p1 = scmp.ge.s32.totalorder %s23_s18, 2  ;;  %p201_p2 = scmp.lt.s32.totalorder %s5211_s17, 3 }
   0x5   : > { %s6755_s18 = smov (%p24_p1, %s23_s18), 0  ;;  %p202_p3 = pnand %p4468_p0, %p201_p2 }
   0x7   : > { %205 = sbr.rel (%p202_p3) target bundleno = 763 (0x2fb), region = 36 }
   0xc   : > { %v4472_v0 = vld [vmem:[%s6738_s1 + $0x4] sm:$0xf]  ;;  %vm799_vm0 = vcmask 1043456   ;;  %p240_p4 = scmp.lt.s32.totalorder %s5203_s15, 1  ;;  %v4585_v2 = vld [vmem:[%s6738_s1 + $0x8] sm:$0xf] }
   0xd   : > { %v801_v1 = vsel %vm799_vm0, %v4472_v0, 0  ;;  %v1374_v3 = vsel %vm799_vm0, %v4585_v2, 0  ;;  %v4634_v4 = vld [vmem:[%s6738_s1 + $0xc] sm:$0xf]  ;;  %v296_v5 = vld [vmem:[%s6738_s1] sm:$0xf] }
   0xe   : > { %5107 = vmatpush.bf16.msra.mxu1 %v801_v1  ;;  %5108 = vmatpush.bf16.msra.mxu2 %v801_v1  ;;  %s6757_s15 = smov (!%p240_p4, %s5203_s15), 1  ;;  %v4763_v6 = vld [vmem:[%s6738_s1 + $0x10] sm:$0xf]  ;;  %v1661_v7 = vsel %vm799_vm0, %v4634_v4, 0  ;;  %v1021_v8 = vsel %vm799_vm0, %v296_v5, 0  ;;  %vm750_vm4 = vcmask 64512  }
   0xf   : > { %5109 = vmatpush.bf16.msra.mxu3 %v801_v1  ;;  %810 = vmatpush.bf16.msra.mxu0 %v801_v1  ;;  %s5110_s29 = smul.u32 216, %s6757_s15  ;;  %v2315_v9 = vsel %vm799_vm0, %v4763_v6, 0  ;;  %vm313_vm1 = vsmask.f32 3328  ;;  %vm314_vm2 = vsmask.f32 7440 }
  0x10   : > { %vm5294_vm3 = vmor %vm313_vm1, %vm314_vm2  ;;  %vm1160_vm5 = vcmask 1042432   ;;  %vm1161_vm6 = vcmask 1046532   ;;  %s5058_s23 = sshll.u32 %s6757_s15, 7  ;;  %vm4311_vm8 = vcmask 519168  }
  0x11   : > { %s5282_s6 = scalar_lea.vmem %s6737_s0, %s5110_s29  ;;  %vm5468_vm7 = vmor %vm1160_vm5, %vm1161_vm6  ;;  %s6367_s25 = scalar_lea.vmem %s6741_s4, %s5058_s23 }
  0x12   : > { %1383 = vmatpush.bf16.msrb.mxu2 %v1374_v3  ;;  %1030 = vmatpush.bf16.msrb.mxu1 %v1021_v8  ;;  %v272_v10 = vld [vmem:[%s5282_s6 + $0x30] sm:$0xf]  ;;  %v273_v11 = vld [vmem:[%s5282_s6 + $0x34] sm:$0xf]  ;;  %v301_v12 = vld [vmem:[%s5282_s6 + $0x38] sm:$0x1] }
  0x13   : > { %1670 = vmatpush.bf16.msrb.mxu3 %v1661_v7  ;;  %2324 = vmatpush.bf16.msrb.mxu0 %v2315_v9  ;;  %v413_v13 = vshrl.u32 %v272_v10, 16  ;;  %v416_v14 = vshll.u32 %v272_v10, 16  ;;  %v422_v15 = vshll.u32 %v273_v11, 16  ;;  %v426_v16 = vshrl.u32 %v273_v11, 16  ;;  %v280_v17 = vld [vmem:[%s5282_s6 + $0x60] sm:$0xf] }
  0x14   : > { %v432_v18 = vshll.u32 %v301_v12, 16  ;;  %v281_v19 = vld [vmem:[%s5282_s6 + $0x64] sm:$0xf]  ;;  %v305_v20 = vld [vmem:[%s5282_s6 + $0x68] sm:$0x1]  ;;  %v509_v21 = vshrl.u32 %v280_v17, 16 }
  0x15   : > { %v415_v22 = vrot.slane %v413_v13, 4  ;;  %v418_v23 = vrot.slane %v416_v14, 5  ;;  %v424_v24 = vrot.slane %v422_v15, 5  ;;  %v428_v25 = vrot.slane %v426_v16, 4  ;;  %v288_v26 = vld [vmem:[%s5282_s6 + $0x90] sm:$0xf] }
  0x16   : > { %v434_v27 = vrot.slane %v432_v18, 5  ;;  %v511_v28 = vrot.slane %v509_v21, 4  ;;  %v512_v29 = vshll.u32 %v280_v17, 16  ;;  %v518_v30 = vshll.u32 %v281_v19, 16  ;;  %v289_v35 = vld [vmem:[%s5282_s6 + $0x94] sm:$0xf] }
  0x17   : > { %v419_v31 = vor.u32 %v418_v23, %v415_v22  ;;  %v429_v32 = vor.u32 %v428_v25, %v424_v24  ;;  %v522_v33 = vshrl.u32 %v281_v19, 16  ;;  %v528_v34 = vshll.u32 %v305_v20, 16  ;;  %v309_v45 = vld [vmem:[%s5282_s6 + $0x98] sm:$0x1]  ;;  %v264_v61 = vld [vmem:[%s5282_s6] sm:$0xf] }
  0x18   : > { %v514_v37 = vrot.slane %v512_v29, 5  ;;  %v520_v38 = vrot.slane %v518_v30, 5  ;;  %v605_v39 = vshrl.u32 %v288_v26, 16  ;;  %v608_v47 = vshll.u32 %v288_v26, 16  ;;  %v5307_v1 = vld [vmem:[%s5282_s6 + $0x4] sm:$0xf] }
  0x19   : > { %v420_v40 = vrot.slane %v419_v31, 4  ;;  %v430_v41 = vrot.slane %v429_v32, 4  ;;  %v524_v42 = vrot.slane %v522_v33, 4  ;;  %v530_v43 = vrot.slane %v528_v34, 5  ;;  %v5310_v2 = vld [vmem:[%s5282_s6 + $0x8] sm:$0x1] }
  0x1a   : > { %v515_v44 = vor.u32 %v514_v37, %v511_v28  ;;  %v607_v46 = vrot.slane %v605_v39, 4  ;;  %v614_v48 = vshll.u32 %v289_v35, 16  ;;  %v618_v52 = vshrl.u32 %v289_v35, 16  ;;  %v274_v19 = vld [vmem:[%s5282_s6 + $0x3c] sm:$0xf] }
  0x1b   : > { %v425_v49 = vsel %vm5294_vm3, %v420_v40, %v424_v24  ;;  %v435_v50 = vsel %vm5294_vm3, %v430_v41, %v434_v27  ;;  %v525_v51 = vor.u32 %v524_v42, %v520_v38  ;;  %v610_v56 = vrot.slane %v608_v47, 5  ;;  %v5322_v20 = vld [vmem:[%s5282_s6 + $0x40] sm:$0xf]  ;;  %v5327_v25 = vld [vmem:[%s5282_s6 + $0x44] sm:$0x1] }
  0x1c   : > { %v710_v53 = vunpack.c.l.b16 %v425_v49  ;;  %v711_v54 = vunpack.c.l.b16 %v435_v50  ;;  %v516_v55 = vrot.slane %v515_v44, 4  ;;  %v616_v58 = vrot.slane %v614_v48, 5  ;;  %v282_v33 = vld [vmem:[%s5282_s6 + $0x6c] sm:$0xf]  ;;  %v306_v47 = vld [vmem:[%s5282_s6 + $0x74] sm:$0x1] }
  0x1d   : > { %v526_v57 = vrot.slane %v525_v51, 4  ;;  %v620_v59 = vrot.slane %v618_v52, 4  ;;  %v624_v60 = vshll.u32 %v309_v45, 16  ;;  %v611_v0 = vor.u32 %v610_v56, %v607_v46 }
  0x1e   : > { %v738_v62 = vpack.c.b16 %v711_v54, %v710_v53  ;;  %v521_v63 = vsel %vm5294_vm3, %v516_v55, %v520_v38  ;;  %v317_v9 = vshrl.u32 %v264_v61, 16  ;;  %v320_v10 = vshll.u32 %v264_v61, 16  ;;  %v290_v61 = vld [vmem:[%s5282_s6 + $0x9c] sm:$0xf] }
  0x1f   : > { %v531_v3 = vsel %vm5294_vm3, %v526_v57, %v530_v43  ;;  %v718_v4 = vunpack.c.l.b16 %v521_v63  ;;  %v621_v5 = vor.u32 %v620_v59, %v616_v58  ;;  %v626_v6 = vrot.slane %v624_v60, 5  ;;  %v283_v43 = vld [vmem:[%s5282_s6 + $0x70] sm:$0xf] }
  0x20   : > { %4477 = vmatmul.msk.bf16.vlgmr.msra.gmra.mxu1 %vm750_vm4, %v738_v62  ;;  %v719_v7 = vunpack.c.l.b16 %v531_v3  ;;  %v612_v8 = vrot.slane %v611_v0, 4  ;;  %v326_v12 = vshll.u32 %v5307_v1, 16  ;;  %v330_v13 = vshrl.u32 %v5307_v1, 16  ;;  %v291_v3 = vld [vmem:[%s5282_s6 + $0xa0] sm:$0xf] }
  0x21   : > { %v622_v11 = vrot.slane %v621_v5, 4  ;;  %v336_v14 = vshll.u32 %v5310_v2, 16  ;;  %v319_v17 = vrot.slane %v317_v9, 4  ;;  %v322_v18 = vrot.slane %v320_v10, 5 }
  0x22   : > { %v742_v15 = vpack.c.b16 %v719_v7, %v718_v4  ;;  %v617_v16 = vsel %vm5294_vm3, %v612_v8, %v616_v58  ;;  %v328_v23 = vrot.slane %v326_v12, 5  ;;  %v332_v24 = vrot.slane %v330_v13, 4  ;;  %v310_v8 = vld [vmem:[%s5282_s6 + $0xa4] sm:$0x1] }
  0x23   : > { %v627_v21 = vsel %vm5294_vm3, %v622_v11, %v626_v6  ;;  %v726_v22 = vunpack.c.l.b16 %v617_v16  ;;  %v323_v27 = vor.u32 %v322_v18, %v319_v17  ;;  %v338_v28 = vrot.slane %v336_v14, 5 }
  0x24   : > { %4481 = vmatmul.msk.bf16.vlgmr.msra.gmra.mxu2 %vm750_vm4, %v742_v15  ;;  %v727_v26 = vunpack.c.l.b16 %v627_v21  ;;  %v333_v29 = vor.u32 %v332_v24, %v328_v23  ;;  %v437_v30 = vshrl.u32 %v274_v19, 16  ;;  %v440_v31 = vshll.u32 %v274_v19, 16 }
  0x25   : > { %v446_v32 = vshll.u32 %v5322_v20, 16  ;;  %v324_v35 = vrot.slane %v323_v27, 4  ;;  %v450_v37 = vshrl.u32 %v5322_v20, 16  ;;  %v456_v38 = vshll.u32 %v5327_v25, 16 }
  0x26   : > { %v746_v34 = vpack.c.b16 %v727_v26, %v726_v22  ;;  %v334_v39 = vrot.slane %v333_v29, 4  ;;  %v439_v40 = vrot.slane %v437_v30, 4  ;;  %v442_v41 = vrot.slane %v440_v31, 5  ;;  %v266_v22 = vld [vmem:[%s5282_s6 + $0xc] sm:$0xf] }
  0x27   : > { %v448_v42 = vrot.slane %v446_v32, 5  ;;  %v329_v44 = vsel %vm5294_vm3, %v324_v35, %v328_v23  ;;  %v452_v45 = vrot.slane %v450_v37, 4  ;;  %v458_v46 = vrot.slane %v456_v38, 5  ;;  %v5356_v32 = vld [vmem:[%s5282_s6 + $0x14] sm:$0x1] }
  0x28   : > { %4485 = vmatmul.msk.bf16.vlgmr.msra.gmra.mxu3 %vm750_vm4, %v746_v34  ;;  %v533_v48 = vshrl.u32 %v282_v33, 16  ;;  %v339_v49 = vsel %vm5294_vm3, %v334_v39, %v338_v28  ;;  %v702_v50 = vunpack.c.l.b16 %v329_v44  ;;  %v443_v51 = vor.u32 %v442_v41, %v439_v40  ;;  %v5353_v28 = vld [vmem:[%s5282_s6 + $0x10] sm:$0xf] }
  0x29   : > { %v536_v52 = vshll.u32 %v282_v33, 16  ;;  %v703_v53 = vunpack.c.l.b16 %v339_v49  ;;  %v453_v54 = vor.u32 %v452_v45, %v448_v42  ;;  %v542_v56 = vshll.u32 %v283_v43, 16 }
  0x2a   : > { %v535_v55 = vrot.slane %v533_v48, 4  ;;  %v444_v57 = vrot.slane %v443_v51, 4  ;;  %v546_v59 = vshrl.u32 %v283_v43, 16  ;;  %v552_v60 = vshll.u32 %v306_v47, 16  ;;  %v5366_v47 = vld [vmem:[%s5282_s6 + $0x4c] sm:$0xf] }
  0x2b   : > { %v538_v58 = vrot.slane %v536_v52, 5  ;;  %v734_v62 = vpack.c.b16 %v703_v53, %v702_v50  ;;  %v454_v63 = vrot.slane %v453_v54, 4  ;;  %v544_v0 = vrot.slane %v542_v56, 5  ;;  %v5371_v56 = vld [vmem:[%s5282_s6 + $0x50] sm:$0x1] }
  0x2c   : > { %v449_v4 = vsel %vm5294_vm3, %v444_v57, %v448_v42  ;;  %v548_v6 = vrot.slane %v546_v59, 4  ;;  %v554_v7 = vrot.slane %v552_v60, 5  ;;  %v629_v11 = vshrl.u32 %v290_v61, 16  ;;  %v276_v42 = vld [vmem:[%s5282_s6 + $0x48] sm:$0xf] }
  0x2d   : > { %v539_v5 = vor.u32 %v538_v58, %v535_v55  ;;  %4473 = vmatmul.msk.bf16.vlgmr.msra.gmra.mxu0 %vm750_vm4, %v734_v62  ;;  %v459_v9 = vsel %vm5294_vm3, %v454_v63, %v458_v46  ;;  %v712_v10 = vunpack.c.l.b16 %v449_v4  ;;  %v632_v12 = vshll.u32 %v290_v61, 16 }
  0x2e   : > { %v713_v13 = vunpack.c.l.b16 %v459_v9  ;;  %v549_v15 = vor.u32 %v548_v6, %v544_v0  ;;  %v638_v16 = vshll.u32 %v291_v3, 16  ;;  %v631_v17 = vrot.slane %v629_v11, 4 }
  0x2f   : > { %v540_v14 = vrot.slane %v539_v5, 4  ;;  %v634_v18 = vrot.slane %v632_v12, 5  ;;  %v642_v19 = vshrl.u32 %v291_v3, 16  ;;  %v648_v21 = vshll.u32 %v310_v8, 16  ;;  %v284_v3 = vld [vmem:[%s5282_s6 + $0x78] sm:$0xf] }
  0x30   : > { %v739_v23 = vpack.c.b16 %v713_v13, %v712_v10  ;;  %v550_v26 = vrot.slane %v549_v15, 4  ;;  %v640_v27 = vrot.slane %v638_v16, 5  ;;  %v341_v35 = vshrl.u32 %v266_v22, 16  ;;  %v285_v8 = vld [vmem:[%s5282_s6 + $0x7c] sm:$0xf] }
  0x31   : > { %v545_v24 = vsel %vm5294_vm3, %v540_v14, %v544_v0  ;;  %v635_v30 = vor.u32 %v634_v18, %v631_v17  ;;  %v644_v31 = vrot.slane %v642_v19, 4  ;;  %v650_v34 = vrot.slane %v648_v21, 5  ;;  %v307_v16 = vld [vmem:[%s5282_s6 + $0x80] sm:$0x1] }
  0x32   : > { %v720_v29 = vunpack.c.l.b16 %v545_v24  ;;  %4478 = vmatmul.msk.bf16.gmra.mxu1 %vm750_vm4, %v739_v23  ;;  %v555_v33 = vsel %vm5294_vm3, %v550_v26, %v554_v7  ;;  %v344_v37 = vshll.u32 %v266_v22, 16  ;;  %v350_v41 = vshll.u32 %v5353_v28, 16 }
  0x33   : > { %v721_v38 = vunpack.c.l.b16 %v555_v33  ;;  %v636_v39 = vrot.slane %v635_v30, 4  ;;  %v645_v40 = vor.u32 %v644_v31, %v640_v27  ;;  %v343_v43 = vrot.slane %v341_v35, 4 }
  0x34   : > { %v346_v44 = vrot.slane %v344_v37, 5  ;;  %v354_v45 = vshrl.u32 %v5353_v28, 16  ;;  %v360_v46 = vshll.u32 %v5356_v32, 16  ;;  %v352_v51 = vrot.slane %v350_v41, 5 }
  0x35   : > { %v743_v48 = vpack.c.b16 %v721_v38, %v720_v29  ;;  %v641_v49 = vsel %vm5294_vm3, %v636_v39, %v640_v27  ;;  %v646_v50 = vrot.slane %v645_v40, 4  ;;  %v461_v58 = vshrl.u32 %v276_v42, 16  ;;  %v293_v39 = vld [vmem:[%s5282_s6 + $0xac] sm:$0xf]  ;;  %v311_v40 = vld [vmem:[%s5282_s6 + $0xb0] sm:$0x1] }
  0x36   : > { %v728_v52 = vunpack.c.l.b16 %v641_v49  ;;  %v347_v53 = vor.u32 %v346_v44, %v343_v43  ;;  %v356_v54 = vrot.slane %v354_v45, 4  ;;  %v362_v55 = vrot.slane %v360_v46, 5 }
  0x37   : > { %4482 = vmatmul.msk.bf16.gmra.mxu2 %vm750_vm4, %v743_v48  ;;  %v651_v57 = vsel %vm5294_vm3, %v646_v50, %v650_v34  ;;  %v464_v59 = vshll.u32 %v276_v42, 16  ;;  %v470_v60 = vshll.u32 %v5366_v47, 16  ;;  %v474_v0 = vshrl.u32 %v5366_v47, 16  ;;  %v292_v34 = vld [vmem:[%s5282_s6 + $0xa8] sm:$0xf] }
  0x38   : > { %v729_v61 = vunpack.c.l.b16 %v651_v57  ;;  %v348_v62 = vrot.slane %v347_v53, 4  ;;  %v357_v63 = vor.u32 %v356_v54, %v352_v51  ;;  %v463_v4 = vrot.slane %v461_v58, 4 }
  0x39   : > { %v466_v5 = vrot.slane %v464_v59, 5  ;;  %v472_v6 = vrot.slane %v470_v60, 5  ;;  %v480_v7 = vshll.u32 %v5371_v56, 16  ;;  %v476_v12 = vrot.slane %v474_v0, 4  ;;  %v268_v59 = vld [vmem:[%s5282_s6 + $0x18] sm:$0xf] }
  0x3a   : > { %v747_v9 = vpack.c.b16 %v729_v61, %v728_v52  ;;  %v353_v10 = vsel %vm5294_vm3, %v348_v62, %v352_v51  ;;  %v358_v11 = vrot.slane %v357_v63, 4  ;;  %v557_v17 = vshrl.u32 %v284_v3, 16  ;;  %v5399_v63 = vld [vmem:[%s5282_s6 + $0x1c] sm:$0xf]  ;;  %v5402_v0 = vld [vmem:[%s5282_s6 + $0x20] sm:$0x1] }
  0x3b   : > { %v704_v13 = vunpack.c.l.b16 %v353_v10  ;;  %v467_v14 = vor.u32 %v466_v5, %v463_v4  ;;  %v482_v15 = vrot.slane %v480_v7, 5  ;;  %v477_v19 = vor.u32 %v476_v12, %v472_v6 }
  0x3c   : > { %4486 = vmatmul.msk.bf16.gmra.mxu3 %vm750_vm4, %v747_v9  ;;  %v363_v18 = vsel %vm5294_vm3, %v358_v11, %v362_v55  ;;  %v560_v21 = vshll.u32 %v284_v3, 16  ;;  %v566_v22 = vshll.u32 %v285_v8, 16  ;;  %v559_v26 = vrot.slane %v557_v17, 4 }
  0x3d   : > { %v705_v23 = vunpack.c.l.b16 %v363_v18  ;;  %v468_v24 = vrot.slane %v467_v14, 4  ;;  %v570_v27 = vshrl.u32 %v285_v8, 16  ;;  %v478_v29 = vrot.slane %v477_v19, 4 }
  0x3e   : > { %v562_v30 = vrot.slane %v560_v21, 5  ;;  %v568_v31 = vrot.slane %v566_v22, 5  ;;  %v576_v33 = vshll.u32 %v307_v16, 16  ;;  %v653_v48 = vshrl.u32 %v292_v34, 16  ;;  %v5412_v21 = vld [vmem:[%s5282_s6 + $0x58] sm:$0xf] }
  0x3f   : > { %v735_v35 = vpack.c.b16 %v705_v23, %v704_v13  ;;  %v473_v37 = vsel %vm5294_vm3, %v468_v24, %v472_v6  ;;  %v572_v38 = vrot.slane %v570_v27, 4  ;;  %v483_v41 = vsel %vm5294_vm3, %v478_v29, %v482_v15  ;;  %v278_v15 = vld [vmem:[%s5282_s6 + $0x54] sm:$0xf]  ;;  %v5417_v27 = vld [vmem:[%s5282_s6 + $0x5c] sm:$0x1] }
  0x40   : > { %v714_v42 = vunpack.c.l.b16 %v473_v37  ;;  %v563_v43 = vor.u32 %v562_v30, %v559_v26  ;;  %v578_v44 = vrot.slane %v576_v33, 5  ;;  %v715_v45 = vunpack.c.l.b16 %v483_v41 }
  0x41   : > { %4474 = vmatmul.msk.bf16.gmra.mxu0 %vm750_vm4, %v735_v35  ;;  %v573_v46 = vor.u32 %v572_v38, %v568_v31  ;;  %v656_v49 = vshll.u32 %v292_v34, 16  ;;  %v662_v51 = vshll.u32 %v293_v39, 16  ;;  %v666_v52 = vshrl.u32 %v293_v39, 16  ;;  %v286_v39 = vld [vmem:[%s5282_s6 + $0x84] sm:$0xf] }
  0x42   : > { %v564_v50 = vrot.slane %v563_v43, 4  ;;  %v672_v53 = vshll.u32 %v311_v40, 16  ;;  %v740_v54 = vpack.c.b16 %v715_v45, %v714_v42  ;;  %v655_v57 = vrot.slane %v653_v48, 4 }
  0x43   : > { %v574_v55 = vrot.slane %v573_v46, 4  ;;  %v658_v58 = vrot.slane %v656_v49, 5  ;;  %v664_v61 = vrot.slane %v662_v51, 5  ;;  %v668_v62 = vrot.slane %v666_v52, 4  ;;  %v287_v49 = vld [vmem:[%s5282_s6 + $0x88] sm:$0xf] }
  0x44   : > { %v569_v60 = vsel %vm5294_vm3, %v564_v50, %v568_v31  ;;  %4479 = vmatmul.msk.bf16.gmra.mxu1 %vm750_vm4, %v740_v54  ;;  %v674_v6 = vrot.slane %v672_v53, 5  ;;  %v365_v9 = vshrl.u32 %v268_v59, 16  ;;  %v368_v10 = vshll.u32 %v268_v59, 16  ;;  %v308_v53 = vld [vmem:[%s5282_s6 + $0x8c] sm:$0x1] }
  0x45   : > { %v579_v3 = vsel %vm5294_vm3, %v574_v55, %v578_v44  ;;  %v722_v4 = vunpack.c.l.b16 %v569_v60  ;;  %v659_v5 = vor.u32 %v658_v58, %v655_v57  ;;  %v669_v8 = vor.u32 %v668_v62, %v664_v61 }
  0x46   : > { %v723_v7 = vunpack.c.l.b16 %v579_v3  ;;  %v374_v12 = vshll.u32 %v5399_v63, 16  ;;  %v378_v13 = vshrl.u32 %v5399_v63, 16  ;;  %v384_v14 = vshll.u32 %v5402_v0, 16 }
  0x47   : > { %v660_v11 = vrot.slane %v659_v5, 4  ;;  %v670_v17 = vrot.slane %v669_v8, 4  ;;  %v367_v18 = vrot.slane %v365_v9, 4  ;;  %v370_v19 = vrot.slane %v368_v10, 5  ;;  %v294_v8 = vld [vmem:[%s5282_s6 + $0xb4] sm:$0xf] }
  0x48   : > { %v744_v16 = vpack.c.b16 %v723_v7, %v722_v4  ;;  %v376_v23 = vrot.slane %v374_v12, 5  ;;  %v380_v24 = vrot.slane %v378_v13, 4  ;;  %v386_v26 = vrot.slane %v384_v14, 5  ;;  %v295_v12 = vld [vmem:[%s5282_s6 + $0xb8] sm:$0xf] }
  0x49   : > { %v665_v22 = vsel %vm5294_vm3, %v660_v11, %v664_v61  ;;  %v675_v29 = vsel %vm5294_vm3, %v670_v17, %v674_v6  ;;  %v371_v31 = vor.u32 %v370_v19, %v367_v18  ;;  %v485_v33 = vshrl.u32 %v278_v15, 16  ;;  %v312_v17 = vld [vmem:[%s5282_s6 + $0xbc] sm:$0x1] }
  0x4a   : > { %4483 = vmatmul.msk.bf16.gmra.mxu2 %vm750_vm4, %v744_v16  ;;  %v730_v30 = vunpack.c.l.b16 %v665_v22  ;;  %v731_v34 = vunpack.c.l.b16 %v675_v29  ;;  %v381_v35 = vor.u32 %v380_v24, %v376_v23  ;;  %v488_v37 = vshll.u32 %v278_v15, 16 }
  0x4b   : > { %v494_v38 = vshll.u32 %v5412_v21, 16  ;;  %v372_v40 = vrot.slane %v371_v31, 4  ;;  %v487_v41 = vrot.slane %v485_v33, 4  ;;  %v498_v42 = vshrl.u32 %v5412_v21, 16 }
  0x4c   : > { %v504_v43 = vshll.u32 %v5417_v27, 16  ;;  %v748_v44 = vpack.c.b16 %v731_v34, %v730_v30  ;;  %v382_v45 = vrot.slane %v381_v35, 4  ;;  %v490_v46 = vrot.slane %v488_v37, 5  ;;  %v270_v37 = vld [vmem:[%s5282_s6 + $0x24] sm:$0xf] }
  0x4d   : > { %v496_v48 = vrot.slane %v494_v38, 5  ;;  %v377_v50 = vsel %vm5294_vm3, %v372_v40, %v376_v23  ;;  %v500_v51 = vrot.slane %v498_v42, 4  ;;  %v581_v54 = vshrl.u32 %v286_v39, 16  ;;  %v5445_v42 = vld [vmem:[%s5282_s6 + $0x28] sm:$0xf] }
  0x4e   : > { %v506_v52 = vrot.slane %v504_v43, 5  ;;  %4487 = vmatmul.msk.bf16.gmra.mxu3 %vm750_vm4, %v748_v44  ;;  %v387_v55 = vsel %vm5294_vm3, %v382_v45, %v386_v26  ;;  %v706_v57 = vunpack.c.l.b16 %v377_v50  ;;  %v491_v58 = vor.u32 %v490_v46, %v487_v41 }
  0x4f   : > { %v584_v59 = vshll.u32 %v286_v39, 16  ;;  %v707_v60 = vunpack.c.l.b16 %v387_v55  ;;  %v501_v61 = vor.u32 %v500_v51, %v496_v48  ;;  %v583_v62 = vrot.slane %v581_v54, 4 }
  0x50   : > { %v590_v3 = vshll.u32 %v287_v49, 16  ;;  %v492_v4 = vrot.slane %v491_v58, 4  ;;  %v594_v6 = vshrl.u32 %v287_v49, 16  ;;  %v600_v7 = vshll.u32 %v308_v53, 16 }
  0x51   : > { %v586_v5 = vrot.slane %v584_v59, 5  ;;  %v736_v9 = vpack.c.b16 %v707_v60, %v706_v57  ;;  %v502_v10 = vrot.slane %v501_v61, 4  ;;  %v677_v22 = vshrl.u32 %v294_v8, 16  ;;  %v1112_v61 = vld [vmem:[%s5282_s6] sm:$0xe] }
  0x52   : > { %v592_v11 = vrot.slane %v590_v3, 5  ;;  %v497_v13 = vsel %vm5294_vm3, %v492_v4, %v496_v48  ;;  %v596_v15 = vrot.slane %v594_v6, 4  ;;  %v602_v16 = vrot.slane %v600_v7, 5  ;;  %v5449_v48 = vld [vmem:[%s5282_s6 + $0x2c] sm:$0x1] }
  0x53   : > { %v587_v14 = vor.u32 %v586_v5, %v583_v62  ;;  %4475 = vmatmul.msk.bf16.gmra.mxu0 %vm750_vm4, %v736_v9  ;;  %v507_v18 = vsel %vm5294_vm3, %v502_v10, %v506_v52  ;;  %v716_v19 = vunpack.c.l.b16 %v497_v13  ;;  %v680_v23 = vshll.u32 %v294_v8, 16  ;;  %v4715_v6 = vld [vmem:[%s5282_s6 + $0xc] sm:$0xf] }
  0x54   : > { %v717_v24 = vunpack.c.l.b16 %v507_v18  ;;  %v597_v29 = vor.u32 %v596_v15, %v592_v11  ;;  %v686_v30 = vshll.u32 %v295_v12, 16  ;;  %v679_v31 = vrot.slane %v677_v22, 4 }
  0x55   : > { %v588_v26 = vrot.slane %v587_v14, 4  ;;  %v682_v33 = vrot.slane %v680_v23, 5  ;;  %v690_v34 = vshrl.u32 %v295_v12, 16  ;;  %v696_v35 = vshll.u32 %v312_v17, 16  ;;  %v4716_v12 = vld [vmem:[%s5282_s6 + $0x10] sm:$0xf] }
  0x56   : > { %v741_v38 = vpack.c.b16 %v717_v24, %v716_v19  ;;  %v598_v40 = vrot.slane %v597_v29, 4  ;;  %v688_v41 = vrot.slane %v686_v30, 5  ;;  %v1168_v43 = vrot.slane %v5310_v2, 5 }
  0x57   : > { %v593_v39 = vsel %vm5294_vm3, %v588_v26, %v592_v11  ;;  %v683_v45 = vor.u32 %v682_v33, %v679_v31  ;;  %v692_v46 = vrot.slane %v690_v34, 4  ;;  %v698_v50 = vrot.slane %v696_v35, 5  ;;  %v4861_v11 = vld [vmem:[%s6738_s1 + $0x18] sm:$0xf] }
  0x58   : > { %v724_v44 = vunpack.c.l.b16 %v593_v39  ;;  %4480 = vmatmul.msk.bf16.gmra.mxu1 %vm750_vm4, %v741_v38  ;;  %v603_v49 = vsel %vm5294_vm3, %v598_v40, %v602_v16  ;;  %v389_v51 = vshrl.u32 %v270_v37, 16  ;;  %v392_v52 = vshll.u32 %v270_v37, 16  ;;  %v4717_v38 = vld [vmem:[%s5282_s6 + $0x14] sm:$0x1] }
  0x59   : > { %v725_v53 = vunpack.c.l.b16 %v603_v49  ;;  %v684_v54 = vrot.slane %v683_v45, 4  ;;  %v693_v55 = vor.u32 %v692_v46, %v688_v41  ;;  %v398_v2 = vshll.u32 %v5445_v42, 16  ;;  %v4990_v45 = vld [vmem:[%s6738_s1 + $0x1c] sm:$0xf] }
  0x5a   : > { %v391_v57 = vrot.slane %v389_v51, 4  ;;  %v394_v58 = vrot.slane %v392_v52, 5  ;;  %v402_v59 = vshrl.u32 %v5445_v42, 16  ;;  %v408_v60 = vshll.u32 %v5449_v48, 16  ;;  %v5059_v51 = vld [vmem:[%s5282_s6] sm:$0xff] }
  0x5b   : > { %v745_v62 = vpack.c.b16 %v725_v53, %v724_v44  ;;  %v689_v3 = vsel %vm5294_vm3, %v684_v54, %v688_v41  ;;  %v694_v4 = vrot.slane %v693_v55, 4  ;;  %v400_v5 = vrot.slane %v398_v2, 5  ;;  %v5039_v2 = vld [vmem:[%s6738_s1 + $0x20] sm:$0xf] }
  0x5c   : > { %v732_v7 = vunpack.c.l.b16 %v689_v3  ;;  %v395_v8 = vor.u32 %v394_v58, %v391_v57  ;;  %v404_v9 = vrot.slane %v402_v59, 4  ;;  %v410_v10 = vrot.slane %v408_v60, 5 }
  0x5d   : > { %4484 = vmatmul.msk.bf16.gmra.mxu2 %vm750_vm4, %v745_v62  ;;  %v699_v13 = vsel %vm5294_vm3, %v694_v4, %v698_v50  ;;  %v4569_v14 = vrot.slane %v1112_v61, 9  ;;  %v1165_v19 = vrot.slane %v5307_v1, 5  ;;  %v3000_v22 = vsel %vm799_vm0, %v4861_v11, 0  ;;  %v4812_v50 = vld [vmem:[%s6738_s1 + $0x14] sm:$0xf] }
  0x5e   : > { %v733_v15 = vunpack.c.l.b16 %v699_v13  ;;  %v396_v16 = vrot.slane %v395_v8, 4  ;;  %v405_v17 = vor.u32 %v404_v9, %v400_v5  ;;  %v1833_v23 = vshrl.u32 %v4715_v6, 16  ;;  %3009 = vmatpush.bf16.msra.mxu2 %v3000_v22  ;;  %v1113_v8 = vld [vmem:[%s5282_s6 + $0xc] sm:$0xe] }
  0x5f   : > { %v1836_v24 = vshll.u32 %v4715_v6, 16  ;;  %v1842_v26 = vshll.u32 %v4716_v12, 16  ;;  %v1166_v33 = vsel %vm5468_vm7, %v4569_v14, %v1165_v19  ;;  %v1167_v35 = vrot.slane %v1165_v19, 4  ;;  %v4719_v6 = vld [vmem:[%s5282_s6 + $0x1c] sm:$0xf] }
  0x60   : > { %v749_v29 = vpack.c.b16 %v733_v15, %v732_v7  ;;  %v401_v30 = vsel %vm5294_vm3, %v396_v16, %v400_v5  ;;  %v406_v31 = vrot.slane %v405_v17, 4  ;;  %v1277_v37 = vunpack.c.l.b16 %v1166_v33  ;;  %v4718_v5 = vld [vmem:[%s5282_s6 + $0x18] sm:$0xf]  ;;  %v5075_v15 = vld [vmem:[%s5282_s6 + $0xc] sm:$0xff] }
  0x61   : > { %v708_v34 = vunpack.c.l.b16 %v401_v30  ;;  %v1835_v1 = vrot.slane %v1833_v23, 4  ;;  %v1838_v40 = vrot.slane %v1836_v24, 5  ;;  %v1844_v41 = vrot.slane %v1842_v26, 5  ;;  %v4720_v30 = vld [vmem:[%s5282_s6 + $0x20] sm:$0x1] }
  0x62   : > { %4488 = vmatmul.msk.bf16.gmra.mxu3 %vm750_vm4, %v749_v29  ;;  %v411_v39 = vsel %vm5294_vm3, %v406_v31, %v410_v10  ;;  %v1846_v44 = vshrl.u32 %v4716_v12, 16  ;;  %v1169_v49 = vsel %vm5468_vm7, %v1167_v35, %v1168_v43  ;;  %v1852_v55 = vshll.u32 %v4717_v38, 16  ;;  %v5060_v35 = vld [vmem:[%s5282_s6 + $0xc] sm:$0xff] }
  0x63   : > { %v709_v46 = vunpack.c.l.b16 %v411_v39  ;;  %v1278_v52 = vunpack.c.l.b16 %v1169_v49  ;;  %v1839_v53 = vor.u32 %v1838_v40, %v1835_v1  ;;  %v3654_v58 = vsel %vm799_vm0, %v4990_v45, 0 }
  0x64   : > { %v1848_v54 = vrot.slane %v1846_v44, 4  ;;  %3663 = vmatpush.bf16.msra.mxu3 %v3654_v58  ;;  %v2713_v60 = vsel %vm799_vm0, %v4812_v50, 0  ;;  %v4052_v61 = vsel %vm799_vm0, %v5039_v2, 0  ;;  %v1854_v4 = vrot.slane %v1852_v55, 5  ;;  %v1114_v50 = vld [vmem:[%s5282_s6 + $0x18] sm:$0xe] }
  0x65   : > { %v737_v57 = vpack.c.b16 %v709_v46, %v708_v34  ;;  %v1309_v43 = vpack.c.b16 %v1278_v52, %v1277_v37  ;;  %2722 = vmatpush.bf16.msra.mxu1 %v2713_v60  ;;  %v1840_v62 = vrot.slane %v1839_v53, 4  ;;  %4061 = vmatpush.bf16.msra.mxu0 %v4052_v61  ;;  %v1172_v7 = vrot.slane %v5353_v28, 5  ;;  %v4722_v46 = vld [vmem:[%s5282_s6 + $0x28] sm:$0xf] }
  0x66   : > { %v1849_v59 = vor.u32 %v1848_v54, %v1844_v41  ;;  %v1857_v9 = vshrl.u32 %v4718_v5, 16  ;;  %v1860_v10 = vshll.u32 %v4718_v5, 16  ;;  %v1866_v13 = vshll.u32 %v4719_v6, 16 }
  0x67   : > { %4476 = vmatmul.msk.bf16.gmra.mxu0 %vm750_vm4, %v737_v57  ;;  %v1845_v11 = vsel %vm5294_vm3, %v1840_v62, %v1844_v41  ;;  %v1870_v14 = vshrl.u32 %v4719_v6, 16  ;;  %v4570_v16 = vrot.slane %v1113_v8, 9  ;;  %v1174_v17 = vrot.slane %v1172_v7, 4  ;;  %v4721_v41 = vld [vmem:[%s5282_s6 + $0x24] sm:$0xf] }
  0x68   : > { %4553 = vmatmul.msk.bf16.vlgmr.msrb.gmra.mxu1 %vm750_vm4, %v5059_v51  ;;  %v1850_v3 = vrot.slane %v1849_v59, 4  ;;  %v1175_v28 = vrot.slane %v5356_v32, 5  ;;  %v2218_v19 = vunpack.c.l.b16 %v1845_v11  ;;  %v1859_v23 = vrot.slane %v1857_v9, 4  ;;  %v4723_v6 = vld [vmem:[%s5282_s6 + $0x2c] sm:$0x1] }
  0x69   : > { %v1862_v24 = vrot.slane %v1860_v10, 5  ;;  %v1868_v26 = vrot.slane %v1866_v13, 5  ;;  %v1872_v29 = vrot.slane %v1870_v14, 4  ;;  %v1173_v31 = vsel %vm5468_vm7, %v4570_v16, %v1172_v7 }
  0x6a   : > { %v1855_v12 = vsel %vm5294_vm3, %v1850_v3, %v1854_v4  ;;  %v1176_v33 = vsel %vm5468_vm7, %v1174_v17, %v1175_v28  ;;  %v1876_v38 = vshll.u32 %v4720_v30, 16  ;;  %v1279_v1 = vunpack.c.l.b16 %v1173_v31 }
  0x6b   : > { %v2219_v22 = vunpack.c.l.b16 %v1855_v12  ;;  %v1863_v32 = vor.u32 %v1862_v24, %v1859_v23  ;;  %v1873_v37 = vor.u32 %v1872_v29, %v1868_v26  ;;  %v1280_v39 = vunpack.c.l.b16 %v1176_v33  ;;  %v5061_v12 = vld [vmem:[%s5282_s6 + $0x18] sm:$0xff]  ;;  %v1115_v29 = vld [vmem:[%s5282_s6 + $0x24] sm:$0xe] }
  0x6c   : > { %v1878_v45 = vrot.slane %v1876_v38, 5  ;;  %v1179_v51 = vrot.slane %v5399_v63, 5  ;;  %v1881_v52 = vshrl.u32 %v4721_v41, 16  ;;  %v1884_v54 = vshll.u32 %v4721_v41, 16 }
  0x6d   : > { %4586 = vmatmul.msk.bf16.vlgmr.msrb.gmra.mxu2 %vm750_vm4, %v1309_v43  ;;  %v2250_v34 = vpack.c.b16 %v2219_v22, %v2218_v19  ;;  %v1864_v40 = vrot.slane %v1863_v32, 4  ;;  %v1874_v44 = vrot.slane %v1873_v37, 4  ;;  %v1310_v49 = vpack.c.b16 %v1280_v39, %v1279_v1  ;;  %v5076_v43 = vld [vmem:[%s5282_s6 + $0x18] sm:$0xff]  ;;  %v4724_v19 = vld [vmem:[%s5282_s6 + $0x30] sm:$0xf]  ;;  %v5077_v32 = vld [vmem:[%s5282_s6 + $0x24] sm:$0xff] }
  0x6e   : > { %v1890_v55 = vshll.u32 %v4722_v46, 16  ;;  %v1894_v2 = vshrl.u32 %v4722_v46, 16  ;;  %v4571_v58 = vrot.slane %v1114_v50, 9  ;;  %v1181_v60 = vrot.slane %v1179_v51, 4  ;;  %v4725_v22 = vld [vmem:[%s5282_s6 + $0x34] sm:$0xf] }
  0x6f   : > { %v1869_v53 = vsel %vm5294_vm3, %v1864_v40, %v1868_v26  ;;  %v1879_v57 = vsel %vm5294_vm3, %v1874_v44, %v1878_v45  ;;  %v1182_v63 = vrot.slane %v5402_v0, 5  ;;  %v1883_v61 = vrot.slane %v1881_v52, 4  ;;  %v4726_v45 = vld [vmem:[%s5282_s6 + $0x38] sm:$0x1] }
  0x70   : > { %v2220_v59 = vunpack.c.l.b16 %v1869_v53  ;;  %v2221_v62 = vunpack.c.l.b16 %v1879_v57  ;;  %v1886_v3 = vrot.slane %v1884_v54, 5  ;;  %v1892_v4 = vrot.slane %v1890_v55, 5  ;;  %v4728_v57 = vld [vmem:[%s5282_s6 + $0x40] sm:$0xf] }
  0x71   : > { %v1896_v5 = vrot.slane %v1894_v2, 4  ;;  %v1180_v7 = vsel %vm5468_vm7, %v4571_v58, %v1179_v51  ;;  %v1183_v8 = vsel %vm5468_vm7, %v1181_v60, %v1182_v63  ;;  %v1900_v0 = vshll.u32 %v4723_v6, 16  ;;  %v4727_v2 = vld [vmem:[%s5282_s6 + $0x3c] sm:$0xf]  ;;  %v5137_v63 = vld [vmem:[%s5282_s6 + $0x34] sm:$0xf] }
  0x72   : > { %4699 = vmatmul.msk.bf16.vlgmr.msrb.gmra.mxu3 %vm750_vm4, %v5075_v15  ;;  %v2251_v9 = vpack.c.b16 %v2221_v62, %v2220_v59  ;;  %v1887_v10 = vor.u32 %v1886_v3, %v1883_v61  ;;  %v1281_v13 = vunpack.c.l.b16 %v1180_v7  ;;  %v1282_v14 = vunpack.c.l.b16 %v1183_v8  ;;  %v1116_v62 = vld [vmem:[%s5282_s6 + $0x30] sm:$0xe] }
  0x73   : > { %v1897_v11 = vor.u32 %v1896_v5, %v1892_v4  ;;  %v1902_v17 = vrot.slane %v1900_v0, 5  ;;  %v1186_v23 = vrot.slane %v5445_v42, 5  ;;  %v1905_v30 = vshrl.u32 %v4724_v19, 16  ;;  %v5138_v0 = vld [vmem:[%s5282_s6 + $0x38] sm:$0x1] }
  0x74   : > { %v1888_v15 = vrot.slane %v1887_v10, 4  ;;  %v1311_v28 = vpack.c.b16 %v1282_v14, %v1281_v13  ;;  %v1908_v31 = vshll.u32 %v4724_v19, 16  ;;  %v1914_v33 = vshll.u32 %v4725_v22, 16  ;;  %v5078_v13 = vld [vmem:[%s5282_s6 + $0x30] sm:$0xff] }
  0x75   : > { %v1898_v16 = vrot.slane %v1897_v11, 4  ;;  %v1188_v37 = vrot.slane %v1186_v23, 4  ;;  %v1189_v42 = vrot.slane %v5449_v48, 5  ;;  %v1907_v39 = vrot.slane %v1905_v30, 4  ;;  %v5062_v48 = vld [vmem:[%s5282_s6 + $0x24] sm:$0xff] }
  0x76   : > { %v1893_v24 = vsel %vm5294_vm3, %v1888_v15, %v1892_v4  ;;  %v1910_v40 = vrot.slane %v1908_v31, 5  ;;  %v1916_v41 = vrot.slane %v1914_v33, 5  ;;  %v1924_v53 = vshll.u32 %v4726_v45, 16  ;;  %v5063_v33 = vld [vmem:[%s5282_s6 + $0x30] sm:$0xff] }
  0x77   : > { %4764 = vmatmul.msk.bf16.vlgmr.msrb.gmra.mxu0 %vm750_vm4, %v2250_v34  ;;  %v1903_v26 = vsel %vm5294_vm3, %v1898_v16, %v1902_v17  ;;  %v1918_v34 = vshrl.u32 %v4725_v22, 16  ;;  %v2222_v38 = vunpack.c.l.b16 %v1893_v24  ;;  %v1193_v61 = vrot.slane %v5137_v63, 5  ;;  %v4729_v22 = vld [vmem:[%s5282_s6 + $0x44] sm:$0x1] }
  0x78   : > { %4554 = vmatmul.msk.bf16.gmra.mxu1 %vm750_vm4, %v5060_v35  ;;  %v4572_v35 = vrot.slane %v1115_v29, 9  ;;  %v2223_v1 = vunpack.c.l.b16 %v1903_v26  ;;  %v1911_v51 = vor.u32 %v1910_v40, %v1907_v39  ;;  %v1926_v59 = vrot.slane %v1924_v53, 5  ;;  %v4730_v39 = vld [vmem:[%s5282_s6 + $0x48] sm:$0xf]  ;;  %v4731_v40 = vld [vmem:[%s5282_s6 + $0x4c] sm:$0xf] }
  0x79   : > { %v1920_v44 = vrot.slane %v1918_v34, 4  ;;  %v1929_v3 = vshrl.u32 %v4727_v2, 16  ;;  %v1932_v4 = vshll.u32 %v4727_v2, 16  ;;  %v1938_v5 = vshll.u32 %v4728_v57, 16  ;;  %v5079_v2 = vld [vmem:[%s5282_s6 + $0x3c] sm:$0xff] }
  0x7a   : > { %v1187_v46 = vsel %vm5468_vm7, %v4572_v35, %v1186_v23  ;;  %v2252_v50 = vpack.c.b16 %v2223_v1, %v2222_v38  ;;  %v1912_v58 = vrot.slane %v1911_v51, 4  ;;  %v1942_v6 = vshrl.u32 %v4728_v57, 16 }
  0x7b   : > { %v1921_v52 = vor.u32 %v1920_v44, %v1916_v41  ;;  %v1283_v54 = vunpack.c.l.b16 %v1187_v46  ;;  %v4573_v10 = vrot.slane %v1116_v62, 9  ;;  %v1195_v11 = vrot.slane %v1193_v61, 4 }
  0x7c   : > { %v1917_v8 = vsel %vm5294_vm3, %v1912_v58, %v1916_v41  ;;  %v1931_v14 = vrot.slane %v1929_v3, 4  ;;  %v1934_v15 = vrot.slane %v1932_v4, 5  ;;  %v1940_v16 = vrot.slane %v1938_v5, 5  ;;  %v4732_v4 = vld [vmem:[%s5282_s6 + $0x50] sm:$0x1] }
  0x7d   : > { %4587 = vmatmul.msk.bf16.gmra.mxu2 %vm750_vm4, %v1310_v49  ;;  %v1190_v49 = vsel %vm5468_vm7, %v1188_v37, %v1189_v42  ;;  %v1944_v17 = vrot.slane %v1942_v6, 4  ;;  %v1194_v23 = vsel %vm5468_vm7, %v4573_v10, %v1193_v61  ;;  %v1948_v30 = vshll.u32 %v4729_v22, 16 }
  0x7e   : > { %v1284_v55 = vunpack.c.l.b16 %v1190_v49  ;;  %v1935_v26 = vor.u32 %v1934_v15, %v1931_v14  ;;  %v1953_v51 = vshrl.u32 %v4730_v39, 16  ;;  %v1962_v53 = vshll.u32 %v4731_v40, 16 }
  0x7f   : > { %v1945_v29 = vor.u32 %v1944_v17, %v1940_v16  ;;  %v1950_v1 = vrot.slane %v1948_v30, 5 }
  0x80   : > { %v1312_v60 = vpack.c.b16 %v1284_v55, %v1283_v54  ;;  %v1936_v42 = vrot.slane %v1935_v26, 4  ;;  %v1966_v54 = vshrl.u32 %v4731_v40, 16  ;;  %v1964_v62 = vrot.slane %v1962_v53, 5 }
  0x81   : > { %v1946_v38 = vrot.slane %v1945_v29, 4  ;;  %v1207_v26 = vrot.slane %v5366_v47, 5 }
  0x82   : > { %4700 = vmatmul.msk.bf16.gmra.mxu3 %vm750_vm4, %v5076_v43  ;;  %v1922_v43 = vrot.slane %v1921_v52, 4  ;;  %v1941_v45 = vsel %vm5294_vm3, %v1936_v42, %v1940_v16  ;;  %v1956_v52 = vshll.u32 %v4730_v39, 16  ;;  %v1968_v3 = vrot.slane %v1966_v54, 4  ;;  %v4735_v54 = vld [vmem:[%s5282_s6 + $0x5c] sm:$0x1] }
  0x83   : > { %v1951_v46 = vsel %vm5294_vm3, %v1946_v38, %v1950_v1  ;;  %v2226_v55 = vunpack.c.l.b16 %v1941_v45  ;;  %v5080_v1 = vld [vmem:[%s5282_s6 + $0x48] sm:$0xff]  ;;  %v1209_v40 = vrot.slane %v1207_v26, 4 }
  0x84   : > { %v2227_v57 = vunpack.c.l.b16 %v1951_v46  ;;  %v1958_v61 = vrot.slane %v1956_v52, 5  ;;  %v1969_v10 = vor.u32 %v1968_v3, %v1964_v62 }
  0x86   : > { %v1970_v16 = vrot.slane %v1969_v10, 4 }
  0x87   : > { %4765 = vmatmul.msk.bf16.gmra.mxu0 %vm750_vm4, %v2251_v9  ;;  %v1927_v9 = vsel %vm5294_vm3, %v1922_v43, %v1926_v59 }
  0x88   : > { %4555 = vmatmul.msk.bf16.gmra.mxu1 %vm750_vm4, %v5061_v12  ;;  %v1196_v12 = vrot.slane %v5138_v0, 5  ;;  %v2225_v19 = vunpack.c.l.b16 %v1927_v9 }
  0x8a   : > { %v1197_v24 = vsel %vm5468_vm7, %v1195_v11, %v1196_v12  ;;  %v1972_v11 = vshll.u32 %v4732_v4, 16  ;;  %v5064_v12 = vld [vmem:[%s5282_s6 + $0x3c] sm:$0xff] }
  0x8b   : > { %v1286_v35 = vunpack.c.l.b16 %v1197_v24  ;;  %v4734_v24 = vld [vmem:[%s5282_s6 + $0x58] sm:$0xf]  ;;  %v4736_v4 = vld [vmem:[%s5282_s6 + $0x60] sm:$0xf] }
  0x8c   : > { %v1974_v17 = vrot.slane %v1972_v11, 5  ;;  %v1990_v42 = vshrl.u32 %v4734_v24, 16 }
  0x8d   : > { %4588 = vmatmul.msk.bf16.gmra.mxu2 %vm750_vm4, %v1311_v28  ;;  %v2224_v28 = vunpack.c.l.b16 %v1917_v8  ;;  %v2254_v8 = vpack.c.b16 %v2227_v57, %v2226_v55 }
  0x8e   : > { %v1975_v30 = vsel %vm5294_vm3, %v1970_v16, %v1974_v17  ;;  %v1992_v52 = vrot.slane %v1990_v42, 4 }
  0x8f   : > { %v2253_v31 = vpack.c.b16 %v2225_v19, %v2224_v28  ;;  %v2229_v46 = vunpack.c.l.b16 %v1975_v30 }
  0x92   : > { %4701 = vmatmul.msk.bf16.gmra.mxu3 %vm750_vm4, %v5077_v32  ;;  %v1285_v32 = vunpack.c.l.b16 %v1194_v23  ;;  %v4733_v23 = vld [vmem:[%s5282_s6 + $0x54] sm:$0xf] }
  0x94   : > { %v1313_v44 = vpack.c.b16 %v1286_v35, %v1285_v32  ;;  %v1980_v32 = vshll.u32 %v4733_v23, 16  ;;  %v1986_v35 = vshll.u32 %v4734_v24, 16 }
  0x97   : > { %4766 = vmatmul.msk.bf16.gmra.mxu0 %vm750_vm4, %v2252_v50  ;;  %v1200_v50 = vrot.slane %v5322_v20, 5  ;;  %v1955_v20 = vrot.slane %v1953_v51, 4  ;;  %v1988_v51 = vrot.slane %v1986_v35, 5  ;;  %v1217_v35 = vrot.slane %v5417_v27, 5 }
  0x98   : > { %4556 = vmatmul.msk.bf16.gmra.mxu1 %vm750_vm4, %v5062_v48  ;;  %v1117_v48 = vld [vmem:[%s5282_s6 + $0x3c] sm:$0xe] }
  0x99   : > { %v4574_v43 = vrot.slane %v1117_v48, 9  ;;  %v1202_v59 = vrot.slane %v1200_v50, 4  ;;  %v1982_v48 = vrot.slane %v1980_v32, 5 }
  0x9b   : > { %v1201_v5 = vsel %vm5468_vm7, %v4574_v43, %v1200_v50  ;;  %v5065_v43 = vld [vmem:[%s5282_s6 + $0x48] sm:$0xff] }
  0x9d   : > { %v5563_v7 = vpop.f32.mrf.mxu1  ;;  %4589 = vmatmul.msk.bf16.gmra.mxu2 %vm750_vm4, %v1312_v60  ;;  %v1203_v60 = vrot.slane %v5327_v25, 5  ;;  %v1959_v25 = vor.u32 %v1958_v61, %v1955_v20  ;;  %v1996_v20 = vshll.u32 %v4735_v54, 16  ;;  %v5066_v54 = vld [vmem:[%s5282_s6 + $0x54] sm:$0xff] }
  0x9f   : > { %v1204_v6 = vsel %vm5468_vm7, %v1202_v59, %v1203_v60  ;;  %v1960_v15 = vrot.slane %v1959_v25, 4  ;;  %v1993_v60 = vor.u32 %v1992_v52, %v1988_v51  ;;  %v1998_v10 = vrot.slane %v1996_v20, 5 }
  0xa0   : > { %v1288_v14 = vunpack.c.l.b16 %v1204_v6 }
  0xa1   : > { %v1965_v29 = vsel %vm5294_vm3, %v1960_v15, %v1964_v62  ;;  %v1994_v25 = vrot.slane %v1993_v60, 4  ;;  %v1214_v15 = vrot.slane %v5412_v21, 5 }
  0xa2   : > { %4702 = vmatmul.msk.bf16.gmra.mxu3 %vm750_vm4, %v5078_v13  ;;  %v1287_v13 = vunpack.c.l.b16 %v1201_v5  ;;  %v2228_v45 = vunpack.c.l.b16 %v1965_v29  ;;  %v4737_v5 = vld [vmem:[%s5282_s6 + $0x64] sm:$0xf] }
  0xa3   : > { %v2014_v16 = vshrl.u32 %v4737_v5, 16  ;;  %v1999_v24 = vsel %vm5294_vm3, %v1994_v25, %v1998_v10  ;;  %v1216_v32 = vrot.slane %v1214_v15, 4  ;;  %v5139_v10 = vld [vmem:[%s5282_s6 + $0x64] sm:$0xf] }
  0xa4   : > { %v1314_v19 = vpack.c.b16 %v1288_v14, %v1287_v13  ;;  %v2255_v57 = vpack.c.b16 %v2229_v46, %v2228_v45  ;;  %v2004_v13 = vshll.u32 %v4736_v4, 16  ;;  %v2010_v14 = vshll.u32 %v4737_v5, 16 }
  0xa5   : > { %v5579_v34 = vpop.f32.mrf.mxu1  ;;  %v2016_v42 = vrot.slane %v2014_v16, 4 }
  0xa6   : > { %v2006_v30 = vrot.slane %v2004_v13, 5  ;;  %v1120_v13 = vld [vmem:[%s5282_s6 + $0x60] sm:$0xe] }
  0xa7   : > { %v5581_v37 = vpop.f32.mrf.mxu2  ;;  %4767 = vmatmul.msk.bf16.gmra.mxu0 %vm750_vm4, %v2253_v31  ;;  %v1118_v31 = vld [vmem:[%s5282_s6 + $0x48] sm:$0xe] }
  0xa8   : > { %4557 = vmatmul.msk.bf16.gmra.mxu1 %vm750_vm4, %v5063_v33  ;;  %v1977_v33 = vshrl.u32 %v4733_v23, 16  ;;  %v4575_v47 = vrot.slane %v1118_v31, 9  ;;  %v2012_v31 = vrot.slane %v2010_v14, 5 }
  0xaa   : > { %v5587_v41 = vpop.f32.mrf.mxu0  ;;  %v1979_v50 = vrot.slane %v1977_v33, 4  ;;  %v5081_v33 = vld [vmem:[%s5282_s6 + $0x54] sm:$0xff]  ;;  %v2017_v27 = vor.u32 %v2016_v42, %v2012_v31 }
  0xab   : > { %v5593_v49 = vpop.f32.mrf.mxu3 }
  0xac   : > { %v1983_v59 = vor.u32 %v1982_v48, %v1979_v50  ;;  %v1218_v48 = vsel %vm5468_vm7, %v1216_v32, %v1217_v35  ;;  %v2018_v60 = vrot.slane %v2017_v27, 4 }
  0xad   : > { %4590 = vmatmul.msk.bf16.gmra.mxu2 %vm750_vm4, %v1313_v44  ;;  %v1210_v44 = vrot.slane %v5371_v56, 5 }
  0xaf   : > { %v5599_v58 = vpop.f32.mrf.mxu1  ;;  %v5602_v63 = vpop.f32.mrf.mxu2  ;;  %v1211_v56 = vsel %vm5468_vm7, %v1209_v40, %v1210_v44  ;;  %v4738_v40 = vld [vmem:[%s5282_s6 + $0x68] sm:$0x1] }
  0xb0   : > { %v1290_v62 = vunpack.c.l.b16 %v1211_v56 }
  0xb2   : > { %4703 = vmatmul.msk.bf16.gmra.mxu3 %vm750_vm4, %v5079_v2  ;;  %v5610_v9 = vpop.f32.mrf.mxu0  ;;  %v1208_v2 = vsel %vm5468_vm7, %v4575_v47, %v1207_v26  ;;  %v2231_v47 = vunpack.c.l.b16 %v1999_v24 }
  0xb3   : > { %v5612_v0 = vpop.f32.mrf.mxu3  ;;  %v1289_v61 = vunpack.c.l.b16 %v1208_v2 }
  0xb5   : > { %v1315_v11 = vpack.c.b16 %v1290_v62, %v1289_v61  ;;  %v4739_v61 = vld [vmem:[%s5282_s6 + $0x6c] sm:$0xf]  ;;  %v4740_v62 = vld [vmem:[%s5282_s6 + $0x70] sm:$0xf] }
  0xb6   : > { %v2025_v14 = vshrl.u32 %v4739_v61, 16  ;;  %v2034_v16 = vshll.u32 %v4740_v62, 16 }
  0xb7   : > { %4768 = vmatmul.msk.bf16.gmra.mxu0 %vm750_vm4, %v2254_v8  ;;  %v5616_v28 = vpop.f32.mrf.mxu1  ;;  %v1984_v8 = vrot.slane %v1983_v59, 4 }
  0xb8   : > { %4558 = vmatmul.msk.bf16.gmra.mxu1 %vm750_vm4, %v5064_v12  ;;  %v2001_v12 = vshrl.u32 %v4736_v4, 16  ;;  %v2027_v35 = vrot.slane %v2025_v14, 4  ;;  %v4743_v14 = vld [vmem:[%s5282_s6 + $0x7c] sm:$0xf] }
  0xb9   : > { %v1989_v23 = vsel %vm5294_vm3, %v1984_v8, %v1988_v51  ;;  %v2020_v51 = vshll.u32 %v4738_v40, 16 }
  0xba   : > { %v5619_v22 = vpop.f32.mrf.mxu2  ;;  %v2003_v29 = vrot.slane %v2001_v12, 4 }
  0xbb   : > { %v2022_v20 = vrot.slane %v2020_v51, 5 }
  0xbc   : > { %v2007_v46 = vor.u32 %v2006_v30, %v2003_v29  ;;  %v5082_v30 = vld [vmem:[%s5282_s6 + $0x60] sm:$0xff] }
  0xbd   : > { %4591 = vmatmul.msk.bf16.gmra.mxu2 %vm750_vm4, %v1314_v19  ;;  %v1119_v19 = vld [vmem:[%s5282_s6 + $0x54] sm:$0xe]  ;;  %v2023_v25 = vsel %vm5294_vm3, %v2018_v60, %v2022_v20 }
  0xbe   : > { %v5629_v38 = vpop.f32.mrf.mxu0  ;;  %v4576_v21 = vrot.slane %v1119_v19, 9  ;;  %v2008_v59 = vrot.slane %v2007_v46, 4  ;;  %v2038_v19 = vshrl.u32 %v4740_v62, 16  ;;  %v4741_v46 = vld [vmem:[%s5282_s6 + $0x74] sm:$0x1] }
  0xbf   : > { %v5633_v39 = vpop.f32.mrf.mxu3 }
  0xc0   : > { %v1215_v50 = vsel %vm5468_vm7, %v4576_v21, %v1214_v15  ;;  %v2013_v8 = vsel %vm5294_vm3, %v2008_v59, %v2012_v31  ;;  %v2028_v15 = vshll.u32 %v4739_v61, 16  ;;  %v4577_v21 = vrot.slane %v1120_v13, 9  ;;  %v4742_v13 = vld [vmem:[%s5282_s6 + $0x78] sm:$0xf] }
  0xc1   : > { %v5636_v53 = vpop.f32.mrf.mxu1  ;;  %v1291_v56 = vunpack.c.l.b16 %v1215_v50  ;;  %v2232_v31 = vunpack.c.l.b16 %v2013_v8 }
  0xc2   : > { %4704 = vmatmul.msk.bf16.gmra.mxu3 %vm750_vm4, %v5080_v1  ;;  %v5640_v55 = vpop.f32.mrf.mxu2  ;;  %v2230_v1 = vunpack.c.l.b16 %v1989_v23  ;;  %v5140_v23 = vld [vmem:[%s5282_s6 + $0x68] sm:$0x1]  ;;  %v2030_v42 = vrot.slane %v2028_v15, 5  ;;  %v5141_v15 = vld [vmem:[%s5282_s6 + $0x70] sm:$0xf] }
  0xc3   : > { %v1224_v24 = vrot.slane %v5140_v23, 5  ;;  %v1121_v23 = vld [vmem:[%s5282_s6 + $0x6c] sm:$0xe] }
  0xc4   : > { %v2256_v52 = vpack.c.b16 %v2231_v47, %v2230_v1  ;;  %v2036_v1 = vrot.slane %v2034_v16, 5  ;;  %v2040_v47 = vrot.slane %v2038_v19, 4  ;;  %v2031_v51 = vor.u32 %v2030_v42, %v2027_v35  ;;  %v5142_v42 = vld [vmem:[%s5282_s6 + $0x74] sm:$0x1] }
  0xc5   : > { %v1228_v16 = vrot.slane %v5141_v15, 5 }
  0xc6   : > { %v5647_v3 = vpop.f32.mrf.mxu0 }
  0xc7   : > { %4769 = vmatmul.msk.bf16.gmra.mxu0 %vm750_vm4, %v2255_v57  ;;  %v5652_v6 = vpop.f32.mrf.mxu3  ;;  %v1292_v57 = vunpack.c.l.b16 %v1218_v48 }
  0xc8   : > { %4559 = vmatmul.msk.bf16.gmra.mxu1 %vm750_vm4, %v5065_v43 }
  0xc9   : > { %v5656_v17 = vpop.f32.mrf.mxu1  ;;  %v1316_v4 = vpack.c.b16 %v1292_v57, %v1291_v56  ;;  %v5067_v57 = vld [vmem:[%s5282_s6 + $0x60] sm:$0xff] }
  0xcd   : > { %v5663_v26 = vpop.f32.mrf.mxu2  ;;  %4592 = vmatmul.msk.bf16.gmra.mxu2 %vm750_vm4, %v1315_v11  ;;  %v1221_v11 = vrot.slane %v5139_v10, 5 }
  0xcf   : > { %v1223_v32 = vrot.slane %v1221_v11, 4  ;;  %v1222_v50 = vsel %vm5468_vm7, %v4577_v21, %v1221_v11  ;;  %v2062_v21 = vshrl.u32 %v4743_v14, 16 }
  0xd0   : > { %v5669_v44 = vpop.f32.mrf.mxu0  ;;  %v1293_v20 = vunpack.c.l.b16 %v1222_v50  ;;  %v4578_v50 = vrot.slane %v1121_v23, 9 }
  0xd1   : > { %v5671_v45 = vpop.f32.mrf.mxu3  ;;  %v1225_v48 = vsel %vm5468_vm7, %v1223_v32, %v1224_v24 }
  0xd2   : > { %4705 = vmatmul.msk.bf16.gmra.mxu3 %vm750_vm4, %v5081_v33  ;;  %v2233_v33 = vunpack.c.l.b16 %v2023_v25  ;;  %v1294_v61 = vunpack.c.l.b16 %v1225_v48  ;;  %v1230_v48 = vrot.slane %v1228_v16, 4 }
  0xd4   : > { %v2257_v27 = vpack.c.b16 %v2233_v33, %v2232_v31  ;;  %v1317_v11 = vpack.c.b16 %v1294_v61, %v1293_v20  ;;  %v2052_v31 = vshll.u32 %v4742_v13, 16  ;;  %v2058_v33 = vshll.u32 %v4743_v14, 16 }
  0xd5   : > { %v5679_v2 = vpop.f32.mrf.mxu1  ;;  %v5681_v43 = vpop.f32.mrf.mxu2  ;;  %v2064_v20 = vrot.slane %v2062_v21, 4 }
  0xd7   : > { %4770 = vmatmul.msk.bf16.gmra.mxu0 %vm750_vm4, %v2256_v52  ;;  %v2041_v52 = vor.u32 %v2040_v47, %v2036_v1  ;;  %v1231_v47 = vrot.slane %v5142_v42, 5 }
  0xd8   : > { %4560 = vmatmul.msk.bf16.gmra.mxu1 %vm750_vm4, %v5066_v54  ;;  %v5687_v5 = vpop.f32.mrf.mxu0  ;;  %v2044_v54 = vshll.u32 %v4741_v46, 16  ;;  %v5083_v46 = vld [vmem:[%s5282_s6 + $0x6c] sm:$0xff] }
  0xd9   : > { %v5694_v12 = vpop.f32.mrf.mxu3  ;;  %v2042_v8 = vrot.slane %v2041_v52, 4 }
  0xda   : > { %v2046_v25 = vrot.slane %v2044_v54, 5 }
  0xdd   : > { %4593 = vmatmul.msk.bf16.gmra.mxu2 %vm750_vm4, %v1316_v4  ;;  %v5699_v29 = vpop.f32.mrf.mxu1  ;;  %v2032_v4 = vrot.slane %v2031_v51, 4 }
  0xdf   : > { %v2037_v19 = vsel %vm5294_vm3, %v2032_v4, %v2036_v1  ;;  %v4744_v4 = vld [vmem:[%s5282_s6 + $0x80] sm:$0x1] }
  0xe0   : > { %v5702_v40 = vpop.f32.mrf.mxu2 }
  0xe2   : > { %4706 = vmatmul.msk.bf16.gmra.mxu3 %vm750_vm4, %v5082_v30  ;;  %v2049_v30 = vshrl.u32 %v4742_v13, 16  ;;  %v5068_v13 = vld [vmem:[%s5282_s6 + $0x6c] sm:$0xff] }
  0xe4   : > { %v5710_v56 = vpop.f32.mrf.mxu0  ;;  %v2051_v54 = vrot.slane %v2049_v30, 4 }
  0xe5   : > { %v5713_v59 = vpop.f32.mrf.mxu3  ;;  %v1032_v60 = vpop.f32.mrf.mxu1 }
  0xe6   : > { %v1033_v62 = vadd.f32 %v1032_v60, %v5587_v41  ;;  %v2047_v41 = vsel %vm5294_vm3, %v2042_v8, %v2046_v25  ;;  %v2060_v60 = vrot.slane %v2058_v33, 5  ;;  %v1229_v8 = vsel %vm5468_vm7, %v4578_v50, %v1228_v16 }
  0xe7   : > { %4771 = vmatmul.msk.bf16.gmra.mxu0 %vm750_vm4, %v2257_v27  ;;  %v2234_v27 = vunpack.c.l.b16 %v2037_v19  ;;  %v2235_v51 = vunpack.c.l.b16 %v2047_v41  ;;  %v2068_v19 = vshll.u32 %v4744_v4, 16 }
  0xe8   : > { %v5717_v10 = vpop.f32.mrf.mxu2  ;;  %4561 = vmatmul.msk.bf16.gmra.mxu1 %vm750_vm4, %v5067_v57  ;;  %v2054_v57 = vrot.slane %v2052_v31, 5  ;;  %v2065_v15 = vor.u32 %v2064_v20, %v2060_v60 }
  0xe9   : > { %v2258_v25 = vpack.c.b16 %v2235_v51, %v2234_v27  ;;  %v2070_v42 = vrot.slane %v2068_v19, 5  ;;  %v4746_v27 = vld [vmem:[%s5282_s6 + $0x88] sm:$0xf]  ;;  %v5143_v51 = vld [vmem:[%s5282_s6 + $0x7c] sm:$0xf] }
  0xea   : > { %v2055_v14 = vor.u32 %v2054_v57, %v2051_v54  ;;  %v1122_v54 = vld [vmem:[%s5282_s6 + $0x78] sm:$0xe] }
  0xec   : > { %v5728_v24 = vpop.f32.mrf.mxu0  ;;  %v2056_v21 = vrot.slane %v2055_v14, 4 }
  0xed   : > { %v5730_v32 = vpop.f32.mrf.mxu3  ;;  %4594 = vmatmul.msk.bf16.gmra.mxu2 %vm750_vm4, %v1317_v11  ;;  %v1034_v35 = vpop.f32.mrf.mxu1 }
  0xee   : > { %v1035_v1 = vadd.f32 %v1034_v35, %v5610_v9  ;;  %v1232_v9 = vsel %vm5468_vm7, %v1230_v48, %v1231_v47  ;;  %v2066_v35 = vrot.slane %v2065_v15, 4  ;;  %v4745_v47 = vld [vmem:[%s5282_s6 + $0x84] sm:$0xf]  ;;  %v5084_v15 = vld [vmem:[%s5282_s6 + $0x78] sm:$0xff] }
  0xef   : > { %v1296_v30 = vunpack.c.l.b16 %v1232_v9  ;;  %v2076_v57 = vshll.u32 %v4745_v47, 16  ;;  %v2086_v9 = vshrl.u32 %v4746_v27, 16 }
  0xf0   : > { %v1385_v52 = vpop.f32.mrf.mxu2  ;;  %v2071_v4 = vsel %vm5294_vm3, %v2066_v35, %v2070_v42 }
  0xf1   : > { %v1465_v61 = vadd.f32 %v1385_v52, %v1033_v62  ;;  %v1295_v62 = vunpack.c.l.b16 %v1229_v8  ;;  %v1235_v52 = vrot.slane %v5143_v51, 5  ;;  %v2082_v8 = vshll.u32 %v4746_v27, 16 }
  0xf2   : > { %4707 = vmatmul.msk.bf16.gmra.mxu3 %vm750_vm4, %v5083_v46  ;;  %v2088_v35 = vrot.slane %v2086_v9, 4 }
  0xf3   : > { %v1318_v48 = vpack.c.b16 %v1296_v30, %v1295_v62 }
  0xf4   : > { %v2326_v11 = vpop.f32.mrf.mxu0 }
  0xf5   : > { %v1672_v41 = vpop.f32.mrf.mxu3  ;;  %v1037_v23 = vpop.f32.mrf.mxu1 }
  0xf6   : > { %v1752_v31 = vadd.f32 %v1672_v41, %v1465_v61  ;;  %v1038_v16 = vadd.f32 %v1037_v23, %v5629_v38  ;;  %v2073_v38 = vshrl.u32 %v4745_v47, 16  ;;  %v2061_v61 = vsel %vm5294_vm3, %v2056_v21, %v2060_v60 }
  0xf7   : > { %4772 = vmatmul.msk.bf16.gmra.mxu0 %vm750_vm4, %v2258_v25  ;;  %v5144_v25 = vld [vmem:[%s5282_s6 + $0x80] sm:$0x1]  ;;  %v4579_v41 = vrot.slane %v1122_v54, 9  ;;  %v1237_v23 = vrot.slane %v1235_v52, 4  ;;  %v2236_v62 = vunpack.c.l.b16 %v2061_v61  ;;  %v2237_v60 = vunpack.c.l.b16 %v2071_v4 }
  0xf8   : > { %v1387_v33 = vpop.f32.mrf.mxu2  ;;  %4562 = vmatmul.msk.bf16.gmra.mxu1 %vm750_vm4, %v5068_v13  ;;  %v5747_v46 = vadd.f32 %v2326_v11, %v1752_v31  ;;  %v1238_v11 = vrot.slane %v5144_v25, 5  ;;  %v2075_v30 = vrot.slane %v2073_v38, 4  ;;  %v2078_v31 = vrot.slane %v2076_v57, 5  ;;  %v5069_v38 = vld [vmem:[%s5282_s6 + $0x78] sm:$0xff] }
  0xf9   : > { %v1466_v50 = vadd.f32 %v1387_v33, %v1035_v1  ;;  %v2084_v21 = vrot.slane %v2082_v8, 5  ;;  %v2259_v27 = vpack.c.b16 %v2237_v60, %v2236_v62  ;;  %v4749_v62 = vld [vmem:[%s5282_s6 + $0x94] sm:$0xf]  ;;  %v5145_v60 = vld [vmem:[%s5282_s6 + $0x88] sm:$0xf] }
  0xfa   : > { %v2079_v51 = vor.u32 %v2078_v31, %v2075_v30  ;;  %v1242_v30 = vrot.slane %v5145_v60, 5  ;;  %v1123_v31 = vld [vmem:[%s5282_s6 + $0x84] sm:$0xe] }
  0xfb   : > { %v2089_v57 = vor.u32 %v2088_v35, %v2084_v21 }
  0xfc   : > { %v2328_v20 = vpop.f32.mrf.mxu0  ;;  %v2080_v25 = vrot.slane %v2079_v51, 4 }
  0xfd   : > { %v1674_v1 = vpop.f32.mrf.mxu3  ;;  %4595 = vmatmul.msk.bf16.gmra.mxu2 %vm750_vm4, %v1318_v48  ;;  %v1039_v13 = vpop.f32.mrf.mxu1  ;;  %v4747_v48 = vld [vmem:[%s5282_s6 + $0x8c] sm:$0x1] }
  0xfe   : > { %v1753_v14 = vadd.f32 %v1674_v1, %v1466_v50  ;;  %v1040_v19 = vadd.f32 %v1039_v13, %v5647_v3  ;;  %v1236_v50 = vsel %vm5468_vm7, %v4579_v41, %v1235_v52  ;;  %v1239_v3 = vsel %vm5468_vm7, %v1237_v23, %v1238_v11 }
  0xff   : > { %v2092_v61 = vshll.u32 %v4747_v48, 16  ;;  %v1298_v8 = vunpack.c.l.b16 %v1239_v3  ;;  %v2090_v1 = vrot.slane %v2089_v57, 4  ;;  %v2110_v3 = vshrl.u32 %v4749_v62, 16  ;;  %v5085_v57 = vld [vmem:[%s5282_s6 + $0x84] sm:$0xff] }
 0x100   : > { %v1390_v33 = vpop.f32.mrf.mxu2  ;;  %v5760_v42 = vadd.f32 %v2328_v20, %v1753_v14  ;;  %v4748_v14 = vld [vmem:[%s5282_s6 + $0x90] sm:$0xf] }
 0x101   : > { %v1467_v47 = vadd.f32 %v1390_v33, %v1038_v16  ;;  %v1297_v16 = vunpack.c.l.b16 %v1236_v50  ;;  %v2094_v13 = vrot.slane %v2092_v61, 5  ;;  %v2097_v33 = vshrl.u32 %v4748_v14, 16 }
 0x102   : > { %4708 = vmatmul.msk.bf16.gmra.mxu3 %vm750_vm4, %v5084_v15  ;;  %v2100_v48 = vshll.u32 %v4748_v14, 16  ;;  %v2106_v50 = vshll.u32 %v4749_v62, 16  ;;  %v4580_v61 = vrot.slane %v1123_v31, 9 }
 0x103   : > { %v1319_v23 = vpack.c.b16 %v1298_v8, %v1297_v16  ;;  %v2099_v8 = vrot.slane %v2097_v33, 4 }
 0x104   : > { %v2331_v54 = vpop.f32.mrf.mxu0 }
 0x105   : > { %v1677_v4 = vpop.f32.mrf.mxu3  ;;  %v1042_v20 = vpop.f32.mrf.mxu1 }
 0x106   : > { %v1754_v9 = vadd.f32 %v1677_v4, %v1467_v47  ;;  %v1043_v52 = vadd.f32 %v1042_v20, %v5669_v44  ;;  %v2085_v44 = vsel %vm5294_vm3, %v2080_v25, %v2084_v21  ;;  %v2095_v47 = vsel %vm5294_vm3, %v2090_v1, %v2094_v13 }
 0x107   : > { %4773 = vmatmul.msk.bf16.gmra.mxu0 %vm750_vm4, %v2259_v27  ;;  %v5146_v27 = vld [vmem:[%s5282_s6 + $0x8c] sm:$0x1]  ;;  %v1244_v4 = vrot.slane %v1242_v30, 4  ;;  %v2238_v20 = vunpack.c.l.b16 %v2085_v44  ;;  %v2239_v16 = vunpack.c.l.b16 %v2095_v47  ;;  %v2102_v25 = vrot.slane %v2100_v48, 5  ;;  %v5070_v44 = vld [vmem:[%s5282_s6 + $0x84] sm:$0xff] }
 0x108   : > { %v1392_v11 = vpop.f32.mrf.mxu2  ;;  %4563 = vmatmul.msk.bf16.gmra.mxu1 %vm750_vm4, %v5069_v38  ;;  %v5773_v15 = vadd.f32 %v2331_v54, %v1754_v9  ;;  %v1245_v51 = vrot.slane %v5146_v27, 5  ;;  %v2112_v1 = vrot.slane %v2110_v3, 4 }
 0x109   : > { %v1468_v41 = vadd.f32 %v1392_v11, %v1040_v19  ;;  %v2108_v11 = vrot.slane %v2106_v50, 5  ;;  %v2260_v62 = vpack.c.b16 %v2239_v16, %v2238_v20  ;;  %v2103_v31 = vor.u32 %v2102_v25, %v2099_v8  ;;  %v4752_v20 = vld [vmem:[%s5282_s6 + $0xa0] sm:$0xf]  ;;  %v1124_v25 = vld [vmem:[%s5282_s6 + $0x90] sm:$0xe] }
 0x10b   : > { %v2113_v33 = vor.u32 %v2112_v1, %v2108_v11 }
 0x10c   : > { %v2333_v35 = vpop.f32.mrf.mxu0 }
 0x10d   : > { %v1679_v19 = vpop.f32.mrf.mxu3  ;;  %4596 = vmatmul.msk.bf16.gmra.mxu2 %vm750_vm4, %v1319_v23  ;;  %v1044_v54 = vpop.f32.mrf.mxu1  ;;  %v4750_v23 = vld [vmem:[%s5282_s6 + $0x98] sm:$0x1] }
 0x10e   : > { %v1755_v38 = vadd.f32 %v1679_v19, %v1468_v41  ;;  %v1045_v21 = vadd.f32 %v1044_v54, %v5687_v5  ;;  %v1243_v5 = vsel %vm5468_vm7, %v4580_v61, %v1242_v30  ;;  %v1246_v41 = vsel %vm5468_vm7, %v1244_v4, %v1245_v51  ;;  %v4751_v30 = vld [vmem:[%s5282_s6 + $0x9c] sm:$0xf] }
 0x10f   : > { %v2116_v47 = vshll.u32 %v4750_v23, 16  ;;  %v1300_v50 = vunpack.c.l.b16 %v1246_v41  ;;  %v2104_v19 = vrot.slane %v2103_v31, 4  ;;  %v2114_v54 = vrot.slane %v2113_v33, 4 }
 0x110   : > { %v1395_v9 = vpop.f32.mrf.mxu2  ;;  %v5786_v13 = vadd.f32 %v2333_v35, %v1755_v38  ;;  %v2121_v16 = vshrl.u32 %v4751_v30, 16  ;;  %v2124_v8 = vshll.u32 %v4751_v30, 16  ;;  %v2134_v41 = vshrl.u32 %v4752_v20, 16 }
 0x111   : > { %v1469_v14 = vadd.f32 %v1395_v9, %v1043_v52  ;;  %v1299_v52 = vunpack.c.l.b16 %v1243_v5  ;;  %v2118_v38 = vrot.slane %v2116_v47, 5  ;;  %v5147_v9 = vld [vmem:[%s5282_s6 + $0x94] sm:$0xf]  ;;  %v2130_v5 = vshll.u32 %v4752_v20, 16 }
 0x112   : > { %4709 = vmatmul.msk.bf16.gmra.mxu3 %vm750_vm4, %v5085_v57  ;;  %v2123_v31 = vrot.slane %v2121_v16, 4  ;;  %v2126_v33 = vrot.slane %v2124_v8, 5 }
 0x113   : > { %v1320_v4 = vpack.c.b16 %v1300_v50, %v1299_v52  ;;  %v2119_v23 = vsel %vm5294_vm3, %v2114_v54, %v2118_v38  ;;  %v4581_v52 = vrot.slane %v1124_v25, 9 }
 0x114   : > { %v2336_v60 = vpop.f32.mrf.mxu0  ;;  %v2127_v20 = vor.u32 %v2126_v33, %v2123_v31  ;;  %v4755_v31 = vld [vmem:[%s5282_s6 + $0xac] sm:$0xf] }
 0x115   : > { %v1682_v48 = vpop.f32.mrf.mxu3  ;;  %v1047_v35 = vpop.f32.mrf.mxu1 }
 0x116   : > { %v1756_v3 = vadd.f32 %v1682_v48, %v1469_v14  ;;  %v1048_v27 = vadd.f32 %v1047_v35, %v5710_v56  ;;  %v1249_v56 = vrot.slane %v5147_v9, 5  ;;  %v2109_v14 = vsel %vm5294_vm3, %v2104_v19, %v2108_v11  ;;  %v5086_v48 = vld [vmem:[%s5282_s6 + $0x90] sm:$0xff] }
 0x117   : > { %4774 = vmatmul.msk.bf16.gmra.mxu0 %vm750_vm4, %v2260_v62  ;;  %v5148_v62 = vld [vmem:[%s5282_s6 + $0x98] sm:$0x1]  ;;  %v2240_v50 = vunpack.c.l.b16 %v2109_v14  ;;  %v2136_v19 = vrot.slane %v2134_v41, 4  ;;  %v5071_v9 = vld [vmem:[%s5282_s6 + $0x90] sm:$0xff] }
 0x118   : > { %v1397_v51 = vpop.f32.mrf.mxu2  ;;  %4564 = vmatmul.msk.bf16.gmra.mxu1 %vm750_vm4, %v5070_v44  ;;  %v5799_v57 = vadd.f32 %v2336_v60, %v1756_v3  ;;  %v1252_v60 = vrot.slane %v5148_v62, 5  ;;  %v1251_v11 = vrot.slane %v1249_v56, 4  ;;  %v2241_v3 = vunpack.c.l.b16 %v2119_v23 }
 0x119   : > { %v1470_v61 = vadd.f32 %v1397_v51, %v1045_v21  ;;  %v2132_v51 = vrot.slane %v2130_v5, 5  ;;  %v2128_v62 = vrot.slane %v2127_v20, 4  ;;  %v5150_v20 = vld [vmem:[%s5282_s6 + $0xa4] sm:$0x1] }
 0x11a   : > { %v2261_v16 = vpack.c.b16 %v2241_v3, %v2240_v50  ;;  %v5149_v50 = vld [vmem:[%s5282_s6 + $0xa0] sm:$0xf] }
 0x11b   : > { %v2137_v25 = vor.u32 %v2136_v19, %v2132_v51  ;;  %v1256_v3 = vrot.slane %v5149_v50, 5  ;;  %v1125_v19 = vld [vmem:[%s5282_s6 + $0x9c] sm:$0xe] }
 0x11c   : > { %v2338_v1 = vpop.f32.mrf.mxu0 }
 0x11d   : > { %v1684_v21 = vpop.f32.mrf.mxu3  ;;  %4597 = vmatmul.msk.bf16.gmra.mxu2 %vm750_vm4, %v1320_v4  ;;  %v1049_v44 = vpop.f32.mrf.mxu1  ;;  %v4753_v4 = vld [vmem:[%s5282_s6 + $0xa4] sm:$0x1] }
 0x11e   : > { %v1757_v47 = vadd.f32 %v1684_v21, %v1470_v61  ;;  %v1050_v35 = vadd.f32 %v1049_v44, %v5728_v24  ;;  %v1250_v61 = vsel %vm5468_vm7, %v4581_v52, %v1249_v56  ;;  %v1253_v24 = vsel %vm5468_vm7, %v1251_v11, %v1252_v60  ;;  %v4754_v21 = vld [vmem:[%s5282_s6 + $0xa8] sm:$0xf] }
 0x11f   : > { %v2140_v14 = vshll.u32 %v4753_v4, 16  ;;  %v1302_v5 = vunpack.c.l.b16 %v1253_v24  ;;  %v2138_v60 = vrot.slane %v2137_v25, 4  ;;  %v2145_v52 = vshrl.u32 %v4754_v21, 16 }
 0x120   : > { %v1400_v30 = vpop.f32.mrf.mxu2  ;;  %v5812_v54 = vadd.f32 %v2338_v1, %v1757_v47  ;;  %v2133_v11 = vsel %vm5294_vm3, %v2128_v62, %v2132_v51  ;;  %v2158_v4 = vshrl.u32 %v4755_v31, 16 }
 0x121   : > { %v1471_v38 = vadd.f32 %v1400_v30, %v1048_v27  ;;  %v1301_v27 = vunpack.c.l.b16 %v1250_v61  ;;  %v2142_v44 = vrot.slane %v2140_v14, 5  ;;  %v2148_v30 = vshll.u32 %v4754_v21, 16  ;;  %v5087_v14 = vld [vmem:[%s5282_s6 + $0x9c] sm:$0xff] }
 0x122   : > { %4710 = vmatmul.msk.bf16.gmra.mxu3 %vm750_vm4, %v5086_v48  ;;  %v2147_v51 = vrot.slane %v2145_v52, 4 }
 0x123   : > { %v1321_v48 = vpack.c.b16 %v1302_v5, %v1301_v27  ;;  %v2143_v24 = vsel %vm5294_vm3, %v2138_v60, %v2142_v44  ;;  %v1258_v27 = vrot.slane %v1256_v3, 4  ;;  %v2150_v5 = vrot.slane %v2148_v30, 5  ;;  %v4756_v44 = vld [vmem:[%s5282_s6 + $0xb0] sm:$0x1] }
 0x124   : > { %v2341_v8 = vpop.f32.mrf.mxu0  ;;  %v2243_v62 = vunpack.c.l.b16 %v2143_v24 }
 0x125   : > { %v1687_v1 = vpop.f32.mrf.mxu3  ;;  %v1052_v23 = vpop.f32.mrf.mxu1  ;;  %v2151_v52 = vor.u32 %v2150_v5, %v2147_v51 }
 0x126   : > { %v1758_v41 = vadd.f32 %v1687_v1, %v1471_v38  ;;  %v2154_v38 = vshll.u32 %v4755_v31, 16  ;;  %v4582_v1 = vrot.slane %v1125_v19, 9  ;;  %v5072_v19 = vld [vmem:[%s5282_s6 + $0x9c] sm:$0xff] }
 0x127   : > { %4775 = vmatmul.msk.bf16.gmra.mxu0 %vm750_vm4, %v2261_v16  ;;  %v1259_v16 = vrot.slane %v5150_v20, 5 }
 0x128   : > { %v1402_v56 = vpop.f32.mrf.mxu2  ;;  %4565 = vmatmul.msk.bf16.gmra.mxu1 %vm750_vm4, %v5071_v9  ;;  %v5825_v33 = vadd.f32 %v2341_v8, %v1758_v41  ;;  %v2242_v8 = vunpack.c.l.b16 %v2133_v11  ;;  %v1053_v41 = vadd.f32 %v1052_v23, %v5563_v7  ;;  %v2156_v21 = vrot.slane %v2154_v38, 5 }
 0x129   : > { %v1472_v47 = vadd.f32 %v1402_v56, %v1050_v35  ;;  %v2160_v56 = vrot.slane %v2158_v4, 4  ;;  %v2164_v11 = vshll.u32 %v4756_v44, 16 }
 0x12a   : > { %v2262_v7 = vpack.c.b16 %v2243_v62, %v2242_v8  ;;  %v4757_v8 = vld [vmem:[%s5282_s6 + $0xb4] sm:$0xf] }
 0x12b   : > { %v2161_v23 = vor.u32 %v2160_v56, %v2156_v21  ;;  %v2166_v51 = vrot.slane %v2164_v11, 5  ;;  %v2172_v44 = vshll.u32 %v4757_v8, 16 }
 0x12c   : > { %v2343_v61 = vpop.f32.mrf.mxu0 }
 0x12d   : > { %v1689_v35 = vpop.f32.mrf.mxu3  ;;  %4598 = vmatmul.msk.bf16.gmra.mxu2 %vm750_vm4, %v1321_v48  ;;  %v1054_v9 = vpop.f32.mrf.mxu1  ;;  %v1260_v48 = vsel %vm5468_vm7, %v1258_v27, %v1259_v16  ;;  %v2162_v16 = vrot.slane %v2161_v23, 4 }
 0x12e   : > { %v1759_v25 = vadd.f32 %v1689_v35, %v1472_v47  ;;  %v1257_v47 = vsel %vm5468_vm7, %v4582_v1, %v1256_v3  ;;  %v1304_v24 = vunpack.c.l.b16 %v1260_v48  ;;  %v2152_v35 = vrot.slane %v2151_v52, 4  ;;  %v5152_v52 = vld [vmem:[%s5282_s6 + $0xb0] sm:$0x1] }
 0x12f   : > { %v1055_v3 = vadd.f32 %v1054_v9, %v5579_v34  ;;  %v2169_v34 = vshrl.u32 %v4757_v8, 16  ;;  %v2167_v9 = vsel %vm5294_vm3, %v2162_v16, %v2166_v51 }
 0x130   : > { %v1405_v60 = vpop.f32.mrf.mxu2  ;;  %v5838_v31 = vadd.f32 %v2343_v61, %v1759_v25  ;;  %v1303_v61 = vunpack.c.l.b16 %v1257_v47  ;;  %v2157_v56 = vsel %vm5294_vm3, %v2152_v35, %v2156_v21 }
 0x131   : > { %v1473_v50 = vadd.f32 %v1405_v60, %v1053_v41  ;;  %v5151_v41 = vld [vmem:[%s5282_s6 + $0xac] sm:$0xf]  ;;  %v1126_v60 = vld [vmem:[%s5282_s6 + $0xa8] sm:$0xe] }
 0x132   : > { %4711 = vmatmul.msk.bf16.gmra.mxu3 %vm750_vm4, %v5087_v14  ;;  %v4758_v14 = vld [vmem:[%s5282_s6 + $0xb8] sm:$0xf]  ;;  %v1322_v5 = vpack.c.b16 %v1304_v24, %v1303_v61  ;;  %v1263_v62 = vrot.slane %v5151_v41, 5  ;;  %v2244_v61 = vunpack.c.l.b16 %v2157_v56  ;;  %v2245_v24 = vunpack.c.l.b16 %v2167_v9  ;;  %v4759_v41 = vld [vmem:[%s5282_s6 + $0xbc] sm:$0x1] }
 0x133   : > { %v2182_v47 = vshrl.u32 %v4758_v14, 16 }
 0x134   : > { %v2346_v30 = vpop.f32.mrf.mxu0 }
 0x135   : > { %v1692_v38 = vpop.f32.mrf.mxu3  ;;  %v1057_v4 = vpop.f32.mrf.mxu1  ;;  %v2184_v51 = vrot.slane %v2182_v47, 4 }
 0x136   : > { %v1760_v20 = vadd.f32 %v1692_v38, %v1473_v50  ;;  %v2178_v50 = vshll.u32 %v4758_v14, 16  ;;  %v5088_v38 = vld [vmem:[%s5282_s6 + $0xa8] sm:$0xff]  ;;  %v1058_v35 = vadd.f32 %v1057_v4, %v5599_v58  ;;  %v2263_v58 = vpack.c.b16 %v2245_v24, %v2244_v61 }
 0x137   : > { %4776 = vmatmul.msk.bf16.gmra.mxu0 %vm750_vm4, %v2262_v7  ;;  %v1266_v7 = vrot.slane %v5152_v52, 5 }
 0x138   : > { %v1407_v25 = vpop.f32.mrf.mxu2  ;;  %4566 = vmatmul.msk.bf16.gmra.mxu1 %vm750_vm4, %v5072_v19  ;;  %v5851_v1 = vadd.f32 %v2346_v30, %v1760_v20  ;;  %v4583_v30 = vrot.slane %v1126_v60, 9  ;;  %v1265_v19 = vrot.slane %v1263_v62, 4  ;;  %v2171_v20 = vrot.slane %v2169_v34, 4  ;;  %v5073_v34 = vld [vmem:[%s5282_s6 + $0xa8] sm:$0xff] }
 0x139   : > { %v1474_v27 = vadd.f32 %v1407_v25, %v1055_v3  ;;  %v2174_v3 = vrot.slane %v2172_v44, 5  ;;  %v5863_v16 = vrot.slane %v2178_v50, 5  ;;  %v2188_v50 = vshll.u32 %v4759_v41, 16 }
 0x13b   : > { %v2175_v4 = vor.u32 %v2174_v3, %v2171_v20  ;;  %v2185_v56 = vor.u32 %v2184_v51, %v5863_v16  ;;  %v2190_v20 = vrot.slane %v2188_v50, 5 }
 0x13c   : > { %v2348_v48 = vpop.f32.mrf.mxu0 }
 0x13d   : > { %v1694_v23 = vpop.f32.mrf.mxu3  ;;  %4599 = vmatmul.msk.bf16.gmra.mxu2 %vm750_vm4, %v1322_v5  ;;  %v1059_v11 = vpop.f32.mrf.mxu1  ;;  %v1264_v5 = vsel %vm5468_vm7, %v4583_v30, %v1263_v62  ;;  %v4760_v62 = vld [vmem:[%s5282_s6 + $0xc0] sm:$0xf]  ;;  %v5153_v30 = vld [vmem:[%s5282_s6 + $0x10] sm:$0xf] }
 0x13e   : > { %v1761_v21 = vadd.f32 %v1694_v23, %v1474_v27  ;;  %v1267_v27 = vsel %vm5468_vm7, %v1265_v19, %v1266_v7  ;;  %v1305_v9 = vunpack.c.l.b16 %v1264_v5  ;;  %v4761_v23 = vld [vmem:[%s5282_s6 + $0xc4] sm:$0xf]  ;;  %v2504_v7 = vrot.slane %v5153_v30, 5 }
 0x13f   : > { %v1306_v44 = vunpack.c.l.b16 %v1267_v27  ;;  %v1060_v19 = vadd.f32 %v1059_v11, %v5616_v28  ;;  %v2196_v3 = vshll.u32 %v4760_v62, 16  ;;  %v5154_v27 = vld [vmem:[%s5282_s6 + $0xb8] sm:$0xf]  ;;  %v1127_v11 = vld [vmem:[%s5282_s6 + $0xb4] sm:$0xe] }
 0x140   : > { %v1410_v8 = vpop.f32.mrf.mxu2  ;;  %v5865_v25 = vadd.f32 %v2348_v48, %v1761_v21  ;;  %v2176_v21 = vrot.slane %v2175_v4, 4  ;;  %v1270_v41 = vrot.slane %v5154_v27, 5  ;;  %v2506_v4 = vrot.slane %v2504_v7, 4  ;;  %v5089_v27 = vld [vmem:[%s5282_s6 + $0xb4] sm:$0xff] }
 0x141   : > { %v1475_v14 = vadd.f32 %v1410_v8, %v1058_v35  ;;  %v1323_v24 = vpack.c.b16 %v1306_v44, %v1305_v9  ;;  %v2193_v35 = vshrl.u32 %v4760_v62, 16  ;;  %v2202_v8 = vshll.u32 %v4761_v23, 16 }
 0x142   : > { %4712 = vmatmul.msk.bf16.gmra.mxu3 %vm750_vm4, %v5088_v38  ;;  %v2186_v38 = vrot.slane %v2185_v56, 4  ;;  %v5156_v56 = vld [vmem:[%s5282_s6 + $0x14] sm:$0x1]  ;;  %v2181_v9 = vsel %vm5294_vm3, %v2176_v21, %v5863_v16 }
 0x143   : > { %v2195_v62 = vrot.slane %v2193_v35, 4  ;;  %v2246_v21 = vunpack.c.l.b16 %v2181_v9 }
 0x144   : > { %v2351_v60 = vpop.f32.mrf.mxu0  ;;  %v2191_v44 = vsel %vm5294_vm3, %v2186_v38, %v2190_v20 }
 0x145   : > { %v1697_v47 = vpop.f32.mrf.mxu3  ;;  %v1062_v48 = vpop.f32.mrf.mxu1  ;;  %v2247_v38 = vunpack.c.l.b16 %v2191_v44 }
 0x146   : > { %v1762_v52 = vadd.f32 %v1697_v47, %v1475_v14  ;;  %v2206_v14 = vshrl.u32 %v4761_v23, 16  ;;  %v2507_v47 = vrot.slane %v5156_v56, 5  ;;  %v5893_v23 = vrot.slane %v2202_v8, 5 }
 0x147   : > { %4777 = vmatmul.msk.bf16.gmra.mxu0 %vm750_vm4, %v2263_v58  ;;  %v5155_v58 = vld [vmem:[%s5282_s6 + $0xbc] sm:$0x1]  ;;  %v1272_v56 = vrot.slane %v1270_v41, 4  ;;  %v1063_v16 = vadd.f32 %v1062_v48, %v5636_v53 }
 0x148   : > { %v1412_v61 = vpop.f32.mrf.mxu2  ;;  %4567 = vmatmul.msk.bf16.gmra.mxu1 %vm750_vm4, %v5073_v34  ;;  %v5881_v5 = vadd.f32 %v2351_v60, %v1762_v52  ;;  %v1273_v28 = vrot.slane %v5155_v58, 5  ;;  %v2198_v52 = vrot.slane %v2196_v3, 5  ;;  %v2208_v30 = vrot.slane %v2206_v14, 4 }
 0x149   : > { %v1476_v51 = vadd.f32 %v1412_v61, %v1060_v19  ;;  %v4780_v19 = vld [vmem:[%s5282_s6 + $0xc] sm:$0xe]  ;;  %v4584_v58 = vrot.slane %v1127_v11, 9  ;;  %v2508_v3 = vsel %vm5468_vm7, %v2506_v4, %v2507_v47  ;;  %v4942_v4 = vld [vmem:[%s5282_s6 + $0x18] sm:$0xf] }
 0x14a   : > { %6746 = vst [vmem:[#allocation2_spill] sm:$0xff] %v5881_v5  ;;  %v4796_v5 = vrot.slane %v4780_v19, 9  ;;  %v2199_v8 = vor.u32 %v2198_v52, %v2195_v62  ;;  %v2617_v11 = vunpack.c.l.b16 %v2508_v3  ;;  %v1274_v48 = vsel %vm5468_vm7, %v1272_v56, %v1273_v28  ;;  %v5074_v62 = vld [vmem:[%s5282_s6 + $0xb4] sm:$0xff]  ;;  %v5916_v52 = vld [vmem:[%s5282_s6 + $0x1c] sm:$0xf] }
 0x14b   : > { %v1271_v53 = vsel %vm5468_vm7, %v4584_v58, %v1270_v41  ;;  %v2209_v9 = vor.u32 %v2208_v30, %v5893_v23  ;;  %v1308_v41 = vunpack.c.l.b16 %v1274_v48  ;;  %v3172_v56 = vshrl.u32 %v4942_v4, 16 }
 0x14c   : > { %v2353_v34 = vpop.f32.mrf.mxu0  ;;  %v2505_v35 = vsel %vm5468_vm7, %v4796_v5, %v2504_v7  ;;  %v2264_v7 = vpack.c.b16 %v2247_v38, %v2246_v21  ;;  %v2200_v58 = vrot.slane %v2199_v8, 4  ;;  %v3175_v30 = vshll.u32 %v4942_v4, 16 }
 0x14d   : > { %v1699_v60 = vpop.f32.mrf.mxu3  ;;  %4600 = vmatmul.msk.bf16.gmra.mxu2 %vm750_vm4, %v1323_v24  ;;  %v1064_v50 = vpop.f32.mrf.mxu1  ;;  %v4762_v24 = vld [vmem:[%s5282_s6 + $0xc8] sm:$0x1]  ;;  %v2616_v14 = vunpack.c.l.b16 %v2505_v35  ;;  %v2210_v28 = vrot.slane %v2209_v9, 4  ;;  %v3185_v38 = vshrl.u32 %v5916_v52, 16  ;;  %v3174_v8 = vrot.slane %v3172_v56, 4 }
 0x14e   : > { %v1763_v61 = vadd.f32 %v1699_v60, %v1476_v51  ;;  %v2212_v5 = vshll.u32 %v4762_v24, 16  ;;  %v1065_v21 = vadd.f32 %v1064_v50, %v5656_v17  ;;  %v2205_v17 = vsel %vm5294_vm3, %v2200_v58, %v5893_v23  ;;  %v4944_v9 = vld [vmem:[%s5282_s6 + $0x20] sm:$0x1]  ;;  %v4945_v56 = vld [vmem:[%s5282_s6 + $0x24] sm:$0xf] }
 0x14f   : > { %v5909_v44 = vpack.c.b16 %v2617_v11, %v2616_v14  ;;  %v3177_v14 = vrot.slane %v3175_v30, 5  ;;  %v3191_v58 = vshll.u32 %v4944_v9, 16  ;;  %v5936_v30 = vld [vmem:[%s5282_s6 + $0x28] sm:$0xf] }
 0x150   : > { %v1415_v20 = vpop.f32.mrf.mxu2  ;;  %v5912_v47 = vadd.f32 %v2353_v34, %v1763_v61  ;;  %v2214_v34 = vrot.slane %v2212_v5, 5  ;;  %v3181_v61 = vshll.u32 %v5916_v52, 16 }
 0x151   : > { %v1477_v51 = vadd.f32 %v1415_v20, %v1063_v16  ;;  %v1307_v16 = vunpack.c.l.b16 %v1271_v53  ;;  %v3187_v53 = vrot.slane %v3185_v38, 4  ;;  %v3193_v38 = vrot.slane %v3191_v58, 5 }
 0x152   : > { %4713 = vmatmul.msk.bf16.gmra.mxu3 %vm750_vm4, %v5089_v27  ;;  %v2215_v50 = vsel %vm5294_vm3, %v2210_v28, %v2214_v34  ;;  %v3183_v11 = vrot.slane %v3181_v61, 5 }
 0x153   : > { %v1324_v3 = vpack.c.b16 %v1308_v41, %v1307_v16  ;;  %v3178_v16 = vor.u32 %v3177_v14, %v3174_v8  ;;  %v3199_v8 = vshll.u32 %v4945_v56, 16  ;;  %v3205_v14 = vshll.u32 %v5936_v30, 16 }
 0x154   : > { %v2356_v60 = vpop.f32.mrf.mxu0  ;;  %v3188_v41 = vor.u32 %v3187_v53, %v3183_v11 }
 0x155   : > { %v1702_v19 = vpop.f32.mrf.mxu3  ;;  %v1067_v27 = vpop.f32.mrf.mxu1  ;;  %v3179_v34 = vrot.slane %v3178_v16, 4 }
 0x156   : > { %v1764_v20 = vadd.f32 %v1702_v19, %v1477_v51  ;;  %v2249_v19 = vunpack.c.l.b16 %v2215_v50  ;;  %v1068_v23 = vadd.f32 %v1067_v27, %v5679_v2  ;;  %v3189_v61 = vrot.slane %v3188_v41, 4 }
 0x157   : > { %4778 = vmatmul.msk.bf16.gmra.mxu0 %vm750_vm4, %v2264_v7 }
 0x158   : > { %v1417_v24 = vpop.f32.mrf.mxu2  ;;  %4568 = vmatmul.msk.bf16.gmra.mxu1 %vm750_vm4, %v5074_v62  ;;  %v5923_v51 = vadd.f32 %v2356_v60, %v1764_v20  ;;  %v5090_v60 = vld [vmem:[%s5282_s6 + $0xc0] sm:$0xff]  ;;  %v2248_v62 = vunpack.c.l.b16 %v2205_v17  ;;  %v3209_v17 = vshrl.u32 %v5936_v30, 16  ;;  %v3194_v41 = vsel %vm5294_vm3, %v3189_v61, %v3193_v38  ;;  %v5962_v38 = vld [vmem:[%s5282_s6 + $0x2c] sm:$0x1] }
 0x159   : > { %v1478_v35 = vadd.f32 %v1417_v24, %v1065_v21  ;;  %v5007_v24 = vld [vmem:[%s5282_s6 + $0x18] sm:$0xe]  ;;  %v3558_v61 = vunpack.c.l.b16 %v3194_v41 }
 0x15a   : > { %v2265_v21 = vpack.c.b16 %v2249_v19, %v2248_v62  ;;  %v5158_v62 = vld [vmem:[%s5282_s6 + $0x20] sm:$0x1] }
 0x15b   : > { %v2514_v19 = vrot.slane %v5158_v62, 5 }
 0x15c   : > { %v2358_v48 = vpop.f32.mrf.mxu0 }
 0x15d   : > { %v1704_v7 = vpop.f32.mrf.mxu3  ;;  %4601 = vmatmul.msk.bf16.gmra.mxu2 %vm750_vm4, %v1324_v3  ;;  %v1069_v5 = vpop.f32.mrf.mxu1  ;;  %v3196_v3 = vshrl.u32 %v4945_v56, 16 }
 0x15e   : > { %v1765_v4 = vadd.f32 %v1704_v7, %v1478_v35  ;;  %v3843_v35 = vrot.slane %v5916_v52, 5  ;;  %v5157_v7 = vld [vmem:[%s5282_s6 + $0x1c] sm:$0xf]  ;;  %v3184_v52 = vsel %vm5294_vm3, %v3179_v34, %v3183_v11  ;;  %v3211_v11 = vrot.slane %v3209_v17, 4 }
 0x160   : > { %v1420_v20 = vpop.f32.mrf.mxu2  ;;  %v5941_v2 = vadd.f32 %v2358_v48, %v1765_v4  ;;  %v5023_v48 = vrot.slane %v5007_v24, 9  ;;  %v4781_v4 = vld [vmem:[%s5282_s6 + $0x18] sm:$0xe]  ;;  %v3845_v58 = vrot.slane %v3843_v35, 4 }
 0x161   : > { %v1479_v28 = vadd.f32 %v1420_v20, %v1068_v23  ;;  %v1070_v23 = vadd.f32 %v1069_v5, %v5699_v29  ;;  %v3846_v20 = vrot.slane %v4944_v9, 5  ;;  %v5091_v24 = vld [vmem:[%s5282_s6 + $0x18] sm:$0xff]  ;;  %v3557_v5 = vunpack.c.l.b16 %v3184_v52 }
 0x162   : > { %4714 = vmatmul.msk.bf16.gmra.mxu3 %vm750_vm4, %v5090_v60  ;;  %6747 = vst [vmem:[#allocation3_spill] sm:$0xff] %v5941_v2  ;;  %v2511_v60 = vrot.slane %v5157_v7, 5  ;;  %v5956_v7 = vrot.slane %v3205_v14, 5  ;;  %v3844_v2 = vsel %vm5468_vm7, %v5023_v48, %v3843_v35  ;;  %v3215_v35 = vshll.u32 %v5962_v38, 16 }
 0x163   : > { %v3589_v48 = vpack.c.b16 %v3558_v61, %v3557_v5  ;;  %v5159_v5 = vld [vmem:[%s5282_s6 + $0x28] sm:$0xf] }
 0x164   : > { %v2361_v27 = vpop.f32.mrf.mxu0  ;;  %v2513_v62 = vrot.slane %v2511_v60, 4  ;;  %v2518_v61 = vrot.slane %v5159_v5, 5 }
 0x165   : > { %v1707_v50 = vpop.f32.mrf.mxu3  ;;  %v1072_v53 = vpop.f32.mrf.mxu1 }
 0x166   : > { %v1766_v16 = vadd.f32 %v1707_v50, %v1479_v28  ;;  %v3198_v28 = vrot.slane %v3196_v3, 4  ;;  %v3201_v50 = vrot.slane %v3199_v8, 5  ;;  %v2515_v17 = vsel %vm5468_vm7, %v2513_v62, %v2514_v19  ;;  %v5981_v62 = vld [vmem:[%s5282_s6 + $0x34] sm:$0xf] }
 0x167   : > { %4779 = vmatmul.msk.bf16.gmra.mxu0 %vm750_vm4, %v2265_v21  ;;  %v4797_v21 = vrot.slane %v4781_v4, 9  ;;  %v1073_v4 = vadd.f32 %v1072_v53, %v5581_v37 }
 0x168   : > { %v1422_v56 = vpop.f32.mrf.mxu2  ;;  %4813 = vmatmul.msk.bf16.vlgmr.msra.gmra.mxu1 %vm750_vm4, %v5909_v44  ;;  %v5959_v29 = vadd.f32 %v2361_v27, %v1766_v16  ;;  %v3847_v44 = vsel %vm5468_vm7, %v3845_v58, %v3846_v20  ;;  %v3202_v3 = vor.u32 %v3201_v50, %v3198_v28  ;;  %v3212_v16 = vor.u32 %v3211_v11, %v5956_v7  ;;  %v5008_v11 = vld [vmem:[%s5282_s6 + $0x24] sm:$0xe] }
 0x169   : > { %v1480_v34 = vadd.f32 %v1422_v56, %v1070_v23  ;;  %v2512_v27 = vsel %vm5468_vm7, %v4797_v21, %v2511_v60  ;;  %v3955_v23 = vunpack.c.l.b16 %v3844_v2  ;;  %v3956_v41 = vunpack.c.l.b16 %v3847_v44 }
 0x16a   : > { %v2618_v20 = vunpack.c.l.b16 %v2512_v27  ;;  %v2619_v60 = vunpack.c.l.b16 %v2515_v17  ;;  %v3203_v28 = vrot.slane %v3202_v3, 4  ;;  %v3213_v19 = vrot.slane %v3212_v16, 4 }
 0x16b   : > { %v3217_v50 = vrot.slane %v3215_v35, 5  ;;  %v3850_v21 = vrot.slane %v5936_v30, 5  ;;  %v5024_v17 = vrot.slane %v5008_v11, 9  ;;  %v4782_v30 = vld [vmem:[%s5282_s6 + $0x24] sm:$0xe] }
 0x16c   : > { %v2363_v9 = vpop.f32.mrf.mxu0  ;;  %v2649_v53 = vpack.c.b16 %v2619_v60, %v2618_v20 }
 0x16d   : > { %v1709_v8 = vpop.f32.mrf.mxu3  ;;  %4926 = vmatmul.msk.bf16.vlgmr.msra.gmra.mxu2 %vm750_vm4, %v5091_v24  ;;  %v1074_v14 = vpop.f32.mrf.mxu1  ;;  %v4948_v24 = vld [vmem:[%s5282_s6 + $0x30] sm:$0xf]  ;;  %v3218_v27 = vsel %vm5294_vm3, %v3213_v19, %v3217_v50  ;;  %v5092_v50 = vld [vmem:[%s5282_s6 + $0x24] sm:$0xff] }
 0x16e   : > { %v1767_v52 = vadd.f32 %v1709_v8, %v1480_v34  ;;  %v3987_v34 = vpack.c.b16 %v3956_v41, %v3955_v23  ;;  %v3208_v8 = vsel %vm5294_vm3, %v3203_v28, %v5956_v7  ;;  %v3220_v16 = vshrl.u32 %v4948_v24, 16  ;;  %v5160_v41 = vld [vmem:[%s5282_s6 + $0x2c] sm:$0x1] }
 0x16f   : > { %v3852_v23 = vrot.slane %v3850_v21, 4  ;;  %v3853_v7 = vrot.slane %v5962_v38, 5  ;;  %v3559_v60 = vunpack.c.l.b16 %v3208_v8  ;;  %v2520_v28 = vrot.slane %v2518_v61, 4 }
 0x170   : > { %v1425_v58 = vpop.f32.mrf.mxu2  ;;  %v5983_v37 = vadd.f32 %v2363_v9, %v1767_v52  ;;  %v3223_v9 = vshll.u32 %v4948_v24, 16  ;;  %v3229_v52 = vshll.u32 %v5981_v62, 16  ;;  %v3560_v11 = vunpack.c.l.b16 %v3218_v27 }
 0x171   : > { %v1481_v56 = vadd.f32 %v1425_v58, %v1073_v4  ;;  %v1075_v4 = vadd.f32 %v1074_v14, %v5602_v63  ;;  %v2521_v58 = vrot.slane %v5160_v41, 5  ;;  %v3851_v24 = vsel %vm5468_vm7, %v5024_v17, %v3850_v21 }
 0x172   : > { %4991 = vmatmul.msk.bf16.vlgmr.msra.gmra.mxu3 %vm750_vm4, %v3589_v48  ;;  %v3233_v48 = vshrl.u32 %v5981_v62, 16  ;;  %v3222_v63 = vrot.slane %v3220_v16, 4  ;;  %v3225_v14 = vrot.slane %v3223_v9, 5  ;;  %v6004_v38 = vrot.slane %v3229_v52, 5 }
 0x173   : > { %v2522_v27 = vsel %vm5468_vm7, %v2520_v28, %v2521_v58  ;;  %v3957_v17 = vunpack.c.l.b16 %v3851_v24  ;;  %v5009_v24 = vld [vmem:[%s5282_s6 + $0x30] sm:$0xe] }
 0x174   : > { %v2366_v2 = vpop.f32.mrf.mxu0  ;;  %v3235_v5 = vrot.slane %v3233_v48, 4  ;;  %v3226_v52 = vor.u32 %v3225_v14, %v3222_v63 }
 0x175   : > { %v1712_v44 = vpop.f32.mrf.mxu3  ;;  %v1077_v3 = vpop.f32.mrf.mxu1 }
 0x176   : > { %v1768_v35 = vadd.f32 %v1712_v44, %v1481_v56  ;;  %v4798_v56 = vrot.slane %v4782_v30, 9  ;;  %v6013_v30 = vld [vmem:[%s5282_s6 + $0x38] sm:$0x1]  ;;  %v3236_v48 = vor.u32 %v3235_v5, %v6004_v38  ;;  %v3227_v28 = vrot.slane %v3226_v52, 4 }
 0x177   : > { %5040 = vmatmul.msk.bf16.vlgmr.msra.gmra.mxu0 %vm750_vm4, %v3987_v34 }
 0x178   : > { %v1427_v20 = vpop.f32.mrf.mxu2  ;;  %4814 = vmatmul.msk.bf16.gmra.mxu1 %vm750_vm4, %v2649_v53  ;;  %v6002_v34 = vadd.f32 %v2366_v2, %v1768_v35  ;;  %v3854_v53 = vsel %vm5468_vm7, %v3852_v23, %v3853_v7  ;;  %v2519_v8 = vsel %vm5468_vm7, %v4798_v56, %v2518_v61  ;;  %v3590_v2 = vpack.c.b16 %v3560_v11, %v3559_v60  ;;  %v6021_v56 = vld [vmem:[%s5282_s6 + $0x40] sm:$0xf] }
 0x179   : > { %v1482_v19 = vadd.f32 %v1427_v20, %v1075_v4  ;;  %v3958_v9 = vunpack.c.l.b16 %v3854_v53  ;;  %v1078_v61 = vadd.f32 %v1077_v3, %v5619_v22  ;;  %v2620_v4 = vunpack.c.l.b16 %v2519_v8  ;;  %v4951_v20 = vld [vmem:[%s5282_s6 + $0x3c] sm:$0xf] }
 0x17a   : > { %v2621_v23 = vunpack.c.l.b16 %v2522_v27  ;;  %v3239_v7 = vshll.u32 %v6013_v30, 16  ;;  %v3857_v22 = vrot.slane %v5981_v62, 5  ;;  %v3244_v14 = vshrl.u32 %v4951_v20, 16 }
 0x17b   : > { %v3988_v60 = vpack.c.b16 %v3958_v9, %v3957_v17  ;;  %v3247_v5 = vshll.u32 %v4951_v20, 16  ;;  %v3253_v53 = vshll.u32 %v6021_v56, 16  ;;  %v3257_v8 = vshrl.u32 %v6021_v56, 16  ;;  %v5162_v9 = vld [vmem:[%s5282_s6 + $0x38] sm:$0x1] }
 0x17c   : > { %v2368_v44 = vpop.f32.mrf.mxu0  ;;  %v3241_v11 = vrot.slane %v3239_v7, 5  ;;  %v2528_v52 = vrot.slane %v5162_v9, 5  ;;  %v3860_v62 = vrot.slane %v6013_v30, 5  ;;  %v3859_v7 = vrot.slane %v3857_v22, 4  ;;  %v6048_v9 = vld [vmem:[%s5282_s6 + $0x44] sm:$0x1] }
 0x17d   : > { %v1714_v21 = vpop.f32.mrf.mxu3  ;;  %4927 = vmatmul.msk.bf16.gmra.mxu2 %vm750_vm4, %v5092_v50  ;;  %v1079_v16 = vpop.f32.mrf.mxu1  ;;  %v2650_v50 = vpack.c.b16 %v2621_v23, %v2620_v4  ;;  %v3232_v4 = vsel %vm5294_vm3, %v3227_v28, %v6004_v38  ;;  %v3249_v20 = vrot.slane %v3247_v5, 5  ;;  %v6042_v30 = vrot.slane %v3253_v53, 5 }
 0x17e   : > { %v1769_v35 = vadd.f32 %v1714_v21, %v1482_v19  ;;  %v3237_v19 = vrot.slane %v3236_v48, 4  ;;  %v3561_v38 = vunpack.c.l.b16 %v3232_v4 }
 0x180   : > { %v1430_v41 = vpop.f32.mrf.mxu2  ;;  %v6026_v3 = vadd.f32 %v2368_v44, %v1769_v35  ;;  %v4783_v44 = vld [vmem:[%s5282_s6 + $0x30] sm:$0xe]  ;;  %v1080_v35 = vadd.f32 %v1079_v16, %v5640_v55  ;;  %v3242_v23 = vsel %vm5294_vm3, %v3237_v19, %v3241_v11 }
 0x181   : > { %v1483_v58 = vadd.f32 %v1430_v41, %v1078_v61  ;;  %v5025_v61 = vrot.slane %v5009_v24, 9  ;;  %v3259_v24 = vrot.slane %v3257_v8, 4  ;;  %v4799_v55 = vrot.slane %v4783_v44, 9 }
 0x182   : > { %4992 = vmatmul.msk.bf16.gmra.mxu3 %vm750_vm4, %v3590_v2  ;;  %v5161_v2 = vld [vmem:[%s5282_s6 + $0x34] sm:$0xf]  ;;  %v3562_v28 = vunpack.c.l.b16 %v3242_v23 }
 0x183   : > { %v2525_v17 = vrot.slane %v5161_v2, 5  ;;  %v3858_v11 = vsel %vm5468_vm7, %v5025_v61, %v3857_v22  ;;  %v3263_v22 = vshll.u32 %v6048_v9, 16 }
 0x184   : > { %v2371_v63 = vpop.f32.mrf.mxu0  ;;  %v3591_v44 = vpack.c.b16 %v3562_v28, %v3561_v38  ;;  %v5163_v28 = vld [vmem:[%s5282_s6 + $0x40] sm:$0xf] }
 0x185   : > { %v1717_v27 = vpop.f32.mrf.mxu3  ;;  %v1082_v21 = vpop.f32.mrf.mxu1  ;;  %v2527_v16 = vrot.slane %v2525_v17, 4 }
 0x186   : > { %v1770_v48 = vadd.f32 %v1717_v27, %v1483_v58  ;;  %v3246_v58 = vrot.slane %v3244_v14, 4  ;;  %v5093_v27 = vld [vmem:[%s5282_s6 + $0x30] sm:$0xff] }
 0x187   : > { %5041 = vmatmul.msk.bf16.gmra.mxu0 %vm750_vm4, %v3988_v60  ;;  %v2529_v8 = vsel %vm5468_vm7, %v2527_v16, %v2528_v52  ;;  %v6067_v16 = vld [vmem:[%s5282_s6 + $0x4c] sm:$0xf] }
 0x188   : > { %v1432_v41 = vpop.f32.mrf.mxu2  ;;  %4815 = vmatmul.msk.bf16.gmra.mxu1 %vm750_vm4, %v2650_v50  ;;  %v6045_v2 = vadd.f32 %v2371_v63, %v1770_v48  ;;  %v3861_v50 = vsel %vm5468_vm7, %v3859_v7, %v3860_v62  ;;  %v3250_v14 = vor.u32 %v3249_v20, %v3246_v58  ;;  %v2526_v63 = vsel %vm5468_vm7, %v4799_v55, %v2525_v17 }
 0x189   : > { %v1484_v60 = vadd.f32 %v1432_v41, %v1080_v35  ;;  %v3260_v48 = vor.u32 %v3259_v24, %v6042_v30  ;;  %v1083_v62 = vadd.f32 %v1082_v21, %v5663_v26  ;;  %v3959_v35 = vunpack.c.l.b16 %v3858_v11  ;;  %v5010_v24 = vld [vmem:[%s5282_s6 + $0x3c] sm:$0xe] }
 0x18a   : > { %v3960_v4 = vunpack.c.l.b16 %v3861_v50  ;;  %v2622_v7 = vunpack.c.l.b16 %v2526_v63  ;;  %v2623_v17 = vunpack.c.l.b16 %v2529_v8  ;;  %v3251_v58 = vrot.slane %v3250_v14, 4 }
 0x18b   : > { %v3261_v52 = vrot.slane %v3260_v48, 4  ;;  %v3265_v20 = vrot.slane %v3263_v22, 5  ;;  %v3864_v55 = vrot.slane %v6021_v56, 5  ;;  %v2532_v11 = vrot.slane %v5163_v28, 5  ;;  %v4784_v56 = vld [vmem:[%s5282_s6 + $0x3c] sm:$0xe] }
 0x18c   : > { %v2373_v19 = vpop.f32.mrf.mxu0  ;;  %v2651_v38 = vpack.c.b16 %v2623_v17, %v2622_v7  ;;  %v5026_v8 = vrot.slane %v5010_v24, 9 }
 0x18d   : > { %v1719_v5 = vpop.f32.mrf.mxu3  ;;  %4928 = vmatmul.msk.bf16.gmra.mxu2 %vm750_vm4, %v5093_v27  ;;  %v1084_v53 = vpop.f32.mrf.mxu1  ;;  %v4954_v27 = vld [vmem:[%s5282_s6 + $0x48] sm:$0xf]  ;;  %v3266_v63 = vsel %vm5294_vm3, %v3261_v52, %v3265_v20  ;;  %v5094_v20 = vld [vmem:[%s5282_s6 + $0x3c] sm:$0xff] }
 0x18e   : > { %v1771_v61 = vadd.f32 %v1719_v5, %v1484_v60  ;;  %v3989_v60 = vpack.c.b16 %v3960_v4, %v3959_v35  ;;  %v3256_v5 = vsel %vm5294_vm3, %v3251_v58, %v6042_v30  ;;  %v3268_v48 = vshrl.u32 %v4954_v27, 16  ;;  %v5164_v4 = vld [vmem:[%s5282_s6 + $0x44] sm:$0x1] }
 0x18f   : > { %v3866_v35 = vrot.slane %v3864_v55, 4  ;;  %v3867_v30 = vrot.slane %v6048_v9, 5  ;;  %v3563_v17 = vunpack.c.l.b16 %v3256_v5  ;;  %v2534_v58 = vrot.slane %v2532_v11, 4 }
 0x190   : > { %v1435_v23 = vpop.f32.mrf.mxu2  ;;  %v6069_v26 = vadd.f32 %v2373_v19, %v1771_v61  ;;  %v3271_v19 = vshll.u32 %v4954_v27, 16  ;;  %v3277_v61 = vshll.u32 %v6067_v16, 16  ;;  %v3564_v24 = vunpack.c.l.b16 %v3266_v63 }
 0x191   : > { %v1485_v41 = vadd.f32 %v1435_v23, %v1083_v62  ;;  %v1085_v62 = vadd.f32 %v1084_v53, %v5681_v43  ;;  %v2535_v23 = vrot.slane %v5164_v4, 5  ;;  %v3865_v27 = vsel %vm5468_vm7, %v5026_v8, %v3864_v55 }
 0x192   : > { %4993 = vmatmul.msk.bf16.gmra.mxu3 %vm750_vm4, %v3591_v44  ;;  %v3281_v44 = vshrl.u32 %v6067_v16, 16  ;;  %v3270_v43 = vrot.slane %v3268_v48, 4  ;;  %v3273_v53 = vrot.slane %v3271_v19, 5  ;;  %v6090_v9 = vrot.slane %v3277_v61, 5 }
 0x193   : > { %v2536_v63 = vsel %vm5468_vm7, %v2534_v58, %v2535_v23  ;;  %v3961_v8 = vunpack.c.l.b16 %v3865_v27  ;;  %v5011_v27 = vld [vmem:[%s5282_s6 + $0x48] sm:$0xe] }
 0x194   : > { %v2376_v21 = vpop.f32.mrf.mxu0  ;;  %v3283_v28 = vrot.slane %v3281_v44, 4  ;;  %v3274_v61 = vor.u32 %v3273_v53, %v3270_v43 }
 0x195   : > { %v1722_v50 = vpop.f32.mrf.mxu3  ;;  %v1087_v14 = vpop.f32.mrf.mxu1 }
 0x196   : > { %v1772_v22 = vadd.f32 %v1722_v50, %v1485_v41  ;;  %v4800_v41 = vrot.slane %v4784_v56, 9  ;;  %v6099_v56 = vld [vmem:[%s5282_s6 + $0x50] sm:$0x1]  ;;  %v3284_v44 = vor.u32 %v3283_v28, %v6090_v9  ;;  %v3275_v58 = vrot.slane %v3274_v61, 4 }
 0x197   : > { %5042 = vmatmul.msk.bf16.gmra.mxu0 %vm750_vm4, %v3989_v60 }
 0x198   : > { %v1437_v7 = vpop.f32.mrf.mxu2  ;;  %4816 = vmatmul.msk.bf16.gmra.mxu1 %vm750_vm4, %v2651_v38  ;;  %v6088_v60 = vadd.f32 %v2376_v21, %v1772_v22  ;;  %v3868_v38 = vsel %vm5468_vm7, %v3866_v35, %v3867_v30  ;;  %v2533_v5 = vsel %vm5468_vm7, %v4800_v41, %v2532_v11  ;;  %v3592_v21 = vpack.c.b16 %v3564_v24, %v3563_v17  ;;  %v6107_v41 = vld [vmem:[%s5282_s6 + $0x58] sm:$0xf] }
 0x199   : > { %v1486_v52 = vadd.f32 %v1437_v7, %v1085_v62  ;;  %v3962_v19 = vunpack.c.l.b16 %v3868_v38  ;;  %v1088_v11 = vadd.f32 %v1087_v14, %v5702_v40  ;;  %v2624_v62 = vunpack.c.l.b16 %v2533_v5  ;;  %v4957_v7 = vld [vmem:[%s5282_s6 + $0x54] sm:$0xf] }
 0x19a   : > { %v2625_v35 = vunpack.c.l.b16 %v2536_v63  ;;  %v3287_v30 = vshll.u32 %v6099_v56, 16  ;;  %v3871_v40 = vrot.slane %v6067_v16, 5  ;;  %v3292_v53 = vshrl.u32 %v4957_v7, 16 }
 0x19b   : > { %v3990_v17 = vpack.c.b16 %v3962_v19, %v3961_v8  ;;  %v3295_v28 = vshll.u32 %v4957_v7, 16  ;;  %v3301_v38 = vshll.u32 %v6107_v41, 16  ;;  %v3305_v5 = vshrl.u32 %v6107_v41, 16  ;;  %v5166_v19 = vld [vmem:[%s5282_s6 + $0x50] sm:$0x1] }
 0x19c   : > { %v2378_v50 = vpop.f32.mrf.mxu0  ;;  %v3289_v24 = vrot.slane %v3287_v30, 5  ;;  %v2542_v61 = vrot.slane %v5166_v19, 5  ;;  %v3874_v16 = vrot.slane %v6099_v56, 5  ;;  %v3873_v30 = vrot.slane %v3871_v40, 4  ;;  %v6134_v19 = vld [vmem:[%s5282_s6 + $0x5c] sm:$0x1] }
 0x19d   : > { %v1724_v55 = vpop.f32.mrf.mxu3  ;;  %4929 = vmatmul.msk.bf16.gmra.mxu2 %vm750_vm4, %v5094_v20  ;;  %v1089_v48 = vpop.f32.mrf.mxu1  ;;  %v2652_v20 = vpack.c.b16 %v2625_v35, %v2624_v62  ;;  %v3280_v62 = vsel %vm5294_vm3, %v3275_v58, %v6090_v9  ;;  %v3297_v7 = vrot.slane %v3295_v28, 5  ;;  %v6128_v56 = vrot.slane %v3301_v38, 5 }
 0x19e   : > { %v1773_v22 = vadd.f32 %v1724_v55, %v1486_v52  ;;  %v3285_v52 = vrot.slane %v3284_v44, 4  ;;  %v3565_v9 = vunpack.c.l.b16 %v3280_v62 }
 0x1a0   : > { %v1440_v4 = vpop.f32.mrf.mxu2  ;;  %v6112_v14 = vadd.f32 %v2378_v50, %v1773_v22  ;;  %v4785_v50 = vld [vmem:[%s5282_s6 + $0x48] sm:$0xe]  ;;  %v1090_v22 = vadd.f32 %v1089_v48, %v5717_v10  ;;  %v3290_v35 = vsel %vm5294_vm3, %v3285_v52, %v3289_v24 }
 0x1a1   : > { %v1487_v23 = vadd.f32 %v1440_v4, %v1088_v11  ;;  %v5027_v11 = vrot.slane %v5011_v27, 9  ;;  %v3307_v27 = vrot.slane %v3305_v5, 4  ;;  %v4801_v10 = vrot.slane %v4785_v50, 9 }
 0x1a2   : > { %4994 = vmatmul.msk.bf16.gmra.mxu3 %vm750_vm4, %v3592_v21  ;;  %v5165_v21 = vld [vmem:[%s5282_s6 + $0x4c] sm:$0xf]  ;;  %v3566_v58 = vunpack.c.l.b16 %v3290_v35 }
 0x1a3   : > { %v2539_v8 = vrot.slane %v5165_v21, 5  ;;  %v3872_v24 = vsel %vm5468_vm7, %v5027_v11, %v3871_v40  ;;  %v3311_v40 = vshll.u32 %v6134_v19, 16 }
 0x1a4   : > { %v2381_v43 = vpop.f32.mrf.mxu0  ;;  %v3593_v50 = vpack.c.b16 %v3566_v58, %v3565_v9  ;;  %v5167_v58 = vld [vmem:[%s5282_s6 + $0x58] sm:$0xf] }
 0x1a5   : > { %v1727_v63 = vpop.f32.mrf.mxu3  ;;  %v1092_v55 = vpop.f32.mrf.mxu1  ;;  %v2541_v48 = vrot.slane %v2539_v8, 4 }
 0x1a6   : > { %v1774_v44 = vadd.f32 %v1727_v63, %v1487_v23  ;;  %v3294_v23 = vrot.slane %v3292_v53, 4  ;;  %v5095_v63 = vld [vmem:[%s5282_s6 + $0x48] sm:$0xff] }
 0x1a7   : > { %5043 = vmatmul.msk.bf16.gmra.mxu0 %vm750_vm4, %v3990_v17  ;;  %v2543_v5 = vsel %vm5468_vm7, %v2541_v48, %v2542_v61  ;;  %v6153_v48 = vld [vmem:[%s5282_s6 + $0x64] sm:$0xf] }
 0x1a8   : > { %v1442_v4 = vpop.f32.mrf.mxu2  ;;  %4817 = vmatmul.msk.bf16.gmra.mxu1 %vm750_vm4, %v2652_v20  ;;  %v6131_v21 = vadd.f32 %v2381_v43, %v1774_v44  ;;  %v3875_v20 = vsel %vm5468_vm7, %v3873_v30, %v3874_v16  ;;  %v3298_v53 = vor.u32 %v3297_v7, %v3294_v23  ;;  %v2540_v43 = vsel %vm5468_vm7, %v4801_v10, %v2539_v8 }
 0x1a9   : > { %v1488_v17 = vadd.f32 %v1442_v4, %v1090_v22  ;;  %v3308_v44 = vor.u32 %v3307_v27, %v6128_v56  ;;  %v1093_v16 = vadd.f32 %v1092_v55, %v5593_v49  ;;  %v3963_v22 = vunpack.c.l.b16 %v3872_v24  ;;  %v5012_v27 = vld [vmem:[%s5282_s6 + $0x54] sm:$0xe] }
 0x1aa   : > { %v3964_v62 = vunpack.c.l.b16 %v3875_v20  ;;  %v2626_v30 = vunpack.c.l.b16 %v2540_v43  ;;  %v2627_v8 = vunpack.c.l.b16 %v2543_v5  ;;  %v3299_v23 = vrot.slane %v3298_v53, 4 }
 0x1ab   : > { %v3309_v61 = vrot.slane %v3308_v44, 4  ;;  %v3313_v7 = vrot.slane %v3311_v40, 5  ;;  %v3878_v10 = vrot.slane %v6107_v41, 5  ;;  %v2546_v24 = vrot.slane %v5167_v58, 5  ;;  %v4786_v41 = vld [vmem:[%s5282_s6 + $0x54] sm:$0xe] }
 0x1ac   : > { %v2383_v52 = vpop.f32.mrf.mxu0  ;;  %v2653_v9 = vpack.c.b16 %v2627_v8, %v2626_v30  ;;  %v5028_v5 = vrot.slane %v5012_v27, 9 }
 0x1ad   : > { %v1729_v28 = vpop.f32.mrf.mxu3  ;;  %4930 = vmatmul.msk.bf16.gmra.mxu2 %vm750_vm4, %v5095_v63  ;;  %v1094_v38 = vpop.f32.mrf.mxu1  ;;  %v4960_v63 = vld [vmem:[%s5282_s6 + $0x60] sm:$0xf]  ;;  %v3314_v43 = vsel %vm5294_vm3, %v3309_v61, %v3313_v7  ;;  %v5096_v7 = vld [vmem:[%s5282_s6 + $0x54] sm:$0xff] }
 0x1ae   : > { %v1775_v11 = vadd.f32 %v1729_v28, %v1488_v17  ;;  %v3991_v17 = vpack.c.b16 %v3964_v62, %v3963_v22  ;;  %v3304_v28 = vsel %vm5294_vm3, %v3299_v23, %v6128_v56  ;;  %v3316_v44 = vshrl.u32 %v4960_v63, 16  ;;  %v5168_v62 = vld [vmem:[%s5282_s6 + $0x5c] sm:$0x1] }
 0x1af   : > { %v3880_v22 = vrot.slane %v3878_v10, 4  ;;  %v3881_v56 = vrot.slane %v6134_v19, 5  ;;  %v3567_v8 = vunpack.c.l.b16 %v3304_v28  ;;  %v2548_v23 = vrot.slane %v2546_v24, 4 }
 0x1b0   : > { %v1445_v35 = vpop.f32.mrf.mxu2  ;;  %v6155_v49 = vadd.f32 %v2383_v52, %v1775_v11  ;;  %v3319_v52 = vshll.u32 %v4960_v63, 16  ;;  %v3325_v11 = vshll.u32 %v6153_v48, 16  ;;  %v3568_v27 = vunpack.c.l.b16 %v3314_v43 }
 0x1b1   : > { %v1489_v4 = vadd.f32 %v1445_v35, %v1093_v16  ;;  %v1095_v16 = vadd.f32 %v1094_v38, %v5612_v0  ;;  %v2549_v35 = vrot.slane %v5168_v62, 5  ;;  %v3879_v63 = vsel %vm5468_vm7, %v5028_v5, %v3878_v10 }
 0x1b2   : > { %4995 = vmatmul.msk.bf16.gmra.mxu3 %vm750_vm4, %v3593_v50  ;;  %v3329_v50 = vshrl.u32 %v6153_v48, 16  ;;  %v3318_v0 = vrot.slane %v3316_v44, 4  ;;  %v3321_v38 = vrot.slane %v3319_v52, 5  ;;  %v6176_v19 = vrot.slane %v3325_v11, 5 }
 0x1b3   : > { %v2550_v43 = vsel %vm5468_vm7, %v2548_v23, %v2549_v35  ;;  %v3965_v5 = vunpack.c.l.b16 %v3879_v63  ;;  %v5013_v63 = vld [vmem:[%s5282_s6 + $0x60] sm:$0xe] }
 0x1b4   : > { %v2386_v55 = vpop.f32.mrf.mxu0  ;;  %v3331_v58 = vrot.slane %v3329_v50, 4  ;;  %v3322_v11 = vor.u32 %v3321_v38, %v3318_v0 }
 0x1b5   : > { %v1732_v20 = vpop.f32.mrf.mxu3  ;;  %v1097_v53 = vpop.f32.mrf.mxu1 }
 0x1b6   : > { %v1776_v40 = vadd.f32 %v1732_v20, %v1489_v4  ;;  %v4802_v4 = vrot.slane %v4786_v41, 9  ;;  %v6185_v41 = vld [vmem:[%s5282_s6 + $0x68] sm:$0x1]  ;;  %v3332_v50 = vor.u32 %v3331_v58, %v6176_v19  ;;  %v3323_v23 = vrot.slane %v3322_v11, 4 }
 0x1b7   : > { %5044 = vmatmul.msk.bf16.gmra.mxu0 %vm750_vm4, %v3991_v17 }
 0x1b8   : > { %v1447_v30 = vpop.f32.mrf.mxu2  ;;  %4818 = vmatmul.msk.bf16.gmra.mxu1 %vm750_vm4, %v2653_v9  ;;  %v6174_v17 = vadd.f32 %v2386_v55, %v1776_v40  ;;  %v3882_v9 = vsel %vm5468_vm7, %v3880_v22, %v3881_v56  ;;  %v2547_v28 = vsel %vm5468_vm7, %v4802_v4, %v2546_v24  ;;  %v3594_v55 = vpack.c.b16 %v3568_v27, %v3567_v8  ;;  %v6193_v4 = vld [vmem:[%s5282_s6 + $0x70] sm:$0xf] }
 0x1b9   : > { %v1490_v61 = vadd.f32 %v1447_v30, %v1095_v16  ;;  %v3966_v52 = vunpack.c.l.b16 %v3882_v9  ;;  %v1098_v24 = vadd.f32 %v1097_v53, %v5633_v39  ;;  %v2628_v16 = vunpack.c.l.b16 %v2547_v28  ;;  %v4963_v30 = vld [vmem:[%s5282_s6 + $0x6c] sm:$0xf] }
 0x1ba   : > { %v2629_v22 = vunpack.c.l.b16 %v2550_v43  ;;  %v3335_v56 = vshll.u32 %v6185_v41, 16  ;;  %v3885_v39 = vrot.slane %v6153_v48, 5  ;;  %v3340_v38 = vshrl.u32 %v4963_v30, 16 }
 0x1bb   : > { %v3992_v8 = vpack.c.b16 %v3966_v52, %v3965_v5  ;;  %v3343_v58 = vshll.u32 %v4963_v30, 16  ;;  %v3349_v9 = vshll.u32 %v6193_v4, 16  ;;  %v3353_v28 = vshrl.u32 %v6193_v4, 16  ;;  %v5170_v52 = vld [vmem:[%s5282_s6 + $0x68] sm:$0x1] }
 0x1bc   : > { %v2388_v20 = vpop.f32.mrf.mxu0  ;;  %v3337_v27 = vrot.slane %v3335_v56, 5  ;;  %v2556_v11 = vrot.slane %v5170_v52, 5  ;;  %v3888_v48 = vrot.slane %v6185_v41, 5  ;;  %v3887_v56 = vrot.slane %v3885_v39, 4 }
 0x1bd   : > { %v1734_v10 = vpop.f32.mrf.mxu3  ;;  %4931 = vmatmul.msk.bf16.gmra.mxu2 %vm750_vm4, %v5096_v7  ;;  %v1099_v44 = vpop.f32.mrf.mxu1  ;;  %v2654_v7 = vpack.c.b16 %v2629_v22, %v2628_v16  ;;  %v3328_v16 = vsel %vm5294_vm3, %v3323_v23, %v6176_v19  ;;  %v3345_v30 = vrot.slane %v3343_v58, 5  ;;  %v3351_v41 = vrot.slane %v3349_v9, 5  ;;  %v6218_v23 = vld [vmem:[%s5282_s6 + $0x74] sm:$0x1] }
 0x1be   : > { %v1777_v40 = vadd.f32 %v1734_v10, %v1490_v61  ;;  %v3333_v61 = vrot.slane %v3332_v50, 4  ;;  %v3569_v52 = vunpack.c.l.b16 %v3328_v16 }
 0x1c0   : > { %v1450_v62 = vpop.f32.mrf.mxu2  ;;  %v6198_v53 = vadd.f32 %v2388_v20, %v1777_v40  ;;  %v4787_v20 = vld [vmem:[%s5282_s6 + $0x60] sm:$0xe]  ;;  %v1100_v40 = vadd.f32 %v1099_v44, %v5652_v6  ;;  %v3338_v22 = vsel %vm5294_vm3, %v3333_v61, %v3337_v27 }
 0x1c1   : > { %v1491_v35 = vadd.f32 %v1450_v62, %v1098_v24  ;;  %v5029_v24 = vrot.slane %v5013_v63, 9  ;;  %v3355_v63 = vrot.slane %v3353_v28, 4  ;;  %v3570_v19 = vunpack.c.l.b16 %v3338_v22 }
 0x1c2   : > { %4996 = vmatmul.msk.bf16.gmra.mxu3 %vm750_vm4, %v3594_v55  ;;  %6748 = vst [vmem:[#allocation4_spill] sm:$0xff] %v6198_v53  ;;  %v5169_v55 = vld [vmem:[%s5282_s6 + $0x64] sm:$0xf] }
 0x1c3   : > { %v2553_v5 = vrot.slane %v5169_v55, 5  ;;  %v4803_v55 = vrot.slane %v4787_v20, 9  ;;  %v3886_v61 = vsel %vm5468_vm7, %v5029_v24, %v3885_v39  ;;  %v3356_v28 = vor.u32 %v3355_v63, %v3351_v41 }
 0x1c4   : > { %v2391_v0 = vpop.f32.mrf.mxu0  ;;  %v3595_v24 = vpack.c.b16 %v3570_v19, %v3569_v52  ;;  %v3967_v20 = vunpack.c.l.b16 %v3886_v61 }
 0x1c5   : > { %v1737_v43 = vpop.f32.mrf.mxu3  ;;  %v1102_v10 = vpop.f32.mrf.mxu1  ;;  %v2555_v6 = vrot.slane %v2553_v5, 4 }
 0x1c6   : > { %v1778_v50 = vadd.f32 %v1737_v43, %v1491_v35  ;;  %v3342_v35 = vrot.slane %v3340_v38, 4 }
 0x1c7   : > { %5045 = vmatmul.msk.bf16.gmra.mxu0 %vm750_vm4, %v3992_v8  ;;  %v5097_v8 = vld [vmem:[%s5282_s6 + $0x60] sm:$0xff]  ;;  %v2557_v9 = vsel %vm5468_vm7, %v2555_v6, %v2556_v11  ;;  %v3892_v6 = vrot.slane %v6193_v4, 5 }
 0x1c8   : > { %v1452_v62 = vpop.f32.mrf.mxu2  ;;  %4819 = vmatmul.msk.bf16.gmra.mxu1 %vm750_vm4, %v2654_v7  ;;  %v6215_v44 = vadd.f32 %v2391_v0, %v1778_v50  ;;  %v3889_v7 = vsel %vm5468_vm7, %v3887_v56, %v3888_v48  ;;  %v3346_v27 = vor.u32 %v3345_v30, %v3342_v35  ;;  %v2554_v0 = vsel %vm5468_vm7, %v4803_v55, %v2553_v5  ;;  %v4966_v30 = vld [vmem:[%s5282_s6 + $0x78] sm:$0xf]  ;;  %v5014_v55 = vld [vmem:[%s5282_s6 + $0x6c] sm:$0xe] }
 0x1c9   : > { %v1492_v43 = vadd.f32 %v1452_v62, %v1100_v40  ;;  %v3359_v50 = vshll.u32 %v6218_v23, 16  ;;  %v1103_v48 = vadd.f32 %v1102_v10, %v5671_v45  ;;  %v3968_v40 = vunpack.c.l.b16 %v3889_v7 }
 0x1ca   : > { %v2630_v22 = vunpack.c.l.b16 %v2554_v0  ;;  %v2631_v56 = vunpack.c.l.b16 %v2557_v9  ;;  %v3347_v5 = vrot.slane %v3346_v27, 4  ;;  %v3357_v35 = vrot.slane %v3356_v28, 4  ;;  %v4788_v27 = vld [vmem:[%s5282_s6 + $0x6c] sm:$0xe] }
 0x1cb   : > { %v3361_v11 = vrot.slane %v3359_v50, 5  ;;  %v3993_v63 = vpack.c.b16 %v3968_v40, %v3967_v20  ;;  %v3364_v9 = vshrl.u32 %v4966_v30, 16  ;;  %v3367_v28 = vshll.u32 %v4966_v30, 16 }
 0x1cc   : > { %v2393_v53 = vpop.f32.mrf.mxu0  ;;  %v2655_v10 = vpack.c.b16 %v2631_v56, %v2630_v22  ;;  %v3352_v61 = vsel %vm5294_vm3, %v3347_v5, %v3351_v41  ;;  %v5030_v41 = vrot.slane %v5014_v55, 9  ;;  %v4804_v22 = vrot.slane %v4788_v27, 9 }
 0x1cd   : > { %v1739_v38 = vpop.f32.mrf.mxu3  ;;  %4932 = vmatmul.msk.bf16.gmra.mxu2 %vm750_vm4, %v5097_v8  ;;  %v1104_v58 = vpop.f32.mrf.mxu1  ;;  %v3362_v7 = vsel %vm5294_vm3, %v3357_v35, %v3361_v11  ;;  %v3571_v20 = vunpack.c.l.b16 %v3352_v61  ;;  %v5172_v35 = vld [vmem:[%s5282_s6 + $0x74] sm:$0x1]  ;;  %v6263_v61 = vld [vmem:[%s5282_s6 + $0x80] sm:$0x1] }
 0x1ce   : > { %v1779_v39 = vadd.f32 %v1739_v38, %v1492_v43  ;;  %v6234_v43 = vld [vmem:[%s5282_s6 + $0x7c] sm:$0xf]  ;;  %v5171_v38 = vld [vmem:[%s5282_s6 + $0x70] sm:$0xf]  ;;  %v3572_v40 = vunpack.c.l.b16 %v3362_v7  ;;  %v2563_v11 = vrot.slane %v5172_v35, 5 }
 0x1cf   : > { %v2560_v0 = vrot.slane %v5171_v38, 5  ;;  %v3373_v50 = vshll.u32 %v6234_v43, 16  ;;  %v3377_v4 = vshrl.u32 %v6234_v43, 16 }
 0x1d0   : > { %v1455_v16 = vpop.f32.mrf.mxu2  ;;  %v6236_v8 = vadd.f32 %v2393_v53, %v1779_v39  ;;  %v1105_v39 = vadd.f32 %v1104_v58, %v5694_v12  ;;  %v3369_v12 = vrot.slane %v3367_v28, 5 }
 0x1d1   : > { %v1493_v62 = vadd.f32 %v1455_v16, %v1103_v48  ;;  %v3894_v16 = vrot.slane %v3892_v6, 4  ;;  %v2562_v5 = vrot.slane %v2560_v0, 4  ;;  %v6256_v58 = vrot.slane %v3373_v50, 5 }
 0x1d2   : > { %4997 = vmatmul.msk.bf16.gmra.mxu3 %vm750_vm4, %v3595_v24  ;;  %v3895_v24 = vrot.slane %v6218_v23, 5  ;;  %v3379_v23 = vrot.slane %v3377_v4, 4  ;;  %v2561_v27 = vsel %vm5468_vm7, %v4804_v22, %v2560_v0  ;;  %v4969_v22 = vld [vmem:[%s5282_s6 + $0x84] sm:$0xf] }
 0x1d3   : > { %v2564_v38 = vsel %vm5468_vm7, %v2562_v5, %v2563_v11  ;;  %v5015_v5 = vld [vmem:[%s5282_s6 + $0x78] sm:$0xe] }
 0x1d4   : > { %v2396_v45 = vpop.f32.mrf.mxu0 }
 0x1d5   : > { %v1742_v52 = vpop.f32.mrf.mxu3  ;;  %v1107_v19 = vpop.f32.mrf.mxu1 }
 0x1d6   : > { %v1780_v53 = vadd.f32 %v1742_v52, %v1493_v62  ;;  %v5098_v62 = vld [vmem:[%s5282_s6 + $0x6c] sm:$0xff]  ;;  %v3896_v52 = vsel %vm5468_vm7, %v3894_v16, %v3895_v24  ;;  %v1108_v50 = vadd.f32 %v1107_v19, %v5713_v59  ;;  %v2633_v16 = vunpack.c.l.b16 %v2564_v38  ;;  %v6278_v19 = vld [vmem:[%s5282_s6 + $0x88] sm:$0xf] }
 0x1d7   : > { %5046 = vmatmul.msk.bf16.gmra.mxu0 %vm750_vm4, %v3993_v63  ;;  %v3366_v63 = vrot.slane %v3364_v9, 4  ;;  %v3899_v59 = vrot.slane %v6234_v43, 5  ;;  %v3401_v43 = vshrl.u32 %v6278_v19, 16 }
 0x1d8   : > { %v1457_v48 = vpop.f32.mrf.mxu2  ;;  %4820 = vmatmul.msk.bf16.gmra.mxu1 %vm750_vm4, %v2655_v10  ;;  %v6254_v30 = vadd.f32 %v2396_v45, %v1780_v53  ;;  %v3893_v10 = vsel %vm5468_vm7, %v5030_v41, %v3892_v6  ;;  %v3596_v53 = vpack.c.b16 %v3572_v40, %v3571_v20  ;;  %v3380_v6 = vor.u32 %v3379_v23, %v6256_v58 }
 0x1d9   : > { %v1494_v56 = vadd.f32 %v1457_v48, %v1105_v39  ;;  %v3370_v28 = vor.u32 %v3369_v12, %v3366_v63  ;;  %v3969_v4 = vunpack.c.l.b16 %v3893_v10  ;;  %v3970_v39 = vunpack.c.l.b16 %v3896_v52 }
 0x1da   : > { %v3383_v41 = vshll.u32 %v6263_v61, 16  ;;  %v2632_v48 = vunpack.c.l.b16 %v2561_v27  ;;  %v3381_v40 = vrot.slane %v3380_v6, 4  ;;  %v3388_v63 = vshrl.u32 %v4969_v22, 16  ;;  %v5173_v27 = vld [vmem:[%s5282_s6 + $0x7c] sm:$0xf] }
 0x1db   : > { %v3371_v20 = vrot.slane %v3370_v28, 4  ;;  %v3391_v12 = vshll.u32 %v4969_v22, 16  ;;  %v2567_v38 = vrot.slane %v5173_v27, 5  ;;  %v5031_v28 = vrot.slane %v5015_v5, 9  ;;  %v5099_v22 = vld [vmem:[%s5282_s6 + $0x78] sm:$0xff] }
 0x1dc   : > { %v2398_v55 = vpop.f32.mrf.mxu0  ;;  %v2656_v11 = vpack.c.b16 %v2633_v16, %v2632_v48  ;;  %v3397_v6 = vshll.u32 %v6278_v19, 16  ;;  %v3390_v48 = vrot.slane %v3388_v63, 4 }
 0x1dd   : > { %v1744_v7 = vpop.f32.mrf.mxu3  ;;  %4933 = vmatmul.msk.bf16.gmra.mxu2 %vm750_vm4, %v5098_v62  ;;  %v1109_v45 = vpop.f32.mrf.mxu1  ;;  %v3385_v62 = vrot.slane %v3383_v41, 5  ;;  %v3901_v41 = vrot.slane %v3899_v59, 4  ;;  %v3393_v16 = vrot.slane %v3391_v12, 5 }
 0x1de   : > { %v1781_v9 = vadd.f32 %v1744_v7, %v1494_v56  ;;  %v3994_v56 = vpack.c.b16 %v3970_v39, %v3969_v4  ;;  %v4789_v7 = vld [vmem:[%s5282_s6 + $0x78] sm:$0xe]  ;;  %v3902_v4 = vrot.slane %v6263_v61, 5  ;;  %v6300_v61 = vld [vmem:[%s5282_s6 + $0x8c] sm:$0x1] }
 0x1df   : > { %v3394_v12 = vor.u32 %v3393_v16, %v3390_v48  ;;  %v4972_v16 = vld [vmem:[%s5282_s6 + $0x90] sm:$0xf] }
 0x1e0   : > { %v1460_v24 = vpop.f32.mrf.mxu2  ;;  %v6280_v23 = vadd.f32 %v2398_v55, %v1781_v9  ;;  %v3376_v55 = vsel %vm5294_vm3, %v3371_v20, %v6256_v58  ;;  %v3386_v9 = vsel %vm5294_vm3, %v3381_v40, %v3385_v62  ;;  %v3399_v40 = vrot.slane %v3397_v6, 5 }
 0x1e1   : > { %v1495_v0 = vadd.f32 %v1460_v24, %v1108_v50  ;;  %v1110_v50 = vadd.f32 %v1109_v45, %v5730_v32  ;;  %v4805_v24 = vrot.slane %v4789_v7, 9  ;;  %v2569_v32 = vrot.slane %v2567_v38, 4  ;;  %v5174_v45 = vld [vmem:[%s5282_s6 + $0x80] sm:$0x1] }
 0x1e2   : > { %4998 = vmatmul.msk.bf16.gmra.mxu3 %vm750_vm4, %v3596_v53  ;;  %v3573_v58 = vunpack.c.l.b16 %v3376_v55  ;;  %v3574_v20 = vunpack.c.l.b16 %v3386_v9  ;;  %v3403_v62 = vrot.slane %v3401_v43, 4  ;;  %v3903_v63 = vsel %vm5468_vm7, %v3901_v41, %v3902_v4 }
 0x1e3   : > { %v2568_v27 = vsel %vm5468_vm7, %v4805_v24, %v2567_v38  ;;  %v3972_v55 = vunpack.c.l.b16 %v3903_v63  ;;  %v3395_v48 = vrot.slane %v3394_v12, 4 }
 0x1e4   : > { %v2401_v35 = vpop.f32.mrf.mxu0  ;;  %v3597_v43 = vpack.c.b16 %v3574_v20, %v3573_v58  ;;  %v3412_v58 = vshrl.u32 %v4972_v16, 16 }
 0x1e5   : > { %v1747_v10 = vpop.f32.mrf.mxu3  ;;  %v2724_v52 = vpop.f32.mrf.mxu1 }
 0x1e6   : > { %v1782_v53 = vadd.f32 %v1747_v10, %v1495_v0  ;;  %v2804_v9 = vadd.f32 %v2724_v52, %v5747_v46 }
 0x1e7   : > { %5047 = vmatmul.msk.bf16.gmra.mxu0 %vm750_vm4, %v3994_v56  ;;  %v2570_v56 = vrot.slane %v5174_v45, 5  ;;  %v5016_v45 = vld [vmem:[%s5282_s6 + $0x84] sm:$0xe] }
 0x1e8   : > { %v1462_v39 = vpop.f32.mrf.mxu2  ;;  %4821 = vmatmul.msk.bf16.gmra.mxu1 %vm750_vm4, %v2656_v11  ;;  %v6297_v5 = vadd.f32 %v2401_v35, %v1782_v53  ;;  %v3900_v11 = vsel %vm5468_vm7, %v5031_v28, %v3899_v59  ;;  %v3407_v59 = vshll.u32 %v6300_v61, 16 }
 0x1e9   : > { %v1496_v0 = vadd.f32 %v1462_v39, %v1110_v50  ;;  %v2571_v53 = vsel %vm5468_vm7, %v2569_v32, %v2570_v56  ;;  %v3404_v50 = vor.u32 %v3403_v62, %v3399_v40  ;;  %v3971_v28 = vunpack.c.l.b16 %v3900_v11 }
 0x1ea   : > { %v2634_v39 = vunpack.c.l.b16 %v2568_v27  ;;  %v2635_v41 = vunpack.c.l.b16 %v2571_v53  ;;  %v3906_v56 = vrot.slane %v6278_v19, 5  ;;  %v3400_v62 = vsel %vm5294_vm3, %v3395_v48, %v3399_v40  ;;  %v5175_v27 = vld [vmem:[%s5282_s6 + $0x88] sm:$0xf]  ;;  %v6331_v19 = vld [vmem:[%s6739_s2] ss:$0 sm:$0xff] }
 0x1eb   : > { %v3405_v24 = vrot.slane %v3404_v50, 4  ;;  %v3995_v32 = vpack.c.b16 %v3972_v55, %v3971_v28  ;;  %v3415_v11 = vshll.u32 %v4972_v16, 16  ;;  %v2574_v53 = vrot.slane %v5175_v27, 5  ;;  %v6358_v27 = vld [vmem:[%s5282_s6 + $0x98] sm:$0x1] }
 0x1ec   : > { %v2403_v10 = vpop.f32.mrf.mxu0  ;;  %v2657_v20 = vpack.c.b16 %v2635_v41, %v2634_v39  ;;  %v3908_v28 = vrot.slane %v3906_v56, 4  ;;  %v3909_v55 = vrot.slane %v6300_v61, 5  ;;  %v6340_v39 = vld [vmem:[%s6740_s3] ss:$0 sm:$0xff] }
 0x1ed   : > { %v1749_v7 = vpop.f32.mrf.mxu3  ;;  %4934 = vmatmul.msk.bf16.gmra.mxu2 %vm750_vm4, %v5099_v22  ;;  %v2726_v35 = vpop.f32.mrf.mxu1  ;;  %v6316_v22 = vld [vmem:[%s5282_s6 + $0x94] sm:$0xf] }
 0x1ee   : > { %v1783_v6 = vadd.f32 %v1749_v7, %v1496_v0  ;;  %v3409_v0 = vrot.slane %v3407_v59, 5  ;;  %v4790_v7 = vld [vmem:[%s5282_s6 + $0x84] sm:$0xe]  ;;  %v3425_v50 = vshrl.u32 %v6316_v22, 16  ;;  %v2805_v41 = vadd.f32 %v2726_v35, %v5760_v42 }
 0x1ef   : > { %v4806_v16 = vrot.slane %v4790_v7, 9  ;;  %v3910_v35 = vsel %vm5468_vm7, %v3908_v28, %v3909_v55 }
 0x1f0   : > { %v3011_v4 = vpop.f32.mrf.mxu2  ;;  %v6320_v46 = vadd.f32 %v2403_v10, %v1783_v6  ;;  %v3410_v40 = vsel %vm5294_vm3, %v3405_v24, %v3409_v0  ;;  %v5032_v10 = vrot.slane %v5016_v45, 9  ;;  %v3575_v6 = vunpack.c.l.b16 %v3400_v62  ;;  %v5100_v24 = vld [vmem:[%s5282_s6 + $0x84] sm:$0xff] }
 0x1f1   : > { %v3091_v38 = vadd.f32 %v3011_v4, %v2804_v9  ;;  %v3414_v9 = vrot.slane %v3412_v58, 4  ;;  %v2576_v0 = vrot.slane %v2574_v53, 4  ;;  %v3427_v58 = vrot.slane %v3425_v50, 4 }
 0x1f2   : > { %4999 = vmatmul.msk.bf16.gmra.mxu3 %vm750_vm4, %v3597_v43  ;;  %v3421_v43 = vshll.u32 %v6316_v22, 16  ;;  %v3907_v42 = vsel %vm5468_vm7, %v5032_v10, %v3906_v56  ;;  %v2575_v7 = vsel %vm5468_vm7, %v4806_v16, %v2574_v53 }
 0x1f3   : > { %v3973_v50 = vunpack.c.l.b16 %v3907_v42  ;;  %v2636_v53 = vunpack.c.l.b16 %v2575_v7  ;;  %v6378_v42 = vld [vmem:[%s5282_s6 + $0xa0] sm:$0xf] }
 0x1f4   : > { %v4063_v52 = vpop.f32.mrf.mxu0  ;;  %v6346_v45 = vrot.slane %v3421_v43, 5 }
 0x1f5   : > { %v3665_v63 = vpop.f32.mrf.mxu3  ;;  %v2729_v12 = vpop.f32.mrf.mxu1 }
 0x1f6   : > { %v3745_v59 = vadd.f32 %v3665_v63, %v3091_v38  ;;  %v3417_v38 = vrot.slane %v3415_v11, 5  ;;  %v3576_v63 = vunpack.c.l.b16 %v3410_v40  ;;  %v3428_v10 = vor.u32 %v3427_v58, %v6346_v45 }
 0x1f7   : > { %5048 = vmatmul.msk.bf16.gmra.mxu0 %vm750_vm4, %v3995_v32  ;;  %v5176_v32 = vld [vmem:[%s5282_s6 + $0x8c] sm:$0x1] }
 0x1f8   : > { %v4143_v4 = vadd.f32 %v4063_v52, %v3745_v59  ;;  %v3013_v48 = vpop.f32.mrf.mxu2  ;;  %4822 = vmatmul.msk.bf16.gmra.mxu1 %vm750_vm4, %v2657_v20  ;;  %v2577_v61 = vrot.slane %v5176_v32, 5  ;;  %v3418_v40 = vor.u32 %v3417_v38, %v3414_v9  ;;  %v2806_v38 = vadd.f32 %v2729_v12, %v5773_v15 }
 0x1f9   : > { %v3092_v62 = vadd.f32 %v3013_v48, %v2805_v41  ;;  %v3974_v41 = vunpack.c.l.b16 %v3910_v35  ;;  %v3431_v48 = vshll.u32 %v6358_v27, 16  ;;  %v3913_v15 = vrot.slane %v6316_v22, 5 }
 0x1fa   : > { %v4179_v52 = vmul.f32 %v6331_v19, %v4143_v4  ;;  %v2578_v56 = vsel %vm5468_vm7, %v2576_v0, %v2577_v61  ;;  %v3598_v4 = vpack.c.b16 %v3576_v63, %v3575_v6  ;;  %v4975_v6 = vld [vmem:[%s5282_s6 + $0x9c] sm:$0xf]  ;;  %v3419_v32 = vrot.slane %v3418_v40, 4  ;;  %v5017_v63 = vld [vmem:[%s5282_s6 + $0x90] sm:$0xe] }
 0x1fb   : > { %v2637_v0 = vunpack.c.l.b16 %v2578_v56  ;;  %v3429_v61 = vrot.slane %v3428_v10, 4  ;;  %v3433_v35 = vrot.slane %v3431_v48, 5  ;;  %v3436_v12 = vshrl.u32 %v4975_v6, 16 }
 0x1fc   : > { %v4215_v20 = vadd.f32 %v6340_v39, %v4179_v52  ;;  %v4065_v11 = vpop.f32.mrf.mxu0  ;;  %v3996_v52 = vpack.c.b16 %v3974_v41, %v3973_v50  ;;  %v5033_v10 = vrot.slane %v5017_v63, 9  ;;  %v3445_v50 = vshll.u32 %v6378_v42, 16 }
 0x1fd   : > { %v3667_v43 = vpop.f32.mrf.mxu3  ;;  %4935 = vmatmul.msk.bf16.gmra.mxu2 %vm750_vm4, %v5100_v24  ;;  %v2731_v59 = vpop.f32.mrf.mxu1  ;;  %v3449_v41 = vshrl.u32 %v6378_v42, 16  ;;  %v3424_v22 = vsel %vm5294_vm3, %v3419_v32, %v6346_v45  ;;  %v5101_v32 = vld [vmem:[%s5282_s6 + $0x90] sm:$0xff] }
 0x1fe   : > { %v4247_v28 = vmax.f32 %v4215_v20, 0.0  ;;  %v3746_v55 = vadd.f32 %v3667_v43, %v3092_v62  ;;  %v3439_v20 = vshll.u32 %v4975_v6, 16  ;;  %v2658_v43 = vpack.c.b16 %v2637_v0, %v2636_v53 }
 0x1ff   : > { %v3916_v53 = vrot.slane %v6358_v27, 5 }
 0x200   : > { %v4279_v16 = vpack.c.bf16 %v4247_v28, %v4247_v28  ;;  %v4144_v9 = vadd.f32 %v4065_v11, %v3746_v55  ;;  %v3016_v24 = vpop.f32.mrf.mxu2  ;;  %v4791_v28 = vld [vmem:[%s5282_s6 + $0x90] sm:$0xe]  ;;  %v5177_v55 = vld [vmem:[%s5282_s6 + $0x94] sm:$0xf]  ;;  %v3441_v0 = vrot.slane %v3439_v20, 5  ;;  %v3577_v20 = vunpack.c.l.b16 %v3424_v22 }
 0x201   : > { %v3093_v62 = vadd.f32 %v3016_v24, %v2806_v38  ;;  %v3915_v38 = vrot.slane %v3913_v15, 4  ;;  %v3438_v24 = vrot.slane %v3436_v12, 4  ;;  %v4807_v45 = vrot.slane %v4791_v28, 9 }
 0x202   : > { %4312 = vst.msk [vmem:[%s6367_s25] sm:$0xf] %vm4311_vm8, %v4279_v16  ;;  %v4180_v58 = vmul.f32 %v6331_v19, %v4144_v9  ;;  %5000 = vmatmul.msk.bf16.gmra.mxu3 %vm750_vm4, %v3598_v4  ;;  %v2581_v4 = vrot.slane %v5177_v55, 5  ;;  %v3434_v9 = vsel %vm5294_vm3, %v3429_v61, %v3433_v35  ;;  %v3451_v61 = vrot.slane %v3449_v41, 4  ;;  %v6403_v55 = vld [vmem:[%s5282_s6 + $0xa4] sm:$0x1] }
 0x203   : > { %v3917_v28 = vsel %vm5468_vm7, %v3915_v38, %v3916_v53  ;;  %v3442_v22 = vor.u32 %v3441_v0, %v3438_v24  ;;  %v6420_v24 = vld [vmem:[%s5282_s6 + $0xac] sm:$0xf] }
 0x204   : > { %v4216_v11 = vadd.f32 %v6340_v39, %v4180_v58  ;;  %v4068_v7 = vpop.f32.mrf.mxu0  ;;  %v2583_v27 = vrot.slane %v2581_v4, 4 }
 0x205   : > { %v3670_v56 = vpop.f32.mrf.mxu3  ;;  %v2734_v40 = vpop.f32.mrf.mxu1  ;;  %v3443_v0 = vrot.slane %v3442_v22, 4 }
 0x206   : > { %v4248_v48 = vmax.f32 %v4216_v11, 0.0  ;;  %v3747_v16 = vadd.f32 %v3670_v56, %v3093_v62  ;;  %v2807_v62 = vadd.f32 %v2731_v59, %v5786_v13  ;;  %v5178_v11 = vld [vmem:[%s5282_s6 + $0x98] sm:$0x1]  ;;  %v6397_v56 = vrot.slane %v3445_v50, 5 }
 0x207   : > { %5049 = vmatmul.msk.bf16.gmra.mxu0 %vm750_vm4, %v3996_v52  ;;  %v2584_v52 = vrot.slane %v5178_v11, 5  ;;  %v2582_v50 = vsel %vm5468_vm7, %v4807_v45, %v2581_v4 }
 0x208   : > { %v4280_v6 = vpack.c.bf16 %v4248_v48, %v4248_v48  ;;  %v4145_v58 = vadd.f32 %v4068_v7, %v3747_v16  ;;  %v3018_v63 = vpop.f32.mrf.mxu2  ;;  %4823 = vmatmul.msk.bf16.gmra.mxu1 %vm750_vm4, %v2658_v43  ;;  %v3578_v7 = vunpack.c.l.b16 %v3434_v9  ;;  %v3914_v43 = vsel %vm5468_vm7, %v5033_v10, %v3913_v15 }
 0x209   : > { %v3094_v12 = vadd.f32 %v3018_v63, %v2807_v62  ;;  %v2585_v16 = vsel %vm5468_vm7, %v2583_v27, %v2584_v52  ;;  %v3452_v9 = vor.u32 %v3451_v61, %v6397_v56  ;;  %v3455_v15 = vshll.u32 %v6403_v55, 16  ;;  %v4978_v62 = vld [vmem:[%s5282_s6 + $0xa8] sm:$0xf] }
 0x20a   : > { %4313 = vst.msk [vmem:[%s6367_s25 + $0x4] sm:$0xf] %vm4311_vm8, %v4280_v6  ;;  %v4181_v35 = vmul.f32 %v6331_v19, %v4145_v58  ;;  %v3599_v53 = vpack.c.b16 %v3578_v7, %v3577_v20  ;;  %v3975_v38 = vunpack.c.l.b16 %v3914_v43  ;;  %v3976_v58 = vunpack.c.l.b16 %v3917_v28  ;;  %v5018_v20 = vld [vmem:[%s5282_s6 + $0x9c] sm:$0xe] }
 0x20b   : > { %v2638_v4 = vunpack.c.l.b16 %v2582_v50  ;;  %v2639_v11 = vunpack.c.l.b16 %v2585_v16  ;;  %v3453_v52 = vrot.slane %v3452_v9, 4  ;;  %v3457_v61 = vrot.slane %v3455_v15, 5 }
 0x20c   : > { %v4217_v13 = vadd.f32 %v6340_v39, %v4181_v35  ;;  %v4070_v59 = vpop.f32.mrf.mxu0  ;;  %v3460_v7 = vshrl.u32 %v4978_v62, 16  ;;  %v3473_v43 = vshrl.u32 %v6420_v24, 16  ;;  %v3448_v9 = vsel %vm5294_vm3, %v3443_v0, %v6397_v56 }
 0x20d   : > { %v3672_v41 = vpop.f32.mrf.mxu3  ;;  %4936 = vmatmul.msk.bf16.gmra.mxu2 %vm750_vm4, %v5101_v32  ;;  %v2736_v48 = vpop.f32.mrf.mxu1  ;;  %v2808_v32 = vadd.f32 %v2734_v40, %v5799_v57  ;;  %v3997_v57 = vpack.c.b16 %v3976_v58, %v3975_v38  ;;  %v3920_v40 = vrot.slane %v6378_v42, 5  ;;  %v3458_v15 = vsel %vm5294_vm3, %v3453_v52, %v3457_v61  ;;  %v5179_v42 = vld [vmem:[%s5282_s6 + $0xa0] sm:$0xf] }
 0x20e   : > { %v4249_v10 = vmax.f32 %v4217_v13, 0.0  ;;  %v3748_v6 = vadd.f32 %v3672_v41, %v3094_v12  ;;  %v3463_v13 = vshll.u32 %v4978_v62, 16  ;;  %v2659_v41 = vpack.c.b16 %v2639_v11, %v2638_v4 }
 0x20f   : > { %v3462_v62 = vrot.slane %v3460_v7, 4  ;;  %v3922_v4 = vrot.slane %v3920_v40, 4  ;;  %v2809_v0 = vadd.f32 %v2736_v48, %v5812_v54  ;;  %v3580_v7 = vunpack.c.l.b16 %v3458_v15 }
 0x210   : > { %v4281_v63 = vpack.c.bf16 %v4249_v10, %v4249_v10  ;;  %v4146_v45 = vadd.f32 %v4070_v59, %v3748_v6  ;;  %v3021_v27 = vpop.f32.mrf.mxu2  ;;  %v3469_v59 = vshll.u32 %v6420_v24, 16  ;;  %v5034_v10 = vrot.slane %v5018_v20, 9  ;;  %v4792_v6 = vld [vmem:[%s5282_s6 + $0x9c] sm:$0xe] }
 0x211   : > { %v3095_v12 = vadd.f32 %v3021_v27, %v2808_v32  ;;  %v3475_v32 = vrot.slane %v3473_v43, 4  ;;  %v4808_v61 = vrot.slane %v4792_v6, 9  ;;  %v3579_v20 = vunpack.c.l.b16 %v3448_v9 }
 0x212   : > { %4314 = vst.msk [vmem:[%s6367_s25 + $0x8] sm:$0xf] %vm4311_vm8, %v4281_v63  ;;  %v4182_v35 = vmul.f32 %v6331_v19, %v4146_v45  ;;  %5001 = vmatmul.msk.bf16.gmra.mxu3 %vm750_vm4, %v3599_v53  ;;  %v2588_v53 = vrot.slane %v5179_v42, 5  ;;  %v3465_v63 = vrot.slane %v3463_v13, 5  ;;  %v3923_v45 = vrot.slane %v6403_v55, 5 }
 0x213   : > { %v3471_v56 = vrot.slane %v3469_v59, 5  ;;  %v3921_v54 = vsel %vm5468_vm7, %v5034_v10, %v3920_v40  ;;  %v3600_v42 = vpack.c.b16 %v3580_v7, %v3579_v20 }
 0x214   : > { %v4218_v28 = vadd.f32 %v6340_v39, %v4182_v35  ;;  %v4073_v50 = vpop.f32.mrf.mxu0  ;;  %v6443_v35 = vld [vmem:[%s5282_s6 + $0xb0] sm:$0x1]  ;;  %v2590_v13 = vrot.slane %v2588_v53, 4  ;;  %v3466_v43 = vor.u32 %v3465_v63, %v3462_v62  ;;  %v3924_v9 = vsel %vm5468_vm7, %v3922_v4, %v3923_v45 }
 0x215   : > { %v3675_v16 = vpop.f32.mrf.mxu3  ;;  %v2739_v22 = vpop.f32.mrf.mxu1  ;;  %v3476_v48 = vor.u32 %v3475_v32, %v3471_v56  ;;  %v2589_v15 = vsel %vm5468_vm7, %v4808_v61, %v2588_v53  ;;  %v3977_v62 = vunpack.c.l.b16 %v3921_v54  ;;  %v3978_v32 = vunpack.c.l.b16 %v3924_v9  ;;  %v5019_v54 = vld [vmem:[%s5282_s6 + $0xa8] sm:$0xe]  ;;  %v5181_v9 = vld [vmem:[%s5282_s6 + $0xac] sm:$0xf] }
 0x216   : > { %v4250_v38 = vmax.f32 %v4218_v28, 0.0  ;;  %v3749_v58 = vadd.f32 %v3675_v16, %v3095_v12  ;;  %v5102_v12 = vld [vmem:[%s5282_s6 + $0x9c] sm:$0xff]  ;;  %v3467_v63 = vrot.slane %v3466_v43, 4 }
 0x217   : > { %5050 = vmatmul.msk.bf16.gmra.mxu0 %vm750_vm4, %v3997_v57  ;;  %v5180_v57 = vld [vmem:[%s5282_s6 + $0xa4] sm:$0x1]  ;;  %v3477_v4 = vrot.slane %v3476_v48, 4 }
 0x218   : > { %v4282_v27 = vpack.c.bf16 %v4250_v38, %v4250_v38  ;;  %v4147_v11 = vadd.f32 %v4073_v50, %v3749_v58  ;;  %v3023_v52 = vpop.f32.mrf.mxu2  ;;  %4824 = vmatmul.msk.bf16.gmra.mxu1 %vm750_vm4, %v2659_v41  ;;  %v2591_v28 = vrot.slane %v5180_v57, 5  ;;  %v3479_v50 = vshll.u32 %v6443_v35, 16 }
 0x219   : > { %v3096_v59 = vadd.f32 %v3023_v52, %v2809_v0  ;;  %v2810_v0 = vadd.f32 %v2739_v22, %v5825_v33  ;;  %v3472_v7 = vsel %vm5294_vm3, %v3467_v63, %v3471_v56  ;;  %v3998_v57 = vpack.c.b16 %v3978_v32, %v3977_v62  ;;  %v6471_v33 = vld [vmem:[%s5282_s6 + $0xb8] sm:$0xf] }
 0x21a   : > { %4315 = vst.msk [vmem:[%s6367_s25 + $0xc] sm:$0xf] %vm4311_vm8, %v4282_v27  ;;  %v4183_v55 = vmul.f32 %v6331_v19, %v4147_v11  ;;  %v2592_v40 = vsel %vm5468_vm7, %v2590_v13, %v2591_v28  ;;  %v2640_v27 = vunpack.c.l.b16 %v2589_v15  ;;  %v3481_v45 = vrot.slane %v3479_v50, 5  ;;  %v4981_v13 = vld [vmem:[%s5282_s6 + $0xb4] sm:$0xf] }
 0x21b   : > { %v2641_v61 = vunpack.c.l.b16 %v2592_v40  ;;  %v3927_v28 = vrot.slane %v6420_v24, 5  ;;  %v2595_v56 = vrot.slane %v5181_v9, 5  ;;  %v3484_v15 = vshrl.u32 %v4981_v13, 16 }
 0x21c   : > { %v4219_v41 = vadd.f32 %v6340_v39, %v4183_v55  ;;  %v4075_v16 = vpop.f32.mrf.mxu0  ;;  %v3482_v43 = vsel %vm5294_vm3, %v3477_v4, %v3481_v45  ;;  %v3493_v40 = vshll.u32 %v6471_v33, 16  ;;  %v5035_v62 = vrot.slane %v5019_v54, 9 }
 0x21d   : > { %v3677_v6 = vpop.f32.mrf.mxu3  ;;  %4937 = vmatmul.msk.bf16.gmra.mxu2 %vm750_vm4, %v5102_v12  ;;  %v2741_v38 = vpop.f32.mrf.mxu1  ;;  %v3929_v63 = vrot.slane %v3927_v28, 4  ;;  %v3930_v32 = vrot.slane %v6443_v35, 5 }
 0x21e   : > { %v4251_v10 = vmax.f32 %v4219_v41, 0.0  ;;  %v3750_v58 = vadd.f32 %v3677_v6, %v3096_v59  ;;  %v2660_v59 = vpack.c.b16 %v2641_v61, %v2640_v27  ;;  %v3581_v41 = vunpack.c.l.b16 %v3472_v7  ;;  %v5182_v61 = vld [vmem:[%s5282_s6 + $0xb0] sm:$0x1] }
 0x21f   : > { %v3487_v6 = vshll.u32 %v4981_v13, 16  ;;  %v2811_v45 = vadd.f32 %v2741_v38, %v5838_v31 }
 0x220   : > { %v4283_v53 = vpack.c.bf16 %v4251_v10, %v4251_v10  ;;  %v4148_v11 = vadd.f32 %v4075_v16, %v3750_v58  ;;  %v3026_v52 = vpop.f32.mrf.mxu2  ;;  %v4793_v16 = vld [vmem:[%s5282_s6 + $0xa8] sm:$0xe]  ;;  %v3497_v10 = vshrl.u32 %v6471_v33, 16  ;;  %v3582_v58 = vunpack.c.l.b16 %v3482_v43 }
 0x221   : > { %v3097_v20 = vadd.f32 %v3026_v52, %v2810_v0  ;;  %v5103_v0 = vld [vmem:[%s5282_s6 + $0xa8] sm:$0xff]  ;;  %v2597_v52 = vrot.slane %v2595_v56, 4  ;;  %v3489_v7 = vrot.slane %v3487_v6, 5  ;;  %v3931_v43 = vsel %vm5468_vm7, %v3929_v63, %v3930_v32 }
 0x222   : > { %4316 = vst.msk [vmem:[%s6367_s25 + $0x10] sm:$0xf] %vm4311_vm8, %v4283_v53  ;;  %v4184_v12 = vmul.f32 %v6331_v19, %v4148_v11  ;;  %5002 = vmatmul.msk.bf16.gmra.mxu3 %vm750_vm4, %v3600_v42  ;;  %v4809_v11 = vrot.slane %v4793_v16, 9  ;;  %v3601_v16 = vpack.c.b16 %v3582_v58, %v3581_v41 }
 0x224   : > { %v4220_v22 = vadd.f32 %v6340_v39, %v4184_v12  ;;  %v4078_v55 = vpop.f32.mrf.mxu0  ;;  %v2598_v12 = vrot.slane %v5182_v61, 5  ;;  %v2596_v54 = vsel %vm5468_vm7, %v4809_v11, %v2595_v56  ;;  %v3980_v56 = vunpack.c.l.b16 %v3931_v43  ;;  %v6514_v61 = vld [vmem:[%s5282_s6 + $0xc4] sm:$0xf]  ;;  %v4794_v43 = vld [vmem:[%s5282_s6 + $0xb4] sm:$0xe] }
 0x225   : > { %v3680_v48 = vpop.f32.mrf.mxu3  ;;  %v2744_v50 = vpop.f32.mrf.mxu1 }
 0x226   : > { %v4252_v24 = vmax.f32 %v4220_v22, 0.0  ;;  %v3751_v42 = vadd.f32 %v3680_v48, %v3097_v20  ;;  %v3486_v20 = vrot.slane %v3484_v15, 4  ;;  %v3499_v22 = vrot.slane %v3497_v10, 4 }
 0x227   : > { %5051 = vmatmul.msk.bf16.gmra.mxu0 %vm750_vm4, %v3998_v57  ;;  %v6490_v57 = vrot.slane %v3493_v40, 5  ;;  %v2599_v15 = vsel %vm5468_vm7, %v2597_v52, %v2598_v12  ;;  %v2812_v58 = vadd.f32 %v2744_v50, %v5851_v1  ;;  %v3934_v1 = vrot.slane %v6471_v33, 5 }
 0x228   : > { %v4284_v27 = vpack.c.bf16 %v4252_v24, %v4252_v24  ;;  %v4149_v4 = vadd.f32 %v4078_v55, %v3751_v42  ;;  %v3028_v53 = vpop.f32.mrf.mxu2  ;;  %4825 = vmatmul.msk.bf16.gmra.mxu1 %vm750_vm4, %v2660_v59  ;;  %v6493_v55 = vld [vmem:[%s5282_s6 + $0xbc] sm:$0x1]  ;;  %v3928_v59 = vsel %vm5468_vm7, %v5035_v62, %v3927_v28  ;;  %v3490_v6 = vor.u32 %v3489_v7, %v3486_v20  ;;  %v5020_v20 = vld [vmem:[%s5282_s6 + $0xb4] sm:$0xe] }
 0x229   : > { %v3098_v35 = vadd.f32 %v3028_v53, %v2811_v45  ;;  %v3500_v28 = vor.u32 %v3499_v22, %v6490_v57  ;;  %v3503_v40 = vshll.u32 %v6493_v55, 16  ;;  %v3979_v10 = vunpack.c.l.b16 %v3928_v59 }
 0x22a   : > { %4317 = vst.msk [vmem:[%s6367_s25 + $0x14] sm:$0xf] %vm4311_vm8, %v4284_v27  ;;  %v4185_v13 = vmul.f32 %v6331_v19, %v4149_v4  ;;  %v2642_v62 = vunpack.c.l.b16 %v2596_v54  ;;  %v2643_v27 = vunpack.c.l.b16 %v2599_v15  ;;  %v4984_v4 = vld [vmem:[%s5282_s6 + $0xc0] sm:$0xf]  ;;  %v3491_v45 = vrot.slane %v3490_v6, 4 }
 0x22b   : > { %v3505_v52 = vrot.slane %v3503_v40, 5  ;;  %v3999_v12 = vpack.c.b16 %v3980_v56, %v3979_v10  ;;  %v3508_v50 = vshrl.u32 %v4984_v4, 16  ;;  %v3511_v7 = vshll.u32 %v4984_v4, 16  ;;  %v5183_v54 = vld [vmem:[%s5282_s6 + $0xb8] sm:$0xf] }
 0x22c   : > { %v4221_v31 = vadd.f32 %v6340_v39, %v4185_v13  ;;  %v4080_v38 = vpop.f32.mrf.mxu0  ;;  %v2661_v22 = vpack.c.b16 %v2643_v27, %v2642_v62  ;;  %v3496_v59 = vsel %vm5294_vm3, %v3491_v45, %v6490_v57  ;;  %v3521_v15 = vshrl.u32 %v6514_v61, 16  ;;  %v5184_v4 = vld [vmem:[%s5282_s6 + $0xbc] sm:$0x1] }
 0x22d   : > { %v3682_v48 = vpop.f32.mrf.mxu3  ;;  %4938 = vmatmul.msk.bf16.gmra.mxu2 %vm750_vm4, %v5103_v0  ;;  %v2746_v9 = vpop.f32.mrf.mxu1  ;;  %v3501_v0 = vrot.slane %v3500_v28, 4  ;;  %v3936_v28 = vrot.slane %v3934_v1, 4  ;;  %v3937_v57 = vrot.slane %v6493_v55, 5  ;;  %v3510_v40 = vrot.slane %v3508_v50, 4 }
 0x22e   : > { %v4253_v24 = vmax.f32 %v4221_v31, 0.0  ;;  %v3752_v42 = vadd.f32 %v3682_v48, %v3098_v35  ;;  %v2602_v48 = vrot.slane %v5183_v54, 5  ;;  %v3513_v10 = vrot.slane %v3511_v7, 5 }
 0x22f   : > { %v2605_v45 = vrot.slane %v5184_v4, 5  ;;  %v3938_v7 = vsel %vm5468_vm7, %v3936_v28, %v3937_v57  ;;  %v6749_v28 = vld [vmem:[#allocation2_spill] sm:$0xff] }
 0x230   : > { %v4285_v63 = vpack.c.bf16 %v4253_v24, %v4253_v24  ;;  %v4150_v41 = vadd.f32 %v4080_v38, %v3752_v42  ;;  %v3031_v32 = vpop.f32.mrf.mxu2  ;;  %v3506_v24 = vsel %vm5294_vm3, %v3501_v0, %v3505_v52  ;;  %v5036_v42 = vrot.slane %v5020_v20, 9  ;;  %v6540_v20 = vld [vmem:[%s5282_s6 + $0xc8] sm:$0x1] }
 0x231   : > { %v3099_v11 = vadd.f32 %v3031_v32, %v2812_v58  ;;  %v4810_v58 = vrot.slane %v4794_v43, 9  ;;  %v5104_v32 = vld [vmem:[%s5282_s6 + $0xb4] sm:$0xff]  ;;  %v2604_v27 = vrot.slane %v2602_v48, 4  ;;  %v3583_v52 = vunpack.c.l.b16 %v3496_v59 }
 0x232   : > { %4318 = vst.msk [vmem:[%s6367_s25 + $0x18] sm:$0xf] %vm4311_vm8, %v4285_v63  ;;  %v4186_v53 = vmul.f32 %v6331_v19, %v4150_v41  ;;  %5003 = vmatmul.msk.bf16.gmra.mxu3 %vm750_vm4, %v3601_v16  ;;  %v3517_v16 = vshll.u32 %v6514_v61, 16  ;;  %v2813_v63 = vadd.f32 %v2746_v9, %v5865_v25  ;;  %v3935_v50 = vsel %vm5468_vm7, %v5036_v42, %v3934_v1 }
 0x233   : > { %v3514_v59 = vor.u32 %v3513_v10, %v3510_v40  ;;  %v3527_v54 = vshll.u32 %v6540_v20, 16 }
 0x234   : > { %v4222_v13 = vadd.f32 %v6340_v39, %v4186_v53  ;;  %v4083_v35 = vpop.f32.mrf.mxu0  ;;  %v6534_v53 = vrot.slane %v3517_v16, 5 }
 0x235   : > { %v3685_v31 = vpop.f32.mrf.mxu3  ;;  %v2749_v38 = vpop.f32.mrf.mxu1  ;;  %v3515_v10 = vrot.slane %v3514_v59, 4 }
 0x236   : > { %v4254_v33 = vmax.f32 %v4222_v13, 0.0  ;;  %v3753_v6 = vadd.f32 %v3685_v31, %v3099_v11  ;;  %v3523_v11 = vrot.slane %v3521_v15, 4  ;;  %v2603_v13 = vsel %vm5468_vm7, %v4810_v58, %v2602_v48 }
 0x237   : > { %5052 = vmatmul.msk.bf16.gmra.mxu0 %vm750_vm4, %v3999_v12  ;;  %v3584_v12 = vunpack.c.l.b16 %v3506_v24  ;;  %v2606_v31 = vsel %vm5468_vm7, %v2604_v27, %v2605_v45  ;;  %v2644_v48 = vunpack.c.l.b16 %v2603_v13  ;;  %v2814_v57 = vadd.f32 %v2749_v38, %v6749_v28 }
 0x238   : > { %v4286_v56 = vpack.c.bf16 %v4254_v33, %v4254_v33  ;;  %v4151_v62 = vadd.f32 %v4083_v35, %v3753_v6  ;;  %v3033_v41 = vpop.f32.mrf.mxu2  ;;  %4826 = vmatmul.msk.bf16.gmra.mxu1 %vm750_vm4, %v2661_v22  ;;  %v3524_v43 = vor.u32 %v3523_v11, %v6534_v53  ;;  %v3981_v33 = vunpack.c.l.b16 %v3935_v50 }
 0x239   : > { %v3100_v0 = vadd.f32 %v3033_v41, %v2813_v63  ;;  %v3602_v15 = vpack.c.b16 %v3584_v12, %v3583_v52  ;;  %v3982_v6 = vunpack.c.l.b16 %v3938_v7  ;;  %v2645_v40 = vunpack.c.l.b16 %v2606_v31  ;;  %v4795_v7 = vld [vmem:[%s5282_s6 + $0xc0] sm:$0xe] }
 0x23a   : > { %4319 = vst.msk [vmem:[%s6367_s25 + $0x1c] sm:$0xf] %vm4311_vm8, %v4286_v56  ;;  %v4187_v55 = vmul.f32 %v6331_v19, %v4151_v62  ;;  %v3525_v62 = vrot.slane %v3524_v43, 4  ;;  %v3529_v63 = vrot.slane %v3527_v54, 5  ;;  %v3941_v27 = vrot.slane %v6514_v61, 5 }
 0x23b   : > { %v4000_v38 = vpack.c.b16 %v3982_v6, %v3981_v33  ;;  %v2662_v11 = vpack.c.b16 %v2645_v40, %v2644_v48  ;;  %v5185_v61 = vld [vmem:[%s5282_s6 + $0xc4] sm:$0xf]  ;;  %v3944_v43 = vrot.slane %v6540_v20, 5 }
 0x23c   : > { %v4223_v25 = vadd.f32 %v6340_v39, %v4187_v55  ;;  %v4085_v9 = vpop.f32.mrf.mxu0  ;;  %v4987_v55 = vld [vmem:[%s5282_s6 + $0xcc] sm:$0xf]  ;;  %v2609_v13 = vrot.slane %v5185_v61, 5  ;;  %v3943_v59 = vrot.slane %v3941_v27, 4 }
 0x23d   : > { %v3687_v35 = vpop.f32.mrf.mxu3  ;;  %4939 = vmatmul.msk.bf16.gmra.mxu2 %vm750_vm4, %v5104_v32  ;;  %v2751_v22 = vpop.f32.mrf.mxu1  ;;  %v5021_v32 = vld [vmem:[%s5282_s6 + $0xc0] sm:$0xe]  ;;  %v3532_v54 = vshrl.u32 %v4987_v55, 16 }
 0x23e   : > { %v4255_v1 = vmax.f32 %v4223_v25, 0.0  ;;  %v3754_v16 = vadd.f32 %v3687_v35, %v3100_v0  ;;  %v6564_v0 = vld [vmem:[%s5282_s6 + $0xd0] sm:$0xf]  ;;  %v3520_v25 = vsel %vm5294_vm3, %v3515_v10, %v6534_v53  ;;  %v5037_v50 = vrot.slane %v5021_v32, 9 }
 0x23f   : > { %v3541_v53 = vshll.u32 %v6564_v0, 16  ;;  %v2815_v6 = vadd.f32 %v2751_v22, %v5912_v47  ;;  %v3585_v20 = vunpack.c.l.b16 %v3520_v25  ;;  %v3945_v47 = vsel %vm5468_vm7, %v3943_v59, %v3944_v43 }
 0x240   : > { %v4287_v24 = vpack.c.bf16 %v4255_v1, %v4255_v1  ;;  %v4152_v42 = vadd.f32 %v4085_v9, %v3754_v16  ;;  %v3036_v56 = vpop.f32.mrf.mxu2  ;;  %v3530_v9 = vsel %vm5294_vm3, %v3525_v62, %v3529_v63  ;;  %v3535_v1 = vshll.u32 %v4987_v55, 16 }
 0x241   : > { %v3101_v58 = vadd.f32 %v3036_v56, %v2814_v57  ;;  %v3545_v16 = vshrl.u32 %v6564_v0, 16  ;;  %v3586_v28 = vunpack.c.l.b16 %v3530_v9  ;;  %v2611_v57 = vrot.slane %v2609_v13, 4  ;;  %v5186_v56 = vld [vmem:[%s5282_s6 + $0xc8] sm:$0x1] }
 0x242   : > { %4320 = vst.msk [vmem:[%s6367_s25 + $0x20] sm:$0xf] %vm4311_vm8, %v4287_v24  ;;  %v4188_v41 = vmul.f32 %v6331_v19, %v4152_v42  ;;  %5004 = vmatmul.msk.bf16.gmra.mxu3 %vm750_vm4, %v3602_v15  ;;  %v4811_v24 = vrot.slane %v4795_v7, 9  ;;  %v5105_v42 = vld [vmem:[%s5282_s6 + $0xc0] sm:$0xff]  ;;  %v2612_v40 = vrot.slane %v5186_v56, 5  ;;  %v3942_v63 = vsel %vm5468_vm7, %v5037_v50, %v3941_v27 }
 0x243   : > { %v3534_v22 = vrot.slane %v3532_v54, 4  ;;  %v3547_v32 = vrot.slane %v3545_v16, 4  ;;  %v3983_v7 = vunpack.c.l.b16 %v3942_v63  ;;  %v3984_v61 = vunpack.c.l.b16 %v3945_v47  ;;  %v5022_v56 = vld [vmem:[%s5282_s6 + $0xcc] sm:$0xe] }
 0x244   : > { %v4224_v4 = vadd.f32 %v6340_v39, %v4188_v41  ;;  %v4088_v45 = vpop.f32.mrf.mxu0  ;;  %v3537_v41 = vrot.slane %v3535_v1, 5  ;;  %v2613_v25 = vsel %vm5468_vm7, %v2611_v57, %v2612_v40 }
 0x245   : > { %v3690_v52 = vpop.f32.mrf.mxu3  ;;  %v2754_v12 = vpop.f32.mrf.mxu1  ;;  %v2647_v16 = vunpack.c.l.b16 %v2613_v25 }
 0x246   : > { %v4256_v35 = vmax.f32 %v4224_v4, 0.0  ;;  %v3755_v31 = vadd.f32 %v3690_v52, %v3101_v58  ;;  %v3543_v58 = vrot.slane %v3541_v53, 5  ;;  %v3603_v52 = vpack.c.b16 %v3586_v28, %v3585_v20 }
 0x247   : > { %5053 = vmatmul.msk.bf16.gmra.mxu0 %vm750_vm4, %v4000_v38  ;;  %v2816_v1 = vadd.f32 %v2754_v12, %v5923_v51  ;;  %v3948_v51 = vrot.slane %v6564_v0, 5 }
 0x248   : > { %v4288_v15 = vpack.c.bf16 %v4256_v35, %v4256_v35  ;;  %v4153_v33 = vadd.f32 %v4088_v45, %v3755_v31  ;;  %v3038_v48 = vpop.f32.mrf.mxu2  ;;  %4827 = vmatmul.msk.bf16.gmra.mxu1 %vm750_vm4, %v2662_v11  ;;  %v2610_v45 = vsel %vm5468_vm7, %v4811_v24, %v2609_v13  ;;  %v4989_v11 = vld [vmem:[%s5282_s6 + $0xd4] sm:$0x1]  ;;  %v3538_v31 = vor.u32 %v3537_v41, %v3534_v22 }
 0x249   : > { %v3102_v62 = vadd.f32 %v3038_v48, %v2815_v6  ;;  %v2646_v35 = vunpack.c.l.b16 %v2610_v45  ;;  %v3548_v59 = vor.u32 %v3547_v32, %v3543_v58  ;;  %v3551_v43 = vshll.u32 %v4989_v11, 16 }
 0x24a   : > { %4321 = vst.msk [vmem:[%s6367_s25 + $0x24] sm:$0xf] %vm4311_vm8, %v4288_v15  ;;  %v4189_v10 = vmul.f32 %v6331_v19, %v4153_v33  ;;  %v4001_v6 = vpack.c.b16 %v3984_v61, %v3983_v7  ;;  %v3539_v48 = vrot.slane %v3538_v31, 4  ;;  %v5038_v22 = vrot.slane %v5022_v56, 9 }
 0x24b   : > { %v3549_v24 = vrot.slane %v3548_v59, 4  ;;  %v2663_v57 = vpack.c.b16 %v2647_v16, %v2646_v35  ;;  %v3951_v41 = vrot.slane %v4989_v11, 5 }
 0x24c   : > { %v4225_v38 = vadd.f32 %v6340_v39, %v4189_v10  ;;  %v4090_v4 = vpop.f32.mrf.mxu0  ;;  %v3544_v63 = vsel %vm5294_vm3, %v3539_v48, %v3543_v58  ;;  %v3949_v7 = vsel %vm5468_vm7, %v5038_v22, %v3948_v51 }
 0x24d   : > { %v3692_v55 = vpop.f32.mrf.mxu3  ;;  %4940 = vmatmul.msk.bf16.gmra.mxu2 %vm750_vm4, %v5105_v42  ;;  %v2756_v27 = vpop.f32.mrf.mxu1  ;;  %v3553_v42 = vrot.slane %v3551_v43, 5  ;;  %v3587_v58 = vunpack.c.l.b16 %v3544_v63 }
 0x24e   : > { %v4257_v9 = vmax.f32 %v4225_v38, 0.0  ;;  %v3756_v50 = vadd.f32 %v3692_v55, %v3102_v62  ;;  %v3950_v55 = vrot.slane %v3948_v51, 4 }
 0x24f   : > { %v3554_v47 = vsel %vm5294_vm3, %v3549_v24, %v3553_v42 }
 0x250   : > { %v4289_v54 = vpack.c.bf16 %v4257_v9, %v4257_v9  ;;  %v4154_v13 = vadd.f32 %v4090_v4, %v3756_v50  ;;  %v3041_v53 = vpop.f32.mrf.mxu2  ;;  %v6750_v4 = vld [vmem:[#allocation3_spill] sm:$0xff]  ;;  %v3588_v50 = vunpack.c.l.b16 %v3554_v47 }
 0x251   : > { %v3103_v33 = vadd.f32 %v3041_v53, %v2816_v1  ;;  %v2817_v0 = vadd.f32 %v2756_v27, %v6750_v4  ;;  %v3952_v27 = vsel %vm5468_vm7, %v3950_v55, %v3951_v41 }
 0x252   : > { %4322 = vst.msk [vmem:[%s6367_s25 + $0x28] sm:$0xf] %vm4311_vm8, %v4289_v54  ;;  %v4190_v15 = vmul.f32 %v6331_v19, %v4154_v13  ;;  %5005 = vmatmul.msk.bf16.gmra.mxu3 %vm750_vm4, %v3603_v52  ;;  %v5106_v52 = vld [vmem:[%s5282_s6 + $0xcc] sm:$0xff]  ;;  %v3604_v43 = vpack.c.b16 %v3588_v50, %v3587_v58  ;;  %v3985_v54 = vunpack.c.l.b16 %v3949_v7  ;;  %v3986_v13 = vunpack.c.l.b16 %v3952_v27 }
 0x254   : > { %v4226_v20 = vadd.f32 %v6340_v39, %v4190_v15  ;;  %v4093_v28 = vpop.f32.mrf.mxu0 }
 0x255   : > { %v3695_v12 = vpop.f32.mrf.mxu3  ;;  %v2759_v40 = vpop.f32.mrf.mxu1 }
 0x256   : > { %v4258_v10 = vmax.f32 %v4226_v20, 0.0  ;;  %v3757_v62 = vadd.f32 %v3695_v12, %v3103_v33  ;;  %v2818_v16 = vadd.f32 %v2759_v40, %v5959_v29 }
 0x257   : > { %5054 = vmatmul.msk.bf16.gmra.mxu0 %vm750_vm4, %v4001_v6  ;;  %v4002_v6 = vpack.c.b16 %v3986_v13, %v3985_v54 }
 0x258   : > { %v4290_v32 = vpack.c.bf16 %v4258_v10, %v4258_v10  ;;  %v4155_v38 = vadd.f32 %v4093_v28, %v3757_v62  ;;  %v3043_v45 = vpop.f32.mrf.mxu2  ;;  %4828 = vmatmul.msk.bf16.gmra.mxu1 %vm750_vm4, %v2663_v57 }
 0x259   : > { %v3104_v9 = vadd.f32 %v3043_v45, %v2817_v0 }
 0x25a   : > { %4323 = vst.msk [vmem:[%s6367_s25 + $0x2c] sm:$0xf] %vm4311_vm8, %v4290_v32  ;;  %v4191_v25 = vmul.f32 %v6331_v19, %v4155_v38 }
 0x25c   : > { %v4227_v36 = vadd.f32 %v6340_v39, %v4191_v25  ;;  %v4095_v11 = vpop.f32.mrf.mxu0 }
 0x25d   : > { %v3697_v61 = vpop.f32.mrf.mxu3  ;;  %4941 = vmatmul.msk.bf16.gmra.mxu2 %vm750_vm4, %v5106_v52  ;;  %v2761_v35 = vpop.f32.mrf.mxu1 }
 0x25e   : > { %v4259_v31 = vmax.f32 %v4227_v36, 0.0  ;;  %v3758_v59 = vadd.f32 %v3697_v61, %v3104_v9  ;;  %v2819_v51 = vadd.f32 %v2761_v35, %v5983_v37 }
 0x260   : > { %v4291_v1 = vpack.c.bf16 %v4259_v31, %v4259_v31  ;;  %v4156_v53 = vadd.f32 %v4095_v11, %v3758_v59  ;;  %v3046_v15 = vpop.f32.mrf.mxu2 }
 0x261   : > { %v3105_v33 = vadd.f32 %v3046_v15, %v2818_v16 }
 0x262   : > { %4324 = vst.msk [vmem:[%s6367_s25 + $0x30] sm:$0xf] %vm4311_vm8, %v4291_v1  ;;  %v4192_v18 = vmul.f32 %v6331_v19, %v4156_v53  ;;  %5006 = vmatmul.msk.bf16.gmra.mxu3 %vm750_vm4, %v3604_v43 }
 0x264   : > { %v4228_v48 = vadd.f32 %v6340_v39, %v4192_v18  ;;  %v4098_v24 = vpop.f32.mrf.mxu0 }
 0x265   : > { %v3700_v42 = vpop.f32.mrf.mxu3  ;;  %v2764_v20 = vpop.f32.mrf.mxu1 }
 0x266   : > { %v4260_v28 = vmax.f32 %v4228_v48, 0.0  ;;  %v3759_v57 = vadd.f32 %v3700_v42, %v3105_v33  ;;  %v2820_v0 = vadd.f32 %v2764_v20, %v6002_v34  ;;  %v6654_v33 = vld [vmem:[%s6740_s3] ss:$0 sm:$0xff] }
 0x267   : > { %5055 = vmatmul.msk.bf16.gmra.mxu0 %vm750_vm4, %v4002_v6 }
 0x268   : > { %v4292_v29 = vpack.c.bf16 %v4260_v28, %v4260_v28  ;;  %v4157_v56 = vadd.f32 %v4098_v24, %v3759_v57  ;;  %v3048_v12 = vpop.f32.mrf.mxu2 }
 0x269   : > { %v3106_v10 = vadd.f32 %v3048_v12, %v2819_v51 }
 0x26a   : > { %4325 = vst.msk [vmem:[%s6367_s25 + $0x34] sm:$0xf] %vm4311_vm8, %v4292_v29  ;;  %v4193_v40 = vmul.f32 %v6331_v19, %v4157_v56 }
 0x26c   : > { %v4229_v62 = vadd.f32 %v6340_v39, %v4193_v40  ;;  %v4100_v63 = vpop.f32.mrf.mxu0 }
 0x26d   : > { %v3702_v47 = vpop.f32.mrf.mxu3  ;;  %v2766_v22 = vpop.f32.mrf.mxu1 }
 0x26e   : > { %v4261_v41 = vmax.f32 %v4229_v62, 0.0  ;;  %v3760_v32 = vadd.f32 %v3702_v47, %v3106_v10  ;;  %v2821_v27 = vadd.f32 %v2766_v22, %v6026_v3  ;;  %v6648_v3 = vld [vmem:[%s6739_s2] ss:$0 sm:$0xff] }
 0x270   : > { %v4293_v38 = vpack.c.bf16 %v4261_v41, %v4261_v41  ;;  %v4158_v4 = vadd.f32 %v4100_v63, %v3760_v32  ;;  %v3051_v45 = vpop.f32.mrf.mxu2 }
 0x271   : > { %v3107_v55 = vadd.f32 %v3051_v45, %v2820_v0 }
 0x272   : > { %4326 = vst.msk [vmem:[%s6367_s25 + $0x38] sm:$0xf] %vm4311_vm8, %v4293_v38  ;;  %v4194_v37 = vmul.f32 %v6331_v19, %v4158_v4 }
 0x274   : > { %v4230_v52 = vadd.f32 %v6340_v39, %v4194_v37  ;;  %v4103_v25 = vpop.f32.mrf.mxu0 }
 0x275   : > { %v3705_v9 = vpop.f32.mrf.mxu3  ;;  %v2769_v58 = vpop.f32.mrf.mxu1 }
 0x276   : > { %v4262_v50 = vmax.f32 %v4230_v52, 0.0  ;;  %v3761_v36 = vadd.f32 %v3705_v9, %v3107_v55  ;;  %v2822_v15 = vadd.f32 %v2769_v58, %v6045_v2 }
 0x278   : > { %v4294_v11 = vpack.c.bf16 %v4262_v50, %v4262_v50  ;;  %v4159_v7 = vadd.f32 %v4103_v25, %v3761_v36  ;;  %v3053_v61 = vpop.f32.mrf.mxu2 }
 0x279   : > { %v3108_v35 = vadd.f32 %v3053_v61, %v2821_v27 }
 0x27a   : > { %4327 = vst.msk [vmem:[%s6367_s25 + $0x3c] sm:$0xf] %vm4311_vm8, %v4294_v11  ;;  %v4195_v34 = vmul.f32 %v6331_v19, %v4159_v7 }
 0x27c   : > { %v4231_v31 = vadd.f32 %v6340_v39, %v4195_v34  ;;  %v4105_v59 = vpop.f32.mrf.mxu0 }
 0x27d   : > { %v3707_v43 = vpop.f32.mrf.mxu3  ;;  %v2771_v54 = vpop.f32.mrf.mxu1 }
 0x27e   : > { %v4263_v13 = vmax.f32 %v4231_v31, 0.0  ;;  %v3762_v1 = vadd.f32 %v3707_v43, %v3108_v35  ;;  %v2823_v29 = vadd.f32 %v2771_v54, %v6069_v26 }
 0x280   : > { %v4295_v53 = vpack.c.bf16 %v4263_v13, %v4263_v13  ;;  %v4160_v16 = vadd.f32 %v4105_v59, %v3762_v1  ;;  %v3056_v18 = vpop.f32.mrf.mxu2 }
 0x281   : > { %v3109_v39 = vadd.f32 %v3056_v18, %v2822_v15 }
 0x282   : > { %4328 = vst.msk [vmem:[%s6367_s25 + $0x40] sm:$0xf] %vm4311_vm8, %v4295_v53  ;;  %v4196_v19 = vmul.f32 %v6648_v3, %v4160_v16 }
 0x284   : > { %v4232_v6 = vadd.f32 %v6654_v33, %v4196_v19  ;;  %v4108_v2 = vpop.f32.mrf.mxu0 }
 0x285   : > { %v3710_v48 = vpop.f32.mrf.mxu3  ;;  %v2774_v24 = vpop.f32.mrf.mxu1 }
 0x286   : > { %v4264_v42 = vmax.f32 %v4232_v6, 0.0  ;;  %v3763_v20 = vadd.f32 %v3710_v48, %v3109_v39  ;;  %v2824_v38 = vadd.f32 %v2774_v24, %v6088_v60 }
 0x288   : > { %v4296_v28 = vpack.c.bf16 %v4264_v42, %v4264_v42  ;;  %v4161_v57 = vadd.f32 %v4108_v2, %v3763_v20  ;;  %v3058_v56 = vpop.f32.mrf.mxu2 }
 0x289   : > { %v3110_v12 = vadd.f32 %v3058_v56, %v2823_v29 }
 0x28a   : > { %4329 = vst.msk [vmem:[%s6367_s25 + $0x44] sm:$0xf] %vm4311_vm8, %v4296_v28  ;;  %v4197_v51 = vmul.f32 %v6648_v3, %v4161_v57 }
 0x28c   : > { %v4233_v40 = vadd.f32 %v6654_v33, %v4197_v51  ;;  %v4110_v10 = vpop.f32.mrf.mxu0 }
 0x28d   : > { %v3712_v62 = vpop.f32.mrf.mxu3  ;;  %v2776_v63 = vpop.f32.mrf.mxu1 }
 0x28e   : > { %v4265_v47 = vmax.f32 %v4233_v40, 0.0  ;;  %v3764_v22 = vadd.f32 %v3712_v62, %v3110_v12  ;;  %v2825_v36 = vadd.f32 %v2776_v63, %v6112_v14 }
 0x290   : > { %v4297_v41 = vpack.c.bf16 %v4265_v47, %v4265_v47  ;;  %v4162_v32 = vadd.f32 %v4110_v10, %v3764_v22  ;;  %v3061_v4 = vpop.f32.mrf.mxu2 }
 0x291   : > { %v3111_v0 = vadd.f32 %v3061_v4, %v2824_v38 }
 0x292   : > { %4330 = vst.msk [vmem:[%s6367_s25 + $0x48] sm:$0xf] %vm4311_vm8, %v4297_v41  ;;  %v4198_v26 = vmul.f32 %v6648_v3, %v4162_v32 }
 0x294   : > { %v4234_v45 = vadd.f32 %v6654_v33, %v4198_v26  ;;  %v4113_v37 = vpop.f32.mrf.mxu0 }
 0x295   : > { %v3715_v55 = vpop.f32.mrf.mxu3  ;;  %v2779_v52 = vpop.f32.mrf.mxu1 }
 0x296   : > { %v4266_v25 = vmax.f32 %v4234_v45, 0.0  ;;  %v3765_v9 = vadd.f32 %v3715_v55, %v3111_v0  ;;  %v2826_v13 = vadd.f32 %v2779_v52, %v6131_v21 }
 0x298   : > { %v4298_v58 = vpack.c.bf16 %v4266_v25, %v4266_v25  ;;  %v4163_v50 = vadd.f32 %v4113_v37, %v3765_v9  ;;  %v3063_v11 = vpop.f32.mrf.mxu2  ;;  %v6751_v37 = vld [vmem:[#allocation4_spill] sm:$0xff] }
 0x299   : > { %v3112_v7 = vadd.f32 %v3063_v11, %v2825_v36 }
 0x29a   : > { %4331 = vst.msk [vmem:[%s6367_s25 + $0x4c] sm:$0xf] %vm4311_vm8, %v4298_v58  ;;  %v4199_v60 = vmul.f32 %v6648_v3, %v4163_v50 }
 0x29c   : > { %v4235_v27 = vadd.f32 %v6654_v33, %v4199_v60  ;;  %v4115_v61 = vpop.f32.mrf.mxu0 }
 0x29d   : > { %v3717_v34 = vpop.f32.mrf.mxu3  ;;  %v2781_v35 = vpop.f32.mrf.mxu1 }
 0x29e   : > { %v4267_v31 = vmax.f32 %v4235_v27, 0.0  ;;  %v3766_v59 = vadd.f32 %v3717_v34, %v3112_v7  ;;  %v2827_v24 = vadd.f32 %v2781_v35, %v6155_v49 }
 0x2a0   : > { %v4299_v43 = vpack.c.bf16 %v4267_v31, %v4267_v31  ;;  %v4164_v54 = vadd.f32 %v4115_v61, %v3766_v59  ;;  %v3066_v1 = vpop.f32.mrf.mxu2 }
 0x2a1   : > { %v3113_v53 = vadd.f32 %v3066_v1, %v2826_v13 }
 0x2a2   : > { %4332 = vst.msk [vmem:[%s6367_s25 + $0x50] sm:$0xf] %vm4311_vm8, %v4299_v43  ;;  %v4200_v14 = vmul.f32 %v6648_v3, %v4164_v54 }
 0x2a4   : > { %v4236_v16 = vadd.f32 %v6654_v33, %v4200_v14  ;;  %v4118_v15 = vpop.f32.mrf.mxu0 }
 0x2a5   : > { %v3720_v18 = vpop.f32.mrf.mxu3  ;;  %v2784_v19 = vpop.f32.mrf.mxu1 }
 0x2a6   : > { %v4268_v39 = vmax.f32 %v4236_v16, 0.0  ;;  %v3767_v6 = vadd.f32 %v3720_v18, %v3113_v53  ;;  %v2828_v62 = vadd.f32 %v2784_v19, %v6174_v17 }
 0x2a8   : > { %v4300_v2 = vpack.c.bf16 %v4268_v39, %v4268_v39  ;;  %v4165_v48 = vadd.f32 %v4118_v15, %v3767_v6  ;;  %v3068_v42 = vpop.f32.mrf.mxu2 }
 0x2a9   : > { %v3114_v20 = vadd.f32 %v3068_v42, %v2827_v24 }
 0x2aa   : > { %4333 = vst.msk [vmem:[%s6367_s25 + $0x54] sm:$0xf] %vm4311_vm8, %v4300_v2  ;;  %v4201_v21 = vmul.f32 %v6648_v3, %v4165_v48 }
 0x2ac   : > { %v4237_v28 = vadd.f32 %v6654_v33, %v4201_v21  ;;  %v4120_v57 = vpop.f32.mrf.mxu0 }
 0x2ad   : > { %v3722_v29 = vpop.f32.mrf.mxu3  ;;  %v2786_v56 = vpop.f32.mrf.mxu1 }
 0x2ae   : > { %v4269_v51 = vmax.f32 %v4237_v28, 0.0  ;;  %v3768_v12 = vadd.f32 %v3722_v29, %v3114_v20  ;;  %v2829_v55 = vadd.f32 %v2786_v56, %v6751_v37 }
 0x2b0   : > { %v4301_v40 = vpack.c.bf16 %v4269_v51, %v4269_v51  ;;  %v4166_v10 = vadd.f32 %v4120_v57, %v3768_v12  ;;  %v3071_v63 = vpop.f32.mrf.mxu2 }
 0x2b1   : > { %v3115_v47 = vadd.f32 %v3071_v63, %v2828_v62 }
 0x2b2   : > { %4334 = vst.msk [vmem:[%s6367_s25 + $0x58] sm:$0xf] %vm4311_vm8, %v4301_v40  ;;  %v4202_v49 = vmul.f32 %v6648_v3, %v4166_v10 }
 0x2b4   : > { %v4238_v22 = vadd.f32 %v6654_v33, %v4202_v49  ;;  %v4123_v41 = vpop.f32.mrf.mxu0 }
 0x2b5   : > { %v3725_v32 = vpop.f32.mrf.mxu3  ;;  %v2789_v38 = vpop.f32.mrf.mxu1 }
 0x2b6   : > { %v4270_v4 = vmax.f32 %v4238_v22, 0.0  ;;  %v3769_v26 = vadd.f32 %v3725_v32, %v3115_v47  ;;  %v2830_v61 = vadd.f32 %v2789_v38, %v6215_v44 }
 0x2b8   : > { %v4302_v0 = vpack.c.bf16 %v4270_v4, %v4270_v4  ;;  %v4167_v45 = vadd.f32 %v4123_v41, %v3769_v26  ;;  %v3073_v52 = vpop.f32.mrf.mxu2 }
 0x2b9   : > { %v3116_v25 = vadd.f32 %v3073_v52, %v2829_v55 }
 0x2ba   : > { %4335 = vst.msk [vmem:[%s6367_s25 + $0x5c] sm:$0xf] %vm4311_vm8, %v4302_v0  ;;  %v4203_v17 = vmul.f32 %v6648_v3, %v4167_v45 }
 0x2bc   : > { %v4239_v9 = vadd.f32 %v6654_v33, %v4203_v17  ;;  %v4125_v58 = vpop.f32.mrf.mxu0 }
 0x2bd   : > { %v3727_v50 = vpop.f32.mrf.mxu3  ;;  %v2791_v36 = vpop.f32.mrf.mxu1 }
 0x2be   : > { %v4271_v11 = vmax.f32 %v4239_v9, 0.0  ;;  %v3770_v60 = vadd.f32 %v3727_v50, %v3116_v25  ;;  %v2831_v15 = vadd.f32 %v2791_v36, %v6236_v8 }
 0x2c0   : > { %v4303_v7 = vpack.c.bf16 %v4271_v11, %v4271_v11  ;;  %v4168_v27 = vadd.f32 %v4125_v58, %v3770_v60  ;;  %v3076_v34 = vpop.f32.mrf.mxu2 }
 0x2c1   : > { %v3117_v31 = vadd.f32 %v3076_v34, %v2830_v61 }
 0x2c2   : > { %4336 = vst.msk [vmem:[%s6367_s25 + $0x60] sm:$0xf] %vm4311_vm8, %v4303_v7  ;;  %v4204_v35 = vmul.f32 %v6648_v3, %v4168_v27 }
 0x2c4   : > { %v4240_v59 = vadd.f32 %v6654_v33, %v4204_v35  ;;  %v4128_v43 = vpop.f32.mrf.mxu0 }
 0x2c5   : > { %v3730_v54 = vpop.f32.mrf.mxu3  ;;  %v2794_v14 = vpop.f32.mrf.mxu1 }
 0x2c6   : > { %v4272_v13 = vmax.f32 %v4240_v59, 0.0  ;;  %v3771_v1 = vadd.f32 %v3730_v54, %v3117_v31  ;;  %v2832_v20 = vadd.f32 %v2794_v14, %v6254_v30 }
 0x2c8   : > { %v4304_v53 = vpack.c.bf16 %v4272_v13, %v4272_v13  ;;  %v4169_v16 = vadd.f32 %v4128_v43, %v3771_v1  ;;  %v3078_v18 = vpop.f32.mrf.mxu2 }
 0x2c9   : > { %v3118_v19 = vadd.f32 %v3078_v18, %v2831_v15 }
 0x2ca   : > { %4337 = vst.msk [vmem:[%s6367_s25 + $0x64] sm:$0xf] %vm4311_vm8, %v4304_v53  ;;  %v4205_v44 = vmul.f32 %v6648_v3, %v4169_v16 }
 0x2cc   : > { %v4241_v39 = vadd.f32 %v6654_v33, %v4205_v44  ;;  %v4130_v6 = vpop.f32.mrf.mxu0 }
 0x2cd   : > { %v3732_v2 = vpop.f32.mrf.mxu3  ;;  %v2796_v57 = vpop.f32.mrf.mxu1 }
 0x2ce   : > { %v4273_v48 = vmax.f32 %v4241_v39, 0.0  ;;  %v3772_v24 = vadd.f32 %v3732_v2, %v3118_v19  ;;  %v2833_v49 = vadd.f32 %v2796_v57, %v6280_v23 }
 0x2d0   : > { %v4305_v42 = vpack.c.bf16 %v4273_v48, %v4273_v48  ;;  %v4170_v21 = vadd.f32 %v4130_v6, %v3772_v24  ;;  %v3081_v28 = vpop.f32.mrf.mxu2 }
 0x2d1   : > { %v3119_v29 = vadd.f32 %v3081_v28, %v2832_v20 }
 0x2d2   : > { %4338 = vst.msk [vmem:[%s6367_s25 + $0x68] sm:$0xf] %vm4311_vm8, %v4305_v42  ;;  %v4206_v8 = vmul.f32 %v6648_v3, %v4170_v21 }
 0x2d4   : > { %v4242_v56 = vadd.f32 %v6654_v33, %v4206_v8  ;;  %v4133_v51 = vpop.f32.mrf.mxu0 }
 0x2d5   : > { %v3735_v12 = vpop.f32.mrf.mxu3  ;;  %v2799_v41 = vpop.f32.mrf.mxu1 }
 0x2d6   : > { %v4274_v40 = vmax.f32 %v4242_v56, 0.0  ;;  %v3773_v10 = vadd.f32 %v3735_v12, %v3119_v29  ;;  %v2834_v55 = vadd.f32 %v2799_v41, %v6297_v5 }
 0x2d8   : > { %v4306_v62 = vpack.c.bf16 %v4274_v40, %v4274_v40  ;;  %v4171_v63 = vadd.f32 %v4133_v51, %v3773_v10  ;;  %v3083_v47 = vpop.f32.mrf.mxu2 }
 0x2d9   : > { %v3120_v22 = vadd.f32 %v3083_v47, %v2833_v49 }
 0x2da   : > { %4339 = vst.msk [vmem:[%s6367_s25 + $0x6c] sm:$0xf] %vm4311_vm8, %v4306_v62  ;;  %v4207_v30 = vmul.f32 %v6648_v3, %v4171_v63 }
 0x2dc   : > { %v4243_v32 = vadd.f32 %v6654_v33, %v4207_v30  ;;  %v4135_v38 = vpop.f32.mrf.mxu0 }
 0x2dd   : > { %v3737_v4 = vpop.f32.mrf.mxu3  ;;  %v2801_v9 = vpop.f32.mrf.mxu1 }
 0x2de   : > { %v4275_v26 = vmax.f32 %v4243_v32, 0.0  ;;  %v3774_v0 = vadd.f32 %v3737_v4, %v3120_v22  ;;  %v2835_v27 = vadd.f32 %v2801_v9, %v6320_v46 }
 0x2e0   : > { %v4307_v45 = vpack.c.bf16 %v4275_v26, %v4275_v26  ;;  %v4172_v37 = vadd.f32 %v4135_v38, %v3774_v0  ;;  %v3086_v52 = vpop.f32.mrf.mxu2 }
 0x2e1   : > { %v3121_v17 = vadd.f32 %v3086_v52, %v2834_v55 }
 0x2e2   : > { %4340 = vst.msk [vmem:[%s6367_s25 + $0x70] sm:$0xf] %vm4311_vm8, %v4307_v45  ;;  %v4208_v23 = vmul.f32 %v6648_v3, %v4172_v37 }
 0x2e4   : > { %v4244_v25 = vadd.f32 %v6654_v33, %v4208_v23  ;;  %v4138_v58 = vpop.f32.mrf.mxu0 }
 0x2e5   : > { %v3740_v50 = vpop.f32.mrf.mxu3 }
 0x2e6   : > { %v4276_v36 = vmax.f32 %v4244_v25, 0.0  ;;  %v3775_v11 = vadd.f32 %v3740_v50, %v3121_v17 }
 0x2e8   : > { %v4308_v60 = vpack.c.bf16 %v4276_v36, %v4276_v36  ;;  %v4173_v7 = vadd.f32 %v4138_v58, %v3775_v11  ;;  %v3088_v61 = vpop.f32.mrf.mxu2 }
 0x2e9   : > { %v3122_v34 = vadd.f32 %v3088_v61, %v2835_v27 }
 0x2ea   : > { %4341 = vst.msk [vmem:[%s6367_s25 + $0x74] sm:$0xf] %vm4311_vm8, %v4308_v60  ;;  %v4209_v5 = vmul.f32 %v6648_v3, %v4173_v7 }
 0x2ec   : > { %v4245_v35 = vadd.f32 %v6654_v33, %v4209_v5  ;;  %v4140_v54 = vpop.f32.mrf.mxu0 }
 0x2ed   : > { %v3742_v31 = vpop.f32.mrf.mxu3 }
 0x2ee   : > { %v4277_v59 = vmax.f32 %v4245_v35, 0.0  ;;  %v3776_v43 = vadd.f32 %v3742_v31, %v3122_v34 }
 0x2f0   : > { %v4309_v13 = vpack.c.bf16 %v4277_v59, %v4277_v59  ;;  %v4174_v1 = vadd.f32 %v4140_v54, %v3776_v43 }
 0x2f2   : > { %4342 = vst.msk [vmem:[%s6367_s25 + $0x78] sm:$0xf] %vm4311_vm8, %v4309_v13  ;;  %v4210_v14 = vmul.f32 %v6648_v3, %v4174_v1 }
 0x2f4   : > { %v4246_v46 = vadd.f32 %v6654_v33, %v4210_v14 }
 0x2f6   : > { %v4278_v53 = vmax.f32 %v4246_v46, 0.0 }
 0x2f8   : > { %v4310_v16 = vpack.c.bf16 %v4278_v53, %v4278_v53 }
 0x2fa   : > { %4343 = vst.msk [vmem:[%s6367_s25 + $0x7c] sm:$0xf] %vm4311_vm8, %v4310_v16 }
 0x2fb PF: > { %s14_s17 = sadd.s32 1, %s5211_s17   ;;  %s6752_s15 = smov %s5207_s16 }
 0x2fc   : > { %p11_p5 = scmp.ge.s32.totalorder %s14_s17, 4   ;;  %s6753_s16 = smov %s6755_s18 }
 0x2fe   :  { %13 = sbr.rel (!%p11_p5) target bundleno = 2 (0x2), region = 85 }

</bundles_post_ra>
